<compile_context>
chip_gen: v6e
topology: v6e:2x2x1
jax: 0.10.0
libtpu: 0.0.40
codegen_flags: <defaults>
</compile_context>

<pallas_src>
import functools

import jax
import jax.numpy as jnp
from jax.experimental import pallas as pl
from jax.experimental.pallas import tpu as pltpu


# ----------------------------- Pallas kernel ------------------------------- #

def _basic_block_kernel(x_ref, w1_ref, b1_ref, w2_ref, b2_ref, o_ref,
                        xpad_ref, midpad_ref, *, H, W, C, no_relu):
    """Fused conv3x3+bn(+relu) -> conv3x3+bn+residual(+relu) for one image.

    x_ref:      (1, C, H, W)      input block (NCHW)
    w1_ref:     (C, 9*C)          conv1 weight, BN1 scale folded, K tap-major
    b1_ref:     (C, 1)            folded BN1 bias
    w2_ref:     (C, 9*C)          conv2 weight, BN2 scale folded
    b2_ref:     (C, 1)            folded BN2 bias
    o_ref:      (1, C, H*W)       lane-dense flat output
    xpad_ref:   VMEM (C, H+2, W+2) scratch (zero-padded input)
    midpad_ref: VMEM (C, H+2, W+2) scratch (zero-padded intermediate)
    """
    HW = H * W
    x_in = x_ref[0]                                    # (C, H, W)

    # Halo handled in-kernel: zero the padded scratch, write the interior.
    xpad_ref[...] = jnp.zeros_like(xpad_ref)
    xpad_ref[:, 1:H + 1, 1:W + 1] = x_in.astype(xpad_ref.dtype)

    def im2col(pad_ref):
        # (9*C, H*W) patch matrix; K ordered tap-major (ky,kx) then channel.
        taps = []
        for ky in range(3):
            for kx in range(3):
                taps.append(pad_ref[:, ky:ky + H, kx:kx + W].reshape(C, HW))
        return jnp.concatenate(taps, axis=0)

    # conv1 + bn1 + relu : single MXU pass, output lanes = H*W (dense).
    p1 = im2col(xpad_ref)                              # (9C, HW)
    h = jnp.dot(w1_ref[...], p1, preferred_element_type=jnp.float32)
    h = jnp.maximum(h + b1_ref[...], 0.0)              # (C, HW)

    # Stage the intermediate (zero-padded) in VMEM for conv2's halo.
    midpad_ref[...] = jnp.zeros_like(midpad_ref)
    midpad_ref[:, 1:H + 1, 1:W + 1] = h.reshape(C, H, W).astype(midpad_ref.dtype)

    # conv2 + bn2 + residual (+ relu)
    p2 = im2col(midpad_ref)                            # (9C, HW)
    out = jnp.dot(w2_ref[...], p2, preferred_element_type=jnp.float32)
    out = out + b2_ref[...] + x_in.reshape(C, HW).astype(jnp.float32)
    if not no_relu:
        out = jnp.maximum(out, 0.0)
    o_ref[...] = out.reshape(1, C, HW).astype(o_ref.dtype)


# ------------------------------ JAX wrappers -------------------------------- #

def fold_bn(gamma, beta, running_mean, running_var, eps=1e-5):
    scale = gamma / jnp.sqrt(running_var + eps)
    bias = beta - running_mean * scale
    return scale, bias


def _fold_weight(w_hwio, scale):
    """(3,3,Cin,Cout) HWIO conv weight * per-Cout BN scale -> (Cout, 9*Cin)."""
    cin, cout = w_hwio.shape[2], w_hwio.shape[3]
    wf = (w_hwio * scale).reshape(9 * cin, cout)   # rows ordered tap-major, ci
    return wf.T.astype(jnp.float32)                # (Cout, 9*Cin)


def basic_block_forward(x_nchw, params, *, no_relu=False):
    """Pallas BasicBlock forward. Input/output are NCHW (PyTorch convention)."""
    N, C, H, W = x_nchw.shape
    w1, w2 = params["w1"], params["w2"]
    if w1.shape != (3, 3, C, C) or w2.shape != (3, 3, C, C):
        raise ValueError("fused kernel assumes stride=1, no downsample, "
                         "inplanes == planes")
    HW = H * W

    w1f = _fold_weight(w1, params["scale1"])
    w2f = _fold_weight(w2, params["scale2"])
    b1 = params["bias1"].reshape(C, 1).astype(jnp.float32)
    b2 = params["bias2"].reshape(C, 1).astype(jnp.float32)

    kern = functools.partial(_basic_block_kernel, H=H, W=W, C=C,
                             no_relu=no_relu)
    itemsize = 4
    cost = pl.CostEstimate(
        flops=2 * 2 * 9 * HW * C * C * N,          # two 3x3 convs per image
        transcendentals=0,
        bytes_accessed=(x_nchw.size + N * C * HW
                        + w1f.size + w2f.size + 2 * C) * itemsize)

    out_flat = pl.pallas_call(
        kern,
        out_shape=jax.ShapeDtypeStruct((N, C, HW), x_nchw.dtype),
        grid=(N,),
        in_specs=[
            pl.BlockSpec((1, C, H, W), lambda n: (n, 0, 0, 0)),
            pl.BlockSpec((C, 9 * C), lambda n: (0, 0)),
            pl.BlockSpec((C, 1), lambda n: (0, 0)),
            pl.BlockSpec((C, 9 * C), lambda n: (0, 0)),
            pl.BlockSpec((C, 1), lambda n: (0, 0)),
        ],
        out_specs=pl.BlockSpec((1, C, HW), lambda n: (n, 0, 0)),
        scratch_shapes=[
            pltpu.VMEM((C, H + 2, W + 2), jnp.float32),
            pltpu.VMEM((C, H + 2, W + 2), jnp.float32),
        ],
        compiler_params=pltpu.CompilerParams(
            dimension_semantics=("parallel",)),
        cost_estimate=cost,
    )(x_nchw, w1f, b1, w2f, b2)

    return out_flat.reshape(N, C, H, W)


# ---------------------------- pure-JAX reference ---------------------------- #

def basic_block_reference(x_nchw, params, *, no_relu=False):
    x = jnp.transpose(x_nchw, (0, 2, 3, 1))
    dn = jax.lax.conv_dimension_numbers(x.shape, params["w1"].shape,
                                        ("NHWC", "HWIO", "NHWC"))
    out = jax.lax.conv_general_dilated(x, params["w1"], (1, 1), "SAME",
                                       dimension_numbers=dn)
    out = out * params["scale1"] + params["bias1"]
    out = jnp.maximum(out, 0.0)
    out = jax.lax.conv_general_dilated(out, params["w2"], (1, 1), "SAME",
                                       dimension_numbers=dn)
    out = out * params["scale2"] + params["bias2"]
    out = out + x
    if not no_relu:
        out = jnp.maximum(out, 0.0)
    return jnp.transpose(out, (0, 3, 1, 2))


# ---------------------------------- main ------------------------------------ #

if __name__ == "__main__":
    # Small shapes consistent with BasicBlock(inplanes=4, planes=4, stride=1).
    N, C, H, W = 2, 4, 16, 16
    inplanes = planes = C

    key = jax.random.PRNGKey(0)
    k = jax.random.split(key, 10)

    # conv weights (PyTorch stores OIHW; we build HWIO directly, deterministic).
    w1 = 0.1 * jax.random.normal(k[0], (3, 3, inplanes, planes), jnp.float32)
    w2 = 0.1 * jax.random.normal(k[1], (3, 3, planes, planes), jnp.float32)

    # BatchNorm parameters + running statistics (eval mode), folded to scale/bias.
    g1 = 1.0 + 0.1 * jax.random.normal(k[2], (planes,), jnp.float32)
    b1 = 0.1 * jax.random.normal(k[3], (planes,), jnp.float32)
    m1 = 0.1 * jax.random.normal(k[4], (planes,), jnp.float32)
    v1 = jnp.abs(1.0 + 0.1 * jax.random.normal(k[5], (planes,), jnp.float32))
    g2 = 1.0 + 0.1 * jax.random.normal(k[6], (planes,), jnp.float32)
    b2 = 0.1 * jax.random.normal(k[7], (planes,), jnp.float32)
    m2 = 0.1 * jax.random.normal(k[8], (planes,), jnp.float32)
    v2 = jnp.abs(1.0 + 0.1 * jax.random.normal(k[9], (planes,), jnp.float32))

    scale1, bias1 = fold_bn(g1, b1, m1, v1)
    scale2, bias2 = fold_bn(g2, b2, m2, v2)

    params = dict(w1=w1, w2=w2, scale1=scale1, bias1=bias1,
                  scale2=scale2, bias2=bias2)

    x = jax.random.normal(jax.random.PRNGKey(42), (N, C, H, W), jnp.float32)

    out = jax.block_until_ready(basic_block_forward(x, params, no_relu=False))
    ref = jax.block_until_ready(basic_block_reference(x, params, no_relu=False))

    assert out.shape == (N, C, H, W), out.shape
    assert jnp.allclose(out, ref, atol=1e-4, rtol=1e-4), (
        float(jnp.max(jnp.abs(out - ref))))

    print("KERNEL_OK")
</pallas_src>

<mosaic_0001>
module attributes {stable_mosaic.version = 11 : i64} {
  func.func @_basic_block_kernel(%arg0: i32, %arg1: memref<1x4x16x16xf32, #tpu.memory_space<vmem>>, %arg2: memref<4x36xf32, #tpu.memory_space<vmem>>, %arg3: memref<4x1xf32, #tpu.memory_space<vmem>>, %arg4: memref<4x36xf32, #tpu.memory_space<vmem>>, %arg5: memref<4x1xf32, #tpu.memory_space<vmem>>, %arg6: memref<1x4x256xf32, #tpu.memory_space<vmem>>, %arg7: memref<4x18x18xf32, #tpu.memory_space<vmem>>, %arg8: memref<4x18x18xf32, #tpu.memory_space<vmem>>) attributes {dimension_semantics = [#tpu.dimension_semantics<parallel>], iteration_bounds = array<i64: 2>, scalar_prefetch = 0 : i64, scratch_operands = 2 : i64, tpu.core_type = #tpu.core_type<tc>, window_params = [{transform_indices = @transform_0, window_bounds = array<i64: 1, 4, 16, 16>}, {pipeline_mode = #tpu.pipeline_mode<synchronous>, transform_indices = @transform_1, window_bounds = array<i64: 4, 36>}, {pipeline_mode = #tpu.pipeline_mode<synchronous>, transform_indices = @transform_2, window_bounds = array<i64: 4, 1>}, {pipeline_mode = #tpu.pipeline_mode<synchronous>, transform_indices = @transform_3, window_bounds = array<i64: 4, 36>}, {pipeline_mode = #tpu.pipeline_mode<synchronous>, transform_indices = @transform_4, window_bounds = array<i64: 4, 1>}, {transform_indices = @transform_5, window_bounds = array<i64: 1, 4, 256>}]} {
    %c0 = arith.constant 0 : index
    %c0_0 = arith.constant 0 : index
    %c0_1 = arith.constant 0 : index
    %c0_2 = arith.constant 0 : index
    %0 = vector.load %arg1[%c0, %c0_0, %c0_1, %c0_2] : memref<1x4x16x16xf32, #tpu.memory_space<vmem>>, vector<1x4x16x16xf32>
    %1 = vector.shape_cast %0 : vector<1x4x16x16xf32> to vector<4x16x16xf32>
    %cst = arith.constant 0.000000e+00 : f32
    %2 = vector.broadcast %cst : f32 to vector<4x18x18xf32>
    %c0_3 = arith.constant 0 : index
    %c0_4 = arith.constant 0 : index
    %c0_5 = arith.constant 0 : index
    %3 = vector.load %arg7[%c0_3, %c0_4, %c0_5] : memref<4x18x18xf32, #tpu.memory_space<vmem>>, vector<4x18x18xf32>
    tpu.vector_store %arg7[%c0_3, %c0_4, %c0_5], %2 {strides = array<i32>} : memref<4x18x18xf32, #tpu.memory_space<vmem>>, vector<4x18x18xf32>,
    %c0_6 = arith.constant 0 : index
    %c1 = arith.constant 1 : index
    %c1_7 = arith.constant 1 : index
    %4 = vector.load %arg7[%c0_6, %c1, %c1_7] : memref<4x18x18xf32, #tpu.memory_space<vmem>>, vector<4x16x16xf32>
    tpu.vector_store %arg7[%c0_6, %c1, %c1_7], %1 {strides = array<i32>} : memref<4x18x18xf32, #tpu.memory_space<vmem>>, vector<4x16x16xf32>,
    %c0_8 = arith.constant 0 : index
    %c0_9 = arith.constant 0 : index
    %c0_10 = arith.constant 0 : index
    %5 = vector.load %arg7[%c0_8, %c0_9, %c0_10] : memref<4x18x18xf32, #tpu.memory_space<vmem>>, vector<4x16x16xf32>
    %6 = vector.shape_cast %5 : vector<4x16x16xf32> to vector<4x256xf32>
    %c0_11 = arith.constant 0 : index
    %c0_12 = arith.constant 0 : index
    %c1_13 = arith.constant 1 : index
    %7 = vector.load %arg7[%c0_11, %c0_12, %c1_13] : memref<4x18x18xf32, #tpu.memory_space<vmem>>, vector<4x16x16xf32>
    %8 = vector.shape_cast %7 : vector<4x16x16xf32> to vector<4x256xf32>
    %c0_14 = arith.constant 0 : index
    %c0_15 = arith.constant 0 : index
    %c2 = arith.constant 2 : index
    %9 = vector.load %arg7[%c0_14, %c0_15, %c2] : memref<4x18x18xf32, #tpu.memory_space<vmem>>, vector<4x16x16xf32>
    %10 = vector.shape_cast %9 : vector<4x16x16xf32> to vector<4x256xf32>
    %c0_16 = arith.constant 0 : index
    %c1_17 = arith.constant 1 : index
    %c0_18 = arith.constant 0 : index
    %11 = vector.load %arg7[%c0_16, %c1_17, %c0_18] : memref<4x18x18xf32, #tpu.memory_space<vmem>>, vector<4x16x16xf32>
    %12 = vector.shape_cast %11 : vector<4x16x16xf32> to vector<4x256xf32>
    %c0_19 = arith.constant 0 : index
    %c1_20 = arith.constant 1 : index
    %c1_21 = arith.constant 1 : index
    %13 = vector.load %arg7[%c0_19, %c1_20, %c1_21] : memref<4x18x18xf32, #tpu.memory_space<vmem>>, vector<4x16x16xf32>
    %14 = vector.shape_cast %13 : vector<4x16x16xf32> to vector<4x256xf32>
    %c0_22 = arith.constant 0 : index
    %c1_23 = arith.constant 1 : index
    %c2_24 = arith.constant 2 : index
    %15 = vector.load %arg7[%c0_22, %c1_23, %c2_24] : memref<4x18x18xf32, #tpu.memory_space<vmem>>, vector<4x16x16xf32>
    %16 = vector.shape_cast %15 : vector<4x16x16xf32> to vector<4x256xf32>
    %c0_25 = arith.constant 0 : index
    %c2_26 = arith.constant 2 : index
    %c0_27 = arith.constant 0 : index
    %17 = vector.load %arg7[%c0_25, %c2_26, %c0_27] : memref<4x18x18xf32, #tpu.memory_space<vmem>>, vector<4x16x16xf32>
    %18 = vector.shape_cast %17 : vector<4x16x16xf32> to vector<4x256xf32>
    %c0_28 = arith.constant 0 : index
    %c2_29 = arith.constant 2 : index
    %c1_30 = arith.constant 1 : index
    %19 = vector.load %arg7[%c0_28, %c2_29, %c1_30] : memref<4x18x18xf32, #tpu.memory_space<vmem>>, vector<4x16x16xf32>
    %20 = vector.shape_cast %19 : vector<4x16x16xf32> to vector<4x256xf32>
    %c0_31 = arith.constant 0 : index
    %c2_32 = arith.constant 2 : index
    %c2_33 = arith.constant 2 : index
    %21 = vector.load %arg7[%c0_31, %c2_32, %c2_33] : memref<4x18x18xf32, #tpu.memory_space<vmem>>, vector<4x16x16xf32>
    %22 = vector.shape_cast %21 : vector<4x16x16xf32> to vector<4x256xf32>
    %23 = tpu.concatenate %6, %8, %10, %12, %14, %16, %18, %20, %22 in 0 : vector<4x256xf32>, vector<4x256xf32>, vector<4x256xf32>, vector<4x256xf32>, vector<4x256xf32>, vector<4x256xf32>, vector<4x256xf32>, vector<4x256xf32>, vector<4x256xf32> -> vector<36x256xf32>
    %c0_34 = arith.constant 0 : index
    %c0_35 = arith.constant 0 : index
    %24 = vector.load %arg2[%c0_34, %c0_35] : memref<4x36xf32, #tpu.memory_space<vmem>>, vector<4x36xf32>
    %cst_36 = arith.constant dense<0.000000e+00> : vector<4x256xf32>
    %25 = tpu.matmul %24, %23, %cst_36 {dimension_numbers = #tpu.dot_dimension_numbers<[1], [0], [0], [1], [0, 0, 1, 1], [], []>} : vector<4x36xf32>, vector<36x256xf32>, vector<4x256xf32> -> vector<4x256xf32>
    %c0_37 = arith.constant 0 : index
    %c0_38 = arith.constant 0 : index
    %26 = vector.load %arg3[%c0_37, %c0_38] : memref<4x1xf32, #tpu.memory_space<vmem>>, vector<4x1xf32>
    %27 = vector.broadcast %26 : vector<4x1xf32> to vector<4x256xf32>
    %28 = arith.addf %25, %27 : vector<4x256xf32>
    %cst_39 = arith.constant 0.000000e+00 : f32
    %29 = vector.broadcast %cst_39 : f32 to vector<4x256xf32>
    %30 = arith.maximumf %28, %29 : vector<4x256xf32>
    %cst_40 = arith.constant 0.000000e+00 : f32
    %31 = vector.broadcast %cst_40 : f32 to vector<4x18x18xf32>
    %c0_41 = arith.constant 0 : index
    %c0_42 = arith.constant 0 : index
    %c0_43 = arith.constant 0 : index
    %32 = vector.load %arg8[%c0_41, %c0_42, %c0_43] : memref<4x18x18xf32, #tpu.memory_space<vmem>>, vector<4x18x18xf32>
    tpu.vector_store %arg8[%c0_41, %c0_42, %c0_43], %31 {strides = array<i32>} : memref<4x18x18xf32, #tpu.memory_space<vmem>>, vector<4x18x18xf32>,
    %33 = vector.shape_cast %30 : vector<4x256xf32> to vector<4x16x16xf32>
    %c0_44 = arith.constant 0 : index
    %c1_45 = arith.constant 1 : index
    %c1_46 = arith.constant 1 : index
    %34 = vector.load %arg8[%c0_44, %c1_45, %c1_46] : memref<4x18x18xf32, #tpu.memory_space<vmem>>, vector<4x16x16xf32>
    tpu.vector_store %arg8[%c0_44, %c1_45, %c1_46], %33 {strides = array<i32>} : memref<4x18x18xf32, #tpu.memory_space<vmem>>, vector<4x16x16xf32>,
    %c0_47 = arith.constant 0 : index
    %c0_48 = arith.constant 0 : index
    %c0_49 = arith.constant 0 : index
    %35 = vector.load %arg8[%c0_47, %c0_48, %c0_49] : memref<4x18x18xf32, #tpu.memory_space<vmem>>, vector<4x16x16xf32>
    %36 = vector.shape_cast %35 : vector<4x16x16xf32> to vector<4x256xf32>
    %c0_50 = arith.constant 0 : index
    %c0_51 = arith.constant 0 : index
    %c1_52 = arith.constant 1 : index
    %37 = vector.load %arg8[%c0_50, %c0_51, %c1_52] : memref<4x18x18xf32, #tpu.memory_space<vmem>>, vector<4x16x16xf32>
    %38 = vector.shape_cast %37 : vector<4x16x16xf32> to vector<4x256xf32>
    %c0_53 = arith.constant 0 : index
    %c0_54 = arith.constant 0 : index
    %c2_55 = arith.constant 2 : index
    %39 = vector.load %arg8[%c0_53, %c0_54, %c2_55] : memref<4x18x18xf32, #tpu.memory_space<vmem>>, vector<4x16x16xf32>
    %40 = vector.shape_cast %39 : vector<4x16x16xf32> to vector<4x256xf32>
    %c0_56 = arith.constant 0 : index
    %c1_57 = arith.constant 1 : index
    %c0_58 = arith.constant 0 : index
    %41 = vector.load %arg8[%c0_56, %c1_57, %c0_58] : memref<4x18x18xf32, #tpu.memory_space<vmem>>, vector<4x16x16xf32>
    %42 = vector.shape_cast %41 : vector<4x16x16xf32> to vector<4x256xf32>
    %c0_59 = arith.constant 0 : index
    %c1_60 = arith.constant 1 : index
    %c1_61 = arith.constant 1 : index
    %43 = vector.load %arg8[%c0_59, %c1_60, %c1_61] : memref<4x18x18xf32, #tpu.memory_space<vmem>>, vector<4x16x16xf32>
    %44 = vector.shape_cast %43 : vector<4x16x16xf32> to vector<4x256xf32>
    %c0_62 = arith.constant 0 : index
    %c1_63 = arith.constant 1 : index
    %c2_64 = arith.constant 2 : index
    %45 = vector.load %arg8[%c0_62, %c1_63, %c2_64] : memref<4x18x18xf32, #tpu.memory_space<vmem>>, vector<4x16x16xf32>
    %46 = vector.shape_cast %45 : vector<4x16x16xf32> to vector<4x256xf32>
    %c0_65 = arith.constant 0 : index
    %c2_66 = arith.constant 2 : index
    %c0_67 = arith.constant 0 : index
    %47 = vector.load %arg8[%c0_65, %c2_66, %c0_67] : memref<4x18x18xf32, #tpu.memory_space<vmem>>, vector<4x16x16xf32>
    %48 = vector.shape_cast %47 : vector<4x16x16xf32> to vector<4x256xf32>
    %c0_68 = arith.constant 0 : index
    %c2_69 = arith.constant 2 : index
    %c1_70 = arith.constant 1 : index
    %49 = vector.load %arg8[%c0_68, %c2_69, %c1_70] : memref<4x18x18xf32, #tpu.memory_space<vmem>>, vector<4x16x16xf32>
    %50 = vector.shape_cast %49 : vector<4x16x16xf32> to vector<4x256xf32>
    %c0_71 = arith.constant 0 : index
    %c2_72 = arith.constant 2 : index
    %c2_73 = arith.constant 2 : index
    %51 = vector.load %arg8[%c0_71, %c2_72, %c2_73] : memref<4x18x18xf32, #tpu.memory_space<vmem>>, vector<4x16x16xf32>
    %52 = vector.shape_cast %51 : vector<4x16x16xf32> to vector<4x256xf32>
    %53 = tpu.concatenate %36, %38, %40, %42, %44, %46, %48, %50, %52 in 0 : vector<4x256xf32>, vector<4x256xf32>, vector<4x256xf32>, vector<4x256xf32>, vector<4x256xf32>, vector<4x256xf32>, vector<4x256xf32>, vector<4x256xf32>, vector<4x256xf32> -> vector<36x256xf32>
    %c0_74 = arith.constant 0 : index
    %c0_75 = arith.constant 0 : index
    %54 = vector.load %arg4[%c0_74, %c0_75] : memref<4x36xf32, #tpu.memory_space<vmem>>, vector<4x36xf32>
    %cst_76 = arith.constant dense<0.000000e+00> : vector<4x256xf32>
    %55 = tpu.matmul %54, %53, %cst_76 {dimension_numbers = #tpu.dot_dimension_numbers<[1], [0], [0], [1], [0, 0, 1, 1], [], []>} : vector<4x36xf32>, vector<36x256xf32>, vector<4x256xf32> -> vector<4x256xf32>
    %c0_77 = arith.constant 0 : index
    %c0_78 = arith.constant 0 : index
    %56 = vector.load %arg5[%c0_77, %c0_78] : memref<4x1xf32, #tpu.memory_space<vmem>>, vector<4x1xf32>
    %57 = vector.broadcast %56 : vector<4x1xf32> to vector<4x256xf32>
    %58 = arith.addf %55, %57 : vector<4x256xf32>
    %59 = vector.shape_cast %1 : vector<4x16x16xf32> to vector<4x256xf32>
    %60 = arith.addf %58, %59 : vector<4x256xf32>
    %cst_79 = arith.constant 0.000000e+00 : f32
    %61 = vector.broadcast %cst_79 : f32 to vector<4x256xf32>
    %62 = arith.maximumf %60, %61 : vector<4x256xf32>
    %63 = vector.shape_cast %62 : vector<4x256xf32> to vector<1x4x256xf32>
    %c0_80 = arith.constant 0 : index
    %c0_81 = arith.constant 0 : index
    %c0_82 = arith.constant 0 : index
    %64 = vector.load %arg6[%c0_80, %c0_81, %c0_82] : memref<1x4x256xf32, #tpu.memory_space<vmem>>, vector<1x4x256xf32>
    tpu.vector_store %arg6[%c0_80, %c0_81, %c0_82], %63 {strides = array<i32>} : memref<1x4x256xf32, #tpu.memory_space<vmem>>, vector<1x4x256xf32>,
    return
  }
  func.func @transform_0(%arg0: i32) -> (i32, i32, i32, i32) {
    %c0_i32 = arith.constant 0 : i32
    %c0_i32_0 = arith.constant 0 : i32
    %c0_i32_1 = arith.constant 0 : i32
    %c0_i32_2 = arith.constant 0 : i32
    return %arg0, %c0_i32, %c0_i32_0, %c0_i32_1 : i32, i32, i32, i32
  }
  func.func @transform_1(%arg0: i32) -> (i32, i32) {
    %c0_i32 = arith.constant 0 : i32
    %c0_i32_0 = arith.constant 0 : i32
    %c0_i32_1 = arith.constant 0 : i32
    return %c0_i32, %c0_i32_0 : i32, i32
  }
  func.func @transform_2(%arg0: i32) -> (i32, i32) {
    %c0_i32 = arith.constant 0 : i32
    %c0_i32_0 = arith.constant 0 : i32
    %c0_i32_1 = arith.constant 0 : i32
    return %c0_i32, %c0_i32_0 : i32, i32
  }
  func.func @transform_3(%arg0: i32) -> (i32, i32) {
    %c0_i32 = arith.constant 0 : i32
    %c0_i32_0 = arith.constant 0 : i32
    %c0_i32_1 = arith.constant 0 : i32
    return %c0_i32, %c0_i32_0 : i32, i32
  }
  func.func @transform_4(%arg0: i32) -> (i32, i32) {
    %c0_i32 = arith.constant 0 : i32
    %c0_i32_0 = arith.constant 0 : i32
    %c0_i32_1 = arith.constant 0 : i32
    return %c0_i32, %c0_i32_0 : i32, i32
  }
  func.func @transform_5(%arg0: i32) -> (i32, i32, i32) {
    %c0_i32 = arith.constant 0 : i32
    %c0_i32_0 = arith.constant 0 : i32
    %c0_i32_1 = arith.constant 0 : i32
    return %arg0, %c0_i32, %c0_i32_0 : i32, i32, i32
  }
}

</mosaic_0001>

<bundles_post_ra>
// kernel: tpu_custom_call.1
= control target key start
LH: loop header
LB: loop body
LE: loop exit
PB: predicated region body
PF: predicated region fallthrough
CT: control target
= control target key end

     0   :  { %10 = vsyncpa [#allocation5], 0  ;;  %s8974_s0 = inlined_call_operand.hbm [shape: f32[2,4,16,16], index: 0, kind: input, shape index: {}]   ;;  %s8975_s1 = inlined_call_operand.vmem [shape: f32[4,36], index: 1, kind: input, shape index: {}]   ;;  %s8976_s2 = inlined_call_operand.vmem [shape: f32[4,1], index: 2, kind: input, shape index: {}]   ;;  %s8977_s3 = inlined_call_operand.vmem [shape: f32[4,36], index: 3, kind: input, shape index: {}]   ;;  %s8978_s4 = inlined_call_operand.vmem [shape: f32[4,1], index: 4, kind: input, shape index: {}]   ;;  %s8979_s5 = inlined_call_operand.hbm [shape: f32[2,4,256], index: 5, kind: output, shape index: {}]  }
   0x1   :  { %12 = vsyncpa [#allocation5 + $0x1], 0 }
   0x2   :  { %13 = vsyncpa [#allocation6], 0 }
   0x3   :  { %15 = vsyncpa [#allocation6 + $0x1], 0  ;;  %s5448_s18 = smov 0   ;;  %s5450_s19 = smov 0  }
   0x4   :  { %s5452_s20 = smov 0   ;;  %s5454_s21 = smov 0  }
   0x5 LB: > { %s5469_s22 = sadd.s32 4294967295, %s5398_s21   ;;  %s5179_s23 = sadd.s32 4294967294, %s5398_s21   ;;  %s5398_s21 = sphi %s5454_s21, %s9400_s21   ;;  %s5394_s20 = sphi %s5452_s20, %s9399_s20   ;;  %s5390_s19 = sphi %s5450_s19, %s9398_s19   ;;  %s5386_s18 = sphi %s5448_s18, %s9397_s18  }
   0x6   : > { %s5473_s24 = sadd.s32 1, %s5398_s21   ;;  %s28_s25 = sadd.s32 1, %s5394_s20 }
   0x7   : > { %s25_s26 = ssub.s32 %s5398_s21, %s5473_s24  ;;  %p35_p0 = scmp.ne.s32.totalorder %s5394_s20, %s5390_s19 }
   0x8   : > { %p26_p1 = scmp.eq.s32.totalorder %s25_s26, 0  ;;  %p36_p2 = scmp.eq.s32.totalorder %s5398_s21, 0 }
   0x9   : > { %p41_p3 = scmp.ne.s32.totalorder %s5390_s19, %s5386_s18  ;;  %p42_p4 = scmp.eq.s32.totalorder %s5469_s22, 0 }
   0xa   : > { %s5485_s27 = scalar_select %p26_p1, %s5394_s20, %s28_s25  }
   0xb   : > { %p5487_p5 = por %p36_p2, %p35_p0  ;;  %p5491_p6 = por %p42_p4, %p41_p3 }
   0xc   : > { %p149_p7 = scmp.eq.s32.totalorder %s5469_s22, 1  ;;  %p155_p8 = scmp.eq.s32.totalorder %s5179_s23, 1 }
   0xd   : > { %s9079_s29 = scalar_select %p5491_p6, 1, 0 }
   0xe   : > { %p5213_p10 = scmp.lt.s32.totalorder %s5398_s21, 2  ;;  %p5498_p11 = por %p149_p7, %p35_p0 }
   0xf   : > { %p5502_p12 = por %p155_p8, %p41_p3  ;;  %s187_s7 = sand.u32 1, %s5394_s20  }
  0x10   : > { %s9080_s30 = scalar_select %p5498_p11, 1, 0 }
  0x11   : > { %s9081_s6 = scalar_select %p5502_p12, 1, 0 }
  0x12   : > { %s5199_s8 = sshll.u32 %s5398_s21, 10  ;;  %s5182_s9 = sshll.u32 %s187_s7, 6 }
  0x13   : > { %s5511_s12 = scalar_lea.hbm %s8974_s0, %s5199_s8  ;;  %s191_s13 = scalar_lea.vmem [#allocation4], %s5182_s9 }
  0x14   : > { %s198_s14 = sshll.u32 %s191_s13, 4  ;;  %p5515_p13 = pnand %p5213_p10, %p5487_p5  ;;  %s5519_s14 = int_to_ptr.vmem [resolvable:$true] %s198_s14 }
  0x15   : > { %s5521_s16 = scalar_lea.sflag [#allocation5], %s187_s7  ;;  %s5306_s17 = scalar_lea.hbm %s5511_s12, 1024 }
  0x16   : > { %p5307_p0 = scmp.ne.s32.totalorder %s5511_s12, %s5306_s17  ;;  %p5308_p1 = pneg %p5515_p13 }
  0x17   : > { %s5311_s26 = scalar_lea.hbm %s8974_s0, 2048  ;;  %p5312_p4 = scmp.lt.s32.totalorder %s5511_s12, %s8974_s0 }
  0x18   : > { %p5309_p2 = pnand %p5308_p1, %p5307_p0  ;;  %p5313_p5 = scmp.lt.s32.totalorder %s5311_s26, %s5306_s17 }
  0x1a   : > { %p5310_p3 = pneg %p5309_p2  ;;  %p5314_p7 = por %p5313_p5, %p5312_p4 }
  0x1c   : > { %p5315_p8 = pnand %p5314_p7, %p5310_p3 }
  0x1e   : > { %5318 = shalt.err (!%p5315_p8)
}
  0x1f   : > { %s5319_s7 = scalar_lea.vmem %s5519_s14, 1024  ;;  %s5400_s9 = smov [#allocation4]  }
  0x20   : > { %p5320_p10 = scmp.ne.s32.totalorder %s5519_s14, %s5319_s7  ;;  %s5324_s10 = sshll.u32 %s5400_s9, 4  ;;  %s5325_s10 = int_to_ptr.vmem [resolvable:$false] %s5324_s10 }
  0x21   : > { %s5326_s11 = scalar_lea.vmem %s5325_s10, 2048  ;;  %p5327_p2 = scmp.lt.s32.totalorder %s5519_s14, %s5325_s10 }
  0x22   : > { %p5322_p9 = pnand %p5320_p10, %p5308_p1  ;;  %p5328_p12 = scmp.lt.s32.totalorder %s5326_s11, %s5319_s7 }
  0x24   : > { %p5323_p0 = pneg %p5322_p9  ;;  %p5329_p11 = por %p5328_p12, %p5327_p2 }
  0x26   : > { %p5330_p6 = pnand %p5329_p11, %p5323_p0 }
  0x28   : > { %5333 = shalt.err (!%p5330_p6)
}
  0x29   : > { %s5401_s13 = smov 128   ;;  %s5402_s17 = smov 8  }
  0x2a   : > { %5208 = dma.hbm_to_vmem [thread:$0]  (!%p5515_p13), %s5511_s12, 1024, %s5519_s14, %s5521_s16, %s5401_s13, %s5401_s13, %s5402_s17  }
  0x2b   : > { %p5185_p9 = scmp.ge.s32.totalorder %s5398_s21, 1  ;;  %p206_p1 = scmp.lt.s32.totalorder %s5398_s21, 3 }
  0x2d   : > { %p207_p3 = pnand %p5185_p9, %p206_p1 }
  0x2f   : > { %210 = sbr.rel (%p207_p3) target bundleno = 1831 (0x727), region = 40 }
  0x34   : > { %s5545_s23 = sand.u32 1, %s5390_s19   ;;  %p9083_p6 = scmp.ne.s32.totalorder %s9079_s29, 0 }
  0x35   : > { %s5186_s25 = sshll.u32 %s5545_s23, 6  ;;  %s213_s26 = scalar_lea.sflag [#allocation5], %s5545_s23 }
  0x36   : > { %s5549_s28 = scalar_lea.vmem [#allocation4], %s5186_s25 }
  0x37   : > { %5377 = dma.done.wait (%p9083_p6), %s213_s26, 1024  }
  0x38   : > { %5379 = vsyncadd (%p9083_p6), %s213_s26, 4294966272  ;;  %v319_v0 = vlaneseq  ;;  %vm251_vm0 = vcmask 146432   ;;  %v5403_v1 = vmov 1983009808   ;;  %vm254_vm1 = vcmask 140288   ;;  %v248_v6 = vld [vmem:[%s5549_s28 + $0x28] sm:$0xff] }
  0x39   : > { %v317_v2 = vunpack.c.l.s4 %v5403_v1  ;;  %v8982_v3 = vmov 0.0   ;;  %v244_v7 = vld [vmem:[%s5549_s28 + $0x8] sm:$0xff]  ;;  %s5405_s29 = smov 1   ;;  %v250_v11 = vld [vmem:[%s5549_s28 + $0x38] sm:$0xff]  ;;  %v245_v15 = vld [vmem:[%s5549_s28 + $0x10] sm:$0xff]  ;;  %vm297_vm2 = vcmask 138248  }
  0x3a   : > { %260 = vst.msk [vmem:[#allocation2 + $0x38] sm:$0xff] %vm251_vm0, %v8982_v3  ;;  %252 = vst.msk [vmem:[#allocation2] sm:$0xff] %vm251_vm0, %v8982_v3  ;;  %2473 = vmatprep.mubr.f32.mxu0 %v8982_v3  ;;  %4872 = vmatprep.mubr.f32.mxu1 %v8982_v3  ;;  %v5605_v5 = vshrl.u32 %v319_v0, 7  ;;  %v4947_v9 = vcombine.low %v244_v7, %v248_v6  ;;  %v4948_v10 = vcombine.high %v244_v7, %v248_v6  ;;  %v246_v12 = vld [vmem:[%s5549_s28 + $0x18] sm:$0xff]  ;;  %v249_v16 = vld [vmem:[%s5549_s28 + $0x30] sm:$0xff]  ;;  %s5406_s12 = smov 127  }
  0x3b   : > { %253 = vst.msk [vmem:[#allocation2 + $0x8] sm:$0xff] %vm251_vm0, %v8982_v3  ;;  %256 = vst.msk [vmem:[#allocation2 + $0x18] sm:$0xff] %vm251_vm0, %v8982_v3  ;;  %v318_v4 = vunpack.c.0.s8 %v317_v2  ;;  %283 = vrot.lane.b32.xlu1 %v248_v6, %s5405_s29  ;;  %275 = vrot.lane.b32.xlu0 %v244_v7, %s5405_s29  ;;  %v4963_v13 = vcombine.low %v246_v12, %v250_v11  ;;  %v4964_v14 = vcombine.high %v246_v12, %v250_v11  ;;  %v243_v19 = vld [vmem:[%s5549_s28] sm:$0xff]  ;;  %s5407_s14 = smov 126   ;;  %s5409_s15 = smov 32   ;;  %vm506_vm3 = vcmask 130048  }
  0x3c   : > { %257 = vst.msk [vmem:[#allocation2 + $0x20] sm:$0xff] %vm251_vm0, %v8982_v3  ;;  %259 = vst.msk [vmem:[#allocation2 + $0x30] sm:$0xff] %vm251_vm0, %v8982_v3  ;;  %v4895_v20 = vcombine.low %v245_v15, %v249_v16  ;;  %v4896_v21 = vcombine.high %v245_v15, %v249_v16  ;;  %v247_v22 = vld [vmem:[%s5549_s28 + $0x20] sm:$0xff]  ;;  %s5410_s16 = smov 64   ;;  %s5411_s8 = smov 16   ;;  %vm508_vm4 = vcmask 261120  }
  0x3d   : > { %262 = vst.msk [vmem:[#allocation2 + $0x48] sm:$0xff] %vm251_vm0, %v8982_v3  ;;  %263 = vst.msk [vmem:[#allocation2 + $0x50] sm:$0xff] %vm251_vm0, %v8982_v3  ;;  %v5611_v8 = vsub.s32 %v318_v4, %v5605_v5  ;;  %v4879_v25 = vcombine.low %v243_v19, %v247_v22  ;;  %v4880_v26 = vcombine.high %v243_v19, %v247_v22  ;;  %s5412_s7 = smov 48   ;;  %s5413_s9 = smov 80   ;;  %vm510_vm5 = vcmask 392192  }
  0x3e   : > { %2482 = vst.msk [vmem:[#allocation3] sm:$0xff] %vm251_vm0, %v8982_v3  ;;  %2483 = vst.msk [vmem:[#allocation3 + $0x8] sm:$0xff] %vm251_vm0, %v8982_v3  ;;  %s5414_s10 = smov 96   ;;  %s5415_s11 = smov 112   ;;  %vm512_vm6 = vcmask 523264   ;;  %vm514_vm7 = vcmask 654336  }
  0x3f   : > { %2485 = vst.msk [vmem:[#allocation3 + $0x18] sm:$0xff] %vm251_vm0, %v8982_v3  ;;  %2486 = vst.msk [vmem:[#allocation3 + $0x20] sm:$0xff] %vm251_vm0, %v8982_v3  ;;  %v5619_v17 = vrot.slane %v4947_v9, %v5611_v8  ;;  %v5622_v18 = vrot.slane %v4948_v10, %v5611_v8  ;;  %v5627_v23 = vrot.slane %v4963_v13, %v5611_v8  ;;  %287 = vrot.lane.b32.xlu1 %v250_v11, %s5405_s29  ;;  %vm516_vm8 = vcmask 785408   ;;  %s5095_s13 = scalar_lea.sflag [#allocation6], %s5545_s23  ;;  %p9394_p12 = scmp.ne.s32.totalorder %s9080_s30, 0 }
  0x40   : > { %2488 = vst.msk [vmem:[#allocation3 + $0x30] sm:$0xff] %vm251_vm0, %v8982_v3  ;;  %2489 = vst.msk [vmem:[#allocation3 + $0x38] sm:$0xff] %vm251_vm0, %v8982_v3  ;;  %v5630_v24 = vrot.slane %v4964_v14, %v5611_v8  ;;  %279 = vrot.lane.b32.xlu0 %v246_v12, %s5405_s29  ;;  %v5635_v27 = vrot.slane %v4895_v20, %v5611_v8  ;;  %v5638_v28 = vrot.slane %v4896_v21, %v5611_v8  ;;  %vm2383_vm9 = vcmask 1043456   ;;  %s5417_s25 = smov [#allocation7]  }
  0x41   : > { %2491 = vst.msk [vmem:[#allocation3 + $0x48] sm:$0xff] %vm251_vm0, %v8982_v3  ;;  %2492 = vst.msk [vmem:[#allocation3 + $0x50] sm:$0xff] %vm251_vm0, %v8982_v3  ;;  %v5649_v33 = vrot.slane %v4879_v25, %v5611_v8  ;;  %v5652_v34 = vrot.slane %v4880_v26, %v5611_v8  ;;  %vm518_vm10 = vcmask 916480   ;;  %vm2399_vm11 = vcmask 293888   ;;  %s5338_s26 = sshll.u32 %s5417_s25, 4  ;;  %s5339_s26 = int_to_ptr.vmem [resolvable:$false] %s5338_s26 }
  0x42   : > { %261 = vst.msk [vmem:[#allocation2 + $0x40] sm:$0x3] %vm254_vm1, %v8982_v3  ;;  %255 = vst.msk [vmem:[#allocation2 + $0x10] sm:$0x3] %vm254_vm1, %v8982_v3 }
  0x43   : > { %258 = vst.msk [vmem:[#allocation2 + $0x28] sm:$0x3] %vm254_vm1, %v8982_v3  ;;  %264 = vst.msk [vmem:[#allocation2 + $0x58] sm:$0x3] %vm254_vm1, %v8982_v3  ;;  %277 = vrot.lane.b32.xlu1 %v245_v15, %s5405_s29 }
  0x44   : > { %2484 = vst.msk [vmem:[#allocation3 + $0x10] sm:$0x3] %vm254_vm1, %v8982_v3  ;;  %2487 = vst.msk [vmem:[#allocation3 + $0x28] sm:$0x3] %vm254_vm1, %v8982_v3  ;;  %273 = vrot.lane.b32.xlu0 %v243_v19, %s5405_s29 }
  0x45   : > { %2490 = vst.msk [vmem:[#allocation3 + $0x40] sm:$0x3] %vm254_vm1, %v8982_v3  ;;  %2493 = vst.msk [vmem:[#allocation3 + $0x58] sm:$0x3] %vm254_vm1, %v8982_v3 }
  0x46   : > { %9084 = vst [vmem:[#allocation10_spill] sm:$0xff] %v5611_v8  ;;  %9085 = vst [vmem:[#allocation11_spill] sm:$0xff] %v5619_v17 }
  0x47   : > { %9086 = vst [vmem:[#allocation12_spill] sm:$0xff] %v5622_v18  ;;  %9087 = vst [vmem:[#allocation13_spill] sm:$0xff] %v5627_v23  ;;  %285 = vrot.lane.b32.xlu1 %v249_v16, %s5405_s29 }
  0x48   : > { %9088 = vst [vmem:[#allocation14_spill] sm:$0xff] %v5630_v24  ;;  %9089 = vst [vmem:[#allocation15_spill] sm:$0xff] %v5635_v27  ;;  %281 = vrot.lane.b32.xlu0 %v247_v22, %s5405_s29 }
  0x49   : > { %9090 = vst [vmem:[#allocation16_spill] sm:$0xff] %v5638_v28  ;;  %9091 = vst [vmem:[#allocation17_spill] sm:$0xff] %v5649_v33 }
  0x4a   : > { %9092 = vst [vmem:[#allocation18_spill] sm:$0xff] %v5652_v34 }
  0xad   : > { %v284_v39 = vpop.permute.xlu1 %283  ;;  %v276_v40 = vpop.permute.xlu0 %275 }
  0xae   : > { %303 = vst.msk [vmem:[#allocation2 + $0x39] sm:$0xff] %vm297_vm2, %v284_v39  ;;  %299 = vst.msk [vmem:[#allocation2 + $0x9] sm:$0xff] %vm297_vm2, %v276_v40 }
  0xb1   : > { %v288_v41 = vpop.permute.xlu1 %287 }
  0xb2   : > { %v280_v42 = vpop.permute.xlu0 %279  ;;  %305 = vst.msk [vmem:[#allocation2 + $0x51] sm:$0xff] %vm297_vm2, %v288_v41 }
  0xb3   : > { %301 = vst.msk [vmem:[#allocation2 + $0x21] sm:$0xff] %vm297_vm2, %v280_v42 }
  0xb5   : > { %v278_v43 = vpop.permute.xlu1 %277  ;;  %v5670_v45 = vld [vmem:[#allocation2 + $0xa] sm:$0xff]  ;;  %v5672_v46 = vld [vmem:[#allocation2 + $0x3a] sm:$0xff] }
  0xb6   : > { %v274_v44 = vpop.permute.xlu0 %273  ;;  %v5674_v47 = vld [vmem:[#allocation2 + $0x9] sm:$0xff]  ;;  %300 = vst.msk [vmem:[#allocation2 + $0x19] sm:$0xff] %vm297_vm2, %v278_v43  ;;  %1901 = vrot.lane.b32.xlu0 %v5670_v45, %s5406_s12  ;;  %v1753_v48 = vcombine.low %v5670_v45, %v5672_v46  ;;  %v1754_v49 = vcombine.high %v5670_v45, %v5672_v46  ;;  %v5684_v50 = vld [vmem:[#allocation2 + $0x39] sm:$0xff] }
  0xb7   : > { %298 = vst.msk [vmem:[#allocation2 + $0x1] sm:$0xff] %vm297_vm2, %v274_v44  ;;  %v1071_v51 = vcombine.low %v5674_v47, %v5684_v50  ;;  %v1072_v52 = vcombine.high %v5674_v47, %v5684_v50 }
  0xb8   : > { %v5708_v63 = vrot.slane %v1753_v48, %v5611_v8  ;;  %v5714_v1 = vrot.slane %v1754_v49, %v5611_v8 }
  0xb9   : > { %v286_v53 = vpop.permute.xlu1 %285  ;;  %v5690_v56 = vld [vmem:[#allocation2 + $0x52] sm:$0xff]  ;;  %v5722_v6 = vrot.slane %v1071_v51, %v5611_v8  ;;  %v5728_v9 = vrot.slane %v1072_v52, %v5611_v8 }
  0xba   : > { %v282_v54 = vpop.permute.xlu0 %281  ;;  %v1680_v55 = vld [vmem:[#allocation2 + $0x22] sm:$0xff]  ;;  %304 = vst.msk [vmem:[#allocation2 + $0x49] sm:$0xff] %vm297_vm2, %v286_v53  ;;  %1909 = vrot.lane.b32.xlu0 %v5672_v46, %s5406_s12  ;;  %v5701_v60 = vld [vmem:[#allocation2 + $0x51] sm:$0xff] }
  0xbb   : > { %v5692_v57 = vld [vmem:[#allocation2 + $0x21] sm:$0xff]  ;;  %302 = vst.msk [vmem:[#allocation2 + $0x31] sm:$0xff] %vm297_vm2, %v282_v54  ;;  %1905 = vrot.lane.b32.xlu1 %v1680_v55, %s5406_s12  ;;  %v1769_v58 = vcombine.low %v1680_v55, %v5690_v56  ;;  %v1770_v59 = vcombine.high %v1680_v55, %v5690_v56  ;;  %9093 = vst [vmem:[#allocation19_spill] sm:$0xff] %v5728_v9 }
  0xbc   : > { %v1087_v61 = vcombine.low %v5692_v57, %v5701_v60  ;;  %v1088_v62 = vcombine.high %v5692_v57, %v5701_v60 }
  0xbd   : > { %v5711_v0 = vrot.slane %v1769_v58, %v5611_v8  ;;  %v5717_v2 = vrot.slane %v1770_v59, %v5611_v8  ;;  %v1679_v20 = vld [vmem:[#allocation2 + $0x1a] sm:$0xff] }
  0xbe   : > { %v5719_v4 = vld [vmem:[#allocation2 + $0x2] sm:$0xff]  ;;  %v5725_v7 = vrot.slane %v1087_v61, %v5611_v8  ;;  %v5731_v10 = vrot.slane %v1088_v62, %v5611_v8  ;;  %v5753_v22 = vld [vmem:[#allocation2 + $0x19] sm:$0xff] }
  0xbf   : > { %1913 = vrot.lane.b32.xlu1 %v5690_v56, %s5406_s12  ;;  %1899 = vrot.lane.b32.xlu0 %v5719_v4, %s5406_s12  ;;  %v1786_v11 = vcombine.high %v5708_v63, %v5711_v0  ;;  %v1801_v12 = vcombine.low %v5714_v1, %v5717_v2  ;;  %v1785_v13 = vcombine.low %v5708_v63, %v5711_v0  ;;  %v5751_v21 = vld [vmem:[#allocation2 + $0x1] sm:$0xff] }
  0xc0   : > { %9094 = vst [vmem:[#allocation20_spill] sm:$0xff] %v5731_v10  ;;  %v1104_v14 = vcombine.high %v5722_v6, %v5725_v7  ;;  %v1119_v15 = vcombine.low %v5728_v9, %v5731_v10  ;;  %v1103_v16 = vcombine.low %v5722_v6, %v5725_v7  ;;  %v1802_v19 = vcombine.high %v5714_v1, %v5717_v2  ;;  %v307_v52 = vld [vmem:[#allocation2 + $0x8] sm:$0xff]  ;;  %v309_v59 = vld [vmem:[#allocation2 + $0x20] sm:$0xff] }
  0xc1   : > { %v1683_v39 = vld [vmem:[#allocation2 + $0x4a] sm:$0xff] }
  0xc2   : > { %v1681_v26 = vld [vmem:[#allocation2 + $0x32] sm:$0xff]  ;;  %v1701_v43 = vcombine.low %v1679_v20, %v1683_v39  ;;  %v5763_v44 = vld [vmem:[#allocation2 + $0x49] sm:$0xff]  ;;  %v1702_v49 = vcombine.high %v1679_v20, %v1683_v39 }
  0xc3   : > { %v5757_v40 = vld [vmem:[#allocation2 + $0x31] sm:$0xff]  ;;  %1903 = vrot.lane.b32.xlu1 %v1679_v20, %s5406_s12  ;;  %1907 = vrot.lane.b32.xlu0 %v1681_v26, %s5406_s12  ;;  %v1685_v41 = vcombine.low %v5719_v4, %v1681_v26  ;;  %v1686_v42 = vcombine.high %v5719_v4, %v1681_v26  ;;  %v1020_v53 = vcombine.high %v5753_v22, %v5763_v44 }
  0xc4   : > { %v311_v48 = vld [vmem:[#allocation2 + $0x38] sm:$0xff]  ;;  %v1004_v51 = vcombine.high %v5751_v21, %v5757_v40  ;;  %v313_v58 = vld [vmem:[#allocation2 + $0x50] sm:$0xff]  ;;  %v5776_v62 = vrot.slane %v1701_v43, %v5611_v8  ;;  %v5782_v37 = vrot.slane %v1702_v49, %v5611_v8 }
  0xc5   : > { %v383_v54 = vcombine.high %v307_v52, %v311_v48  ;;  %v5773_v61 = vrot.slane %v1685_v41, %v5611_v8  ;;  %v382_v32 = vcombine.low %v307_v52, %v311_v48  ;;  %v398_v38 = vcombine.low %v309_v59, %v313_v58 }
  0xc6   : > { %v5779_v31 = vrot.slane %v1686_v42, %v5611_v8  ;;  %9096 = vst [vmem:[#allocation22_spill] sm:$0xff] %v5782_v37  ;;  %v5794_v42 = vrot.slane %v1004_v51, %v5611_v8  ;;  %v5797_v49 = vrot.slane %v1020_v53, %v5611_v8  ;;  %v399_v30 = vcombine.high %v309_v59, %v313_v58 }
  0xc7   : > { %1911 = vrot.lane.b32.xlu1 %v1683_v39, %s5406_s12  ;;  %2131 = vrot.lane.b32.xlu0 %v5670_v45, %s5407_s14  ;;  %v1718_v45 = vcombine.high %v5773_v61, %v5776_v62  ;;  %v1717_v43 = vcombine.low %v5773_v61, %v5776_v62 }
  0xc8   : > { %9095 = vst [vmem:[#allocation21_spill] sm:$0xff] %v5779_v31  ;;  %v1733_v41 = vcombine.low %v5779_v31, %v5782_v37  ;;  %9097 = vst [vmem:[#allocation23_spill] sm:$0xff] %v5794_v42 }
  0xc9   : > { %9098 = vst [vmem:[#allocation24_spill] sm:$0xff] %v5797_v49 }
  0xcb   : > { %2135 = vrot.lane.b32.xlu1 %v1680_v55, %s5407_s14  ;;  %2139 = vrot.lane.b32.xlu0 %v5672_v46, %s5407_s14  ;;  %v5800_v55 = vrot.slane %v382_v32, %v5611_v8  ;;  %v5803_v46 = vrot.slane %v398_v38, %v5611_v8  ;;  %v5820_v38 = vrot.slane %v383_v54, %v5611_v8 }
  0xcd   : > { %9099 = vst [vmem:[#allocation25_spill] sm:$0xff] %v5800_v55  ;;  %9100 = vst [vmem:[#allocation26_spill] sm:$0xff] %v5803_v46 }
  0xce   : > { %9101 = vst [vmem:[#allocation27_spill] sm:$0xff] %v5820_v38 }
  0xcf   : > { %2143 = vrot.lane.b32.xlu1 %v5690_v56, %s5407_s14  ;;  %1449 = vrot.lane.b32.xlu0 %v5674_v47, %s5407_s14  ;;  %v5823_v56 = vrot.slane %v399_v30, %v5611_v8  ;;  %v5869_v30 = vld [vmem:[#allocation2] sm:$0xff] }
  0xd1   : > { %9102 = vst [vmem:[#allocation28_spill] sm:$0xff] %v5823_v56 }
  0xd3   : > { %1453 = vrot.lane.b32.xlu1 %v5692_v57, %s5407_s14  ;;  %1457 = vrot.lane.b32.xlu0 %v5684_v50, %s5407_s14 }
  0xd7   : > { %1461 = vrot.lane.b32.xlu1 %v5701_v60, %s5407_s14  ;;  %2129 = vrot.lane.b32.xlu0 %v5719_v4, %s5407_s14  ;;  %v1003_v4 = vcombine.low %v5751_v21, %v5757_v40 }
  0xdb   : > { %2133 = vrot.lane.b32.xlu1 %v1679_v20, %s5407_s14  ;;  %2137 = vrot.lane.b32.xlu0 %v1681_v26, %s5407_s14  ;;  %v1019_v20 = vcombine.low %v5753_v22, %v5763_v44  ;;  %v5886_v26 = vld [vmem:[#allocation2 + $0x48] sm:$0xff] }
  0xdf   : > { %2141 = vrot.lane.b32.xlu1 %v1683_v39, %s5407_s14  ;;  %1447 = vrot.lane.b32.xlu0 %v5751_v21, %s5407_s14 }
  0xe3   : > { %1451 = vrot.lane.b32.xlu1 %v5753_v22, %s5407_s14  ;;  %1455 = vrot.lane.b32.xlu0 %v5757_v40, %s5407_s14 }
  0xe7   : > { %1459 = vrot.lane.b32.xlu1 %v5763_v44, %s5407_s14  ;;  %1219 = vrot.lane.b32.xlu0 %v5674_v47, %s5406_s12  ;;  %v5874_v47 = vld [vmem:[#allocation2 + $0x18] sm:$0xff] }
  0xeb   : > { %1223 = vrot.lane.b32.xlu1 %v5692_v57, %s5406_s12  ;;  %1227 = vrot.lane.b32.xlu0 %v5684_v50, %s5406_s12  ;;  %v5876_v50 = vld [vmem:[#allocation2 + $0x30] sm:$0xff]  ;;  %v5408_v57 = vmov 1934713408  }
  0xef   : > { %1231 = vrot.lane.b32.xlu1 %v5701_v60, %s5406_s12  ;;  %1217 = vrot.lane.b32.xlu0 %v5751_v21, %s5406_s12  ;;  %v349_v60 = vunpack.c.l.s4 %v5408_v57 }
  0xf1   : > { %v350_v39 = vunpack.c.0.s8 %v349_v60 }
  0xf3   : > { %1221 = vrot.lane.b32.xlu1 %v5753_v22, %s5406_s12  ;;  %1225 = vrot.lane.b32.xlu0 %v5757_v40, %s5406_s12  ;;  %v5899_v21 = vsub.s32 %v350_v39, %v5605_v5 }
  0xf5   : > { %9103 = vst [vmem:[#allocation29_spill] sm:$0xff] %v5899_v21  ;;  %v1732_v22 = vrot.slane %v1718_v45, %v5899_v21  ;;  %v1118_v54 = vrot.slane %v1104_v14, %v5899_v21  ;;  %v1809_v14 = vrot.slane %v1801_v12, %v5899_v21  ;;  %v5941_v61 = vrot.slane %v1103_v16, %v5899_v21 }
  0xf6   : > { %v5949_v12 = vrot.slane %v1119_v15, %v5899_v21  ;;  %v5957_v6 = vrot.slane %v1785_v13, %v5899_v21 }
  0xf7   : > { %1229 = vrot.lane.b32.xlu1 %v5763_v44, %s5406_s12  ;;  %537 = vrot.lane.b32.xlu0 %v307_v52, %s5406_s12  ;;  %v1800_v44 = vrot.slane %v1786_v11, %v5899_v21  ;;  %v5927_v11 = vrot.slane %v1717_v43, %v5899_v21  ;;  %9105 = vst [vmem:[#allocation31_spill] sm:$0xff] %v5941_v61 }
  0xf8   : > { %v1135_v45 = vcombine.high %v5941_v61, %v8982_v3  ;;  %9106 = vst [vmem:[#allocation32_spill] sm:$0xff] %v5957_v6  ;;  %v1817_v15 = vcombine.high %v5957_v6, %v8982_v3  ;;  %v1750_v43 = vcombine.high %v1732_v22, %v8982_v3 }
  0xf9   : > { %9104 = vst [vmem:[#allocation30_spill] sm:$0xff] %v5927_v11  ;;  %v1818_v13 = vcombine.high %v1800_v44, %v8982_v3 }
  0xfb   : > { %541 = vrot.lane.b32.xlu1 %v309_v59, %s5406_s12  ;;  %545 = vrot.lane.b32.xlu0 %v311_v48, %s5406_s12 }
  0xff   : > { %549 = vrot.lane.b32.xlu1 %v313_v58, %s5406_s12  ;;  %767 = vrot.lane.b32.xlu0 %v307_v52, %s5407_s14  ;;  %v1027_v52 = vrot.slane %v1019_v20, %v5611_v8  ;;  %v1136_v20 = vcombine.high %v1118_v54, %v8982_v3 }
 0x103   : > { %771 = vrot.lane.b32.xlu1 %v309_v59, %s5407_s14  ;;  %775 = vrot.lane.b32.xlu0 %v311_v48, %s5407_s14  ;;  %v1011_v48 = vrot.slane %v1003_v4, %v5611_v8  ;;  %v1749_v59 = vcombine.high %v5927_v11, %v8982_v3 }
 0x105   : > { %v1036_v40 = vcombine.high %v1011_v48, %v1027_v52  ;;  %v1035_v62 = vcombine.low %v1011_v48, %v1027_v52 }
 0x107   : > { %779 = vrot.lane.b32.xlu1 %v313_v58, %s5407_s14  ;;  %535 = vrot.lane.b32.xlu0 %v5869_v30, %s5406_s12  ;;  %v1050_v5 = vrot.slane %v1036_v40, %v5899_v21  ;;  %v1741_v58 = vrot.slane %v1733_v41, %v5899_v21  ;;  %v5960_v7 = vrot.slane %v1035_v62, %v5899_v21 }
 0x109   : > { %9107 = vst [vmem:[#allocation33_spill] sm:$0xff] %v5960_v7  ;;  %v1067_v41 = vcombine.high %v5960_v7, %v8982_v3  ;;  %v1068_v39 = vcombine.high %v1050_v5, %v8982_v3 }
 0x10b   : > { %539 = vrot.lane.b32.xlu1 %v5874_v47, %s5406_s12  ;;  %543 = vrot.lane.b32.xlu0 %v5876_v50, %s5406_s12 }
 0x10f   : > { %547 = vrot.lane.b32.xlu1 %v5886_v26, %s5406_s12  ;;  %765 = vrot.lane.b32.xlu0 %v5869_v30, %s5407_s14 }
 0x113   : > { %769 = vrot.lane.b32.xlu1 %v5874_v47, %s5407_s14  ;;  %773 = vrot.lane.b32.xlu0 %v5876_v50, %s5407_s14 }
 0x117   : > { %777 = vrot.lane.b32.xlu1 %v5886_v26, %s5407_s14  ;;  %1826 = vrot.lane.b32.xlu0 %v1732_v22, %s5409_s15 }
 0x11b   : > { %1854 = vrot.lane.b32.xlu1 %v1800_v44, %s5409_s15  ;;  %1144 = vrot.lane.b32.xlu0 %v1050_v5, %s5409_s15  ;;  %v1751_v5 = vcombine.high %v1741_v58, %v8982_v3 }
 0x11f   : > { %1172 = vrot.lane.b32.xlu1 %v1118_v54, %s5409_s15  ;;  %1834 = vrot.lane.b32.xlu0 %v1741_v58, %s5410_s16  ;;  %v1819_v54 = vcombine.high %v1809_v14, %v8982_v3 }
 0x123   : > { %1862 = vrot.lane.b32.xlu1 %v1809_v14, %s5410_s16  ;;  %1822 = vrot.lane.b32.xlu0 %v1749_v59, %s5411_s8  ;;  %v414_v59 = vcombine.low %v5800_v55, %v5803_v46 }
 0x127   : > { %1180 = vrot.lane.b32.xlu1 %v5949_v12, %s5410_s16  ;;  %1168 = vrot.lane.b32.xlu0 %v1135_v45, %s5411_s8 }
 0x128   : > { %v5965_v16 = vpop.permute.xlu0 %1901 }
 0x12b   : > { %1850 = vrot.lane.b32.xlu1 %v1817_v15, %s5411_s8  ;;  %1140 = vrot.lane.b32.xlu0 %v1067_v41, %s5411_s8 }
 0x12c   : > { %v5975_v0 = vpop.permute.xlu0 %1909 }
 0x12d   : > { %v5973_v63 = vpop.permute.xlu1 %1905  ;;  %v1991_v57 = vcombine.low %v5965_v16, %v5975_v0 }
 0x12f   : > { %1858 = vrot.lane.b32.xlu1 %v1818_v13, %s5412_s7  ;;  %1830 = vrot.lane.b32.xlu0 %v1750_v43, %s5412_s7  ;;  %v5991_v52 = vrot.slane %v1991_v57, %v5611_v8  ;;  %v6021_v13 = vrot.slane %v1802_v19, %v5899_v21  ;;  %v6024_v43 = vrot.slane %v414_v59, %v5899_v21 }
 0x131   : > { %v1914_v60 = vpop.permute.xlu1 %1913  ;;  %v5983_v4 = vpop.permute.xlu0 %1899  ;;  %9108 = vst [vmem:[#allocation34_spill] sm:$0xff] %v6021_v13  ;;  %9109 = vst [vmem:[#allocation35_spill] sm:$0xff] %v6024_v43 }
 0x132   : > { %v2007_v48 = vcombine.low %v5973_v63, %v1914_v60 }
 0x133   : > { %1176 = vrot.lane.b32.xlu1 %v1136_v20, %s5412_s7  ;;  %1148 = vrot.lane.b32.xlu0 %v1068_v39, %s5412_s7  ;;  %v446_v39 = vcombine.high %v6024_v43, %v8982_v3 }
 0x134   : > { %v5994_v22 = vrot.slane %v2007_v48, %v5611_v8 }
 0x135   : > { %v5996_v40 = vpop.permute.xlu1 %1903  ;;  %v5998_v44 = vpop.permute.xlu0 %1907 }
 0x136   : > { %v2024_v45 = vcombine.high %v5991_v52, %v5994_v22  ;;  %v1923_v15 = vcombine.low %v5983_v4, %v5998_v44 }
 0x137   : > { %1866 = vrot.lane.b32.xlu1 %v1819_v54, %s5413_s9  ;;  %1838 = vrot.lane.b32.xlu0 %v1751_v5, %s5413_s9 }
 0x138   : > { %v6013_v14 = vrot.slane %v2024_v45, %v5899_v21  ;;  %v6033_v20 = vrot.slane %v1923_v15, %v5611_v8 }
 0x139   : > { %v6015_v58 = vpop.permute.xlu1 %1911  ;;  %v2132_v41 = vpop.permute.xlu0 %2131 }
 0x13a   : > { %v1939_v57 = vcombine.low %v5996_v40, %v6015_v58 }
 0x13b   : > { %1870 = vrot.lane.b32.xlu1 %v6021_v13, %s5414_s10  ;;  %2092 = vrot.lane.b32.xlu0 %v6013_v14, %s5409_s15 }
 0x13c   : > { %v6036_v1 = vrot.slane %v1939_v57, %v5611_v8 }
 0x13d   : > { %v2136_v2 = vpop.permute.xlu1 %2135  ;;  %v2140_v19 = vpop.permute.xlu0 %2139 }
 0x13e   : > { %v1956_v54 = vcombine.high %v6033_v20, %v6036_v1  ;;  %v2221_v5 = vcombine.low %v2132_v41, %v2140_v19  ;;  %v2222_v34 = vcombine.high %v2132_v41, %v2140_v19 }
 0x13f   : > { %479 = vrot.lane.b32.xlu1 %v446_v39, %s5411_s8 }
 0x140   : > { %v6046_v59 = vrot.slane %v1956_v54, %v5899_v21  ;;  %v6053_v35 = vrot.slane %v2221_v5, %v5611_v8  ;;  %v2008_v5 = vcombine.high %v5973_v63, %v1914_v60  ;;  %v1992_v54 = vcombine.high %v5965_v16, %v5975_v0 }
 0x141   : > { %v2144_v45 = vpop.permute.xlu1 %2143  ;;  %v6048_v15 = vpop.permute.xlu0 %1449 }
 0x142   : > { %v2237_v57 = vcombine.low %v2136_v2, %v2144_v45  ;;  %2064 = vrot.lane.b32.xlu0 %v6046_v59, %s5409_s15  ;;  %v6089_v63 = vrot.slane %v2008_v5, %v5611_v8  ;;  %v2238_v60 = vcombine.high %v2136_v2, %v2144_v45  ;;  %v6094_v28 = vrot.slane %v1992_v54, %v5611_v8 }
 0x143   : > { %v6108_v54 = vrot.slane %v2222_v34, %v5611_v8  ;;  %v1924_v34 = vcombine.high %v5983_v4, %v5998_v44 }
 0x144   : > { %v6056_v29 = vrot.slane %v2237_v57, %v5611_v8  ;;  %v2039_v45 = vcombine.low %v6094_v28, %v6089_v63 }
 0x145   : > { %v6058_v36 = vpop.permute.xlu1 %1453  ;;  %v6060_v39 = vpop.permute.xlu0 %1457 }
 0x146   : > { %v2254_v25 = vcombine.high %v6053_v35, %v6056_v29  ;;  %v1539_v32 = vcombine.low %v6048_v15, %v6060_v39  ;;  %v1540_v38 = vcombine.high %v6048_v15, %v6060_v39 }
 0x148   : > { %v6069_v53 = vrot.slane %v2254_v25, %v5899_v21  ;;  %v6083_v62 = vrot.slane %v1539_v32, %v5611_v8 }
 0x149   : > { %v6072_v57 = vpop.permute.xlu1 %1461  ;;  %v6074_v51 = vpop.permute.xlu0 %2129 }
 0x14a   : > { %v1555_v3 = vcombine.low %v6058_v36, %v6072_v57  ;;  %2322 = vrot.lane.b32.xlu1 %v6069_v53, %s5409_s15 }
 0x14c   : > { %v6086_v25 = vrot.slane %v1555_v3, %v5611_v8  ;;  %v6100_v3 = vrot.slane %v2238_v60, %v5611_v8 }
 0x14d   : > { %v2134_v48 = vpop.permute.xlu1 %2133  ;;  %v2138_v24 = vpop.permute.xlu0 %2137 }
 0x14e   : > { %v1572_v32 = vcombine.high %v6083_v62, %v6086_v25  ;;  %v2153_v16 = vcombine.low %v6074_v51, %v2138_v24  ;;  %v2269_v17 = vcombine.low %v6108_v54, %v6100_v3 }
 0x150   : > { %v6103_v2 = vrot.slane %v1572_v32, %v5899_v21  ;;  %v6113_v41 = vrot.slane %v2153_v16, %v5611_v8  ;;  %v6119_v32 = vrot.slane %v2039_v45, %v5899_v21  ;;  %v6132_v7 = vrot.slane %v2269_v17, %v5899_v21 }
 0x151   : > { %v2142_v0 = vpop.permute.xlu1 %2141  ;;  %v1448_v5 = vpop.permute.xlu0 %1447 }
 0x152   : > { %v2169_v18 = vcombine.low %v2134_v48, %v2142_v0  ;;  %1640 = vrot.lane.b32.xlu1 %v6103_v2, %s5409_s15  ;;  %v2170_v4 = vcombine.high %v2134_v48, %v2142_v0 }
 0x154   : > { %v6116_v19 = vrot.slane %v2169_v18, %v5611_v8  ;;  %v1940_v18 = vcombine.high %v5996_v40, %v6015_v58  ;;  %v6171_v48 = vrot.slane %v2170_v4, %v5611_v8 }
 0x155   : > { %v1452_v60 = vpop.permute.xlu1 %1451  ;;  %v1456_v23 = vpop.permute.xlu0 %1455 }
 0x156   : > { %2100 = vrot.lane.b32.xlu1 %v6119_v32, %s5410_s16  ;;  %v2186_v16 = vcombine.high %v6113_v41, %v6116_v19  ;;  %v1472_v27 = vcombine.high %v1448_v5, %v1456_v23  ;;  %v1471_v33 = vcombine.low %v1448_v5, %v1456_v23  ;;  %v6144_v23 = vrot.slane %v1940_v18, %v5611_v8 }
 0x158   : > { %v6135_v61 = vrot.slane %v2186_v16, %v5899_v21  ;;  %v6147_v17 = vrot.slane %v1472_v27, %v5611_v8  ;;  %v6156_v44 = vrot.slane %v1471_v33, %v5611_v8  ;;  %v2154_v27 = vcombine.high %v6074_v51, %v2138_v24 }
 0x159   : > { %v1460_v43 = vpop.permute.xlu1 %1459  ;;  %v1220_v45 = vpop.permute.xlu0 %1219  ;;  %v1556_v33 = vcombine.high %v6058_v36, %v6072_v57 }
 0x15a   : > { %v1487_v11 = vcombine.low %v1452_v60, %v1460_v43  ;;  %v1488_v6 = vcombine.high %v1452_v60, %v1460_v43  ;;  %2330 = vrot.lane.b32.xlu1 %v6132_v7, %s5410_s16  ;;  %2294 = vrot.lane.b32.xlu0 %v6135_v61, %s5409_s15  ;;  %9110 = vst [vmem:[#allocation36_spill] sm:$0xff] %v6147_v17 }
 0x15b   : > { %v6159_v60 = vrot.slane %v1924_v34, %v5611_v8  ;;  %v6181_v10 = vrot.slane %v2154_v27, %v5611_v8  ;;  %v6195_v4 = vrot.slane %v1556_v33, %v5611_v8 }
 0x15c   : > { %v6150_v40 = vrot.slane %v1487_v11, %v5611_v8  ;;  %v6153_v58 = vrot.slane %v1488_v6, %v5611_v8 }
 0x15d   : > { %v1224_v43 = vpop.permute.xlu1 %1223  ;;  %v1228_v5 = vpop.permute.xlu0 %1227  ;;  %v1971_v6 = vcombine.low %v6159_v60, %v6144_v23  ;;  %v2201_v27 = vcombine.low %v6181_v10, %v6171_v48 }
 0x15e   : > { %9111 = vst [vmem:[#allocation37_spill] sm:$0xff] %v6153_v58  ;;  %v1504_v11 = vcombine.high %v6156_v44, %v6150_v40  ;;  %v1310_v18 = vcombine.high %v1220_v45, %v1228_v5  ;;  %v1309_v0 = vcombine.low %v1220_v45, %v1228_v5  ;;  %v1519_v42 = vcombine.low %v6147_v17, %v6153_v58 }
 0x15f   : > { %v6205_v5 = vrot.slane %v1971_v6, %v5899_v21 }
 0x160   : > { %v6176_v16 = vrot.slane %v1504_v11, %v5899_v21  ;;  %v6186_v36 = vrot.slane %v1310_v18, %v5611_v8  ;;  %v6198_v15 = vrot.slane %v1309_v0, %v5611_v8  ;;  %v6212_v18 = vrot.slane %v1540_v38, %v5611_v8 }
 0x161   : > { %v1232_v34 = vpop.permute.xlu1 %1231  ;;  %v6173_v56 = vpop.permute.xlu0 %1217 }
 0x162   : > { %9112 = vst [vmem:[#allocation38_spill] sm:$0xff] %v6173_v56  ;;  %v1325_v24 = vcombine.low %v1224_v43, %v1232_v34  ;;  %v1326_v51 = vcombine.high %v1224_v43, %v1232_v34  ;;  %1612 = vrot.lane.b32.xlu0 %v6176_v16, %s5409_s15  ;;  %9113 = vst [vmem:[#allocation39_spill] sm:$0xff] %v6186_v36  ;;  %v1587_v38 = vcombine.low %v6212_v18, %v6195_v4 }
 0x164   : > { %v6189_v57 = vrot.slane %v1325_v24, %v5611_v8  ;;  %v6192_v45 = vrot.slane %v1326_v51, %v5611_v8  ;;  %v6225_v24 = vrot.slane %v2201_v27, %v5899_v21  ;;  %v2040_v27 = vcombine.high %v6094_v28, %v6089_v63 }
 0x165   : > { %v6200_v39 = vpop.permute.xlu1 %1221  ;;  %v6202_v43 = vpop.permute.xlu0 %1225  ;;  %v6251_v37 = vrot.slane %v1587_v38, %v5899_v21  ;;  %v2270_v38 = vcombine.high %v6108_v54, %v6100_v3 }
 0x166   : > { %9114 = vst [vmem:[#allocation40_spill] sm:$0xff] %v6192_v45  ;;  %9115 = vst [vmem:[#allocation41_spill] sm:$0xff] %v6202_v43  ;;  %2072 = vrot.lane.b32.xlu0 %v6205_v5, %s5410_s16  ;;  %v1342_v33 = vcombine.high %v6198_v15, %v6189_v57  ;;  %v1241_v0 = vcombine.low %v6173_v56, %v6202_v43  ;;  %v6258_v31 = vrot.slane %v2040_v27, %v5899_v21 }
 0x167   : > { %v6290_v54 = vrot.slane %v2270_v38, %v5899_v21 }
 0x168   : > { %v6228_v51 = vrot.slane %v1342_v33, %v5899_v21  ;;  %v6244_v33 = vrot.slane %v1241_v0, %v5611_v8 }
 0x169   : > { %v6220_v6 = vpop.permute.xlu1 %1229  ;;  %v6222_v34 = vpop.permute.xlu0 %537  ;;  %9123 = vst [vmem:[#allocation49_spill] sm:$0xff] %v6290_v54 }
 0x16a   : > { %9116 = vst [vmem:[#allocation42_spill] sm:$0xff] %v6222_v34  ;;  %v1257_v11 = vcombine.low %v6200_v39, %v6220_v6  ;;  %2302 = vrot.lane.b32.xlu0 %v6225_v24, %s5410_s16  ;;  %1410 = vrot.lane.b32.xlu1 %v6228_v51, %s5409_s15 }
 0x16c   : > { %v6239_v9 = vrot.slane %v1257_v11, %v5611_v8 }
 0x16d   : > { %v6246_v46 = vpop.permute.xlu1 %541  ;;  %v6248_v55 = vpop.permute.xlu0 %545 }
 0x16e   : > { %9117 = vst [vmem:[#allocation43_spill] sm:$0xff] %v6246_v46  ;;  %9118 = vst [vmem:[#allocation44_spill] sm:$0xff] %v6248_v55  ;;  %1648 = vrot.lane.b32.xlu1 %v6251_v37, %s5410_s16  ;;  %v1274_v11 = vcombine.high %v6244_v33, %v6239_v9  ;;  %v627_v28 = vcombine.low %v6222_v34, %v6248_v55 }
 0x170   : > { %v6267_v49 = vrot.slane %v1274_v11, %v5899_v21  ;;  %v6283_v11 = vrot.slane %v627_v28, %v5611_v8 }
 0x171   : > { %v6262_v63 = vpop.permute.xlu1 %549  ;;  %v6264_v0 = vpop.permute.xlu0 %767 }
 0x172   : > { %9119 = vst [vmem:[#allocation45_spill] sm:$0xff] %v6262_v63  ;;  %9120 = vst [vmem:[#allocation46_spill] sm:$0xff] %v6264_v0  ;;  %v643_v27 = vcombine.low %v6246_v46, %v6262_v63  ;;  %2108 = vrot.lane.b32.xlu1 %v6258_v31, %s5414_s10  ;;  %1382 = vrot.lane.b32.xlu0 %v6267_v49, %s5409_s15  ;;  %v6293_v46 = vrot.slane %v1519_v42, %v5899_v21 }
 0x173   : > { %v1972_v63 = vcombine.high %v6159_v60, %v6144_v23 }
 0x174   : > { %v6280_v34 = vrot.slane %v643_v27, %v5611_v8 }
 0x175   : > { %v6285_v55 = vpop.permute.xlu1 %771  ;;  %v6287_v3 = vpop.permute.xlu0 %775  ;;  %v6310_v42 = vrot.slane %v1972_v63, %v5899_v21 }
 0x176   : > { %9121 = vst [vmem:[#allocation47_spill] sm:$0xff] %v6285_v55  ;;  %9122 = vst [vmem:[#allocation48_spill] sm:$0xff] %v6287_v3  ;;  %2338 = vrot.lane.b32.xlu1 %v6290_v54, %s5414_s10  ;;  %1620 = vrot.lane.b32.xlu0 %v6293_v46, %s5410_s16  ;;  %v660_v28 = vcombine.high %v6283_v11, %v6280_v34  ;;  %v857_v27 = vcombine.low %v6264_v0, %v6287_v3 }
 0x178   : > { %v6313_v23 = vrot.slane %v660_v28, %v5899_v21  ;;  %v6325_v3 = vrot.slane %v857_v27, %v5611_v8  ;;  %v1357_v27 = vcombine.low %v6186_v36, %v6192_v45 }
 0x179   : > { %v6305_v38 = vpop.permute.xlu1 %779  ;;  %v6307_v58 = vpop.permute.xlu0 %535 }
 0x17a   : > { %9124 = vst [vmem:[#allocation50_spill] sm:$0xff] %v6305_v38  ;;  %9125 = vst [vmem:[#allocation51_spill] sm:$0xff] %v6307_v58  ;;  %v873_v60 = vcombine.low %v6285_v55, %v6305_v38  ;;  %2080 = vrot.lane.b32.xlu0 %v6310_v42, %s5414_s10  ;;  %728 = vrot.lane.b32.xlu1 %v6313_v23, %s5409_s15  ;;  %v6361_v45 = vrot.slane %v1357_v27, %v5899_v21 }
 0x17c   : > { %v6322_v0 = vrot.slane %v873_v60, %v5611_v8 }
 0x17d   : > { %v6327_v63 = vpop.permute.xlu1 %539  ;;  %v6329_v17 = vpop.permute.xlu0 %543 }
 0x17e   : > { %9126 = vst [vmem:[#allocation52_spill] sm:$0xff] %v6327_v63  ;;  %9127 = vst [vmem:[#allocation53_spill] sm:$0xff] %v6329_v17  ;;  %v890_v28 = vcombine.high %v6325_v3, %v6322_v0  ;;  %v559_v55 = vcombine.low %v6307_v58, %v6329_v17  ;;  %v1588_v58 = vcombine.high %v6212_v18, %v6195_v4 }
 0x180   : > { %v6340_v60 = vrot.slane %v890_v28, %v5899_v21  ;;  %v6354_v17 = vrot.slane %v559_v55, %v5611_v8  ;;  %v2202_v55 = vcombine.high %v6181_v10, %v6171_v48  ;;  %v6374_v18 = vrot.slane %v1588_v58, %v5899_v21 }
 0x181   : > { %v6335_v38 = vpop.permute.xlu1 %547  ;;  %v6337_v13 = vpop.permute.xlu0 %765  ;;  %v9131_v48 = vcombine.low %v6033_v20, %v6036_v1  ;;  %v9134_v20 = vmov 0.0  }
 0x182   : > { %9128 = vst [vmem:[#allocation54_spill] sm:$0xff] %v6337_v13  ;;  %v575_v54 = vcombine.low %v6327_v63, %v6335_v38  ;;  %958 = vrot.lane.b32.xlu1 %v6340_v60, %s5409_s15  ;;  %v6392_v58 = vrot.slane %v2202_v55, %v5899_v21 }
 0x184   : > { %v6349_v56 = vrot.slane %v575_v54, %v5611_v8 }
 0x185   : > { %v6356_v28 = vpop.permute.xlu1 %769  ;;  %v6358_v43 = vpop.permute.xlu0 %773 }
 0x186   : > { %9129 = vst [vmem:[#allocation55_spill] sm:$0xff] %v6356_v28  ;;  %9130 = vst [vmem:[#allocation56_spill] sm:$0xff] %v6358_v43  ;;  %1418 = vrot.lane.b32.xlu1 %v6361_v45, %s5410_s16  ;;  %v592_v54 = vcombine.high %v6354_v17, %v6349_v56  ;;  %v789_v36 = vcombine.low %v6337_v13, %v6358_v43 }
 0x188   : > { %v6377_v27 = vrot.slane %v592_v54, %v5899_v21  ;;  %v6386_v13 = vrot.slane %v789_v36, %v5611_v8  ;;  %v6398_v54 = vrot.slane %v9131_v48, %v5899_v21  ;;  %v9135_v48 = vcombine.low %v6053_v35, %v6056_v29 }
 0x189   : > { %v6371_v4 = vpop.permute.xlu1 %777  ;;  %v1503_v35 = vcombine.low %v6156_v44, %v6150_v40 }
 0x18a   : > { %v805_v63 = vcombine.low %v6356_v28, %v6371_v4  ;;  %1656 = vrot.lane.b32.xlu1 %v6374_v18, %s5414_s10  ;;  %700 = vrot.lane.b32.xlu0 %v6377_v27, %s5409_s15  ;;  %v1987_v1 = vcombine.high %v6398_v54, %v9134_v20 }
 0x18b   : > { %v6461_v44 = vrot.slane %v1503_v35, %v5899_v21  ;;  %v1273_v35 = vcombine.low %v6244_v33, %v6239_v9  ;;  %v2057_v9 = vcombine.high %v6119_v32, %v9134_v20  ;;  %v1536_v32 = vcombine.high %v6176_v16, %v9134_v20 }
 0x18c   : > { %v6389_v10 = vrot.slane %v805_v63, %v5611_v8  ;;  %v9133_v63 = vcombine.low %v5991_v52, %v5994_v22  ;;  %v9136_v52 = vcombine.low %v6083_v62, %v6086_v25  ;;  %v9138_v62 = vcombine.low %v6113_v41, %v6116_v19  ;;  %v6468_v19 = vpop.permute.xlu0 %1826 }
 0x18d   : > { %v6402_v28 = vpop.permute.xlu1 %1854  ;;  %9139 = vst [vmem:[#allocation59_spill] sm:$0xff] %v6461_v44  ;;  %v2286_v41 = vcombine.high %v6069_v53, %v9134_v20  ;;  %v1988_v53 = vcombine.high %v6046_v59, %v9134_v20  ;;  %v889_v59 = vcombine.low %v6325_v3, %v6322_v0  ;;  %v659_v0 = vcombine.low %v6283_v11, %v6280_v34 }
 0x18e   : > { %v822_v43 = vcombine.high %v6386_v13, %v6389_v10  ;;  %9132 = vst [vmem:[#allocation57_spill] sm:$0xff] %v6402_v28  ;;  %2310 = vrot.lane.b32.xlu1 %v6392_v58, %s5414_s10  ;;  %v6413_v55 = vrot.slane %v9133_v63, %v5899_v21  ;;  %v6421_v28 = vrot.slane %v9135_v48, %v5899_v21 }
 0x18f   : > { %v6432_v22 = vrot.slane %v9136_v52, %v5899_v21  ;;  %v6448_v25 = vrot.slane %v9138_v62, %v5899_v21  ;;  %v2056_v48 = vcombine.high %v6013_v14, %v9134_v20  ;;  %v1604_v62 = vcombine.high %v6103_v2, %v9134_v20 }
 0x190   : > { %v6407_v36 = vrot.slane %v822_v43, %v5899_v21  ;;  %v2055_v43 = vcombine.high %v6413_v55, %v9134_v20  ;;  %v2285_v29 = vcombine.high %v6421_v28, %v9134_v20  ;;  %v1374_v16 = vcombine.high %v6228_v51, %v9134_v20 }
 0x191   : > { %v6434_v63 = vpop.permute.xlu1 %1172  ;;  %v2217_v40 = vcombine.high %v6448_v25, %v9134_v20  ;;  %v591_v11 = vcombine.low %v6354_v17, %v6349_v56  ;;  %v2219_v51 = vcombine.high %v6225_v24, %v9134_v20 }
 0x192   : > { %930 = vrot.lane.b32.xlu0 %v6407_v36, %s5409_s15  ;;  %2060 = vrot.lane.b32.xlu1 %v1987_v1, %s5411_s8  ;;  %9137 = vst [vmem:[#allocation58_spill] sm:$0xff] %v6434_v63  ;;  %v1603_v1 = vcombine.high %v6432_v22, %v9134_v20  ;;  %v9178_v63 = vld [vmem:[#allocation46_spill] sm:$0xff] }
 0x193   : > { %v6556_v56 = vrot.slane %v591_v11, %v5899_v21 }
 0x195   : > { %v6455_v52 = vpop.permute.xlu1 %1862  ;;  %9149 = vst [vmem:[#allocation69_spill] sm:$0xff] %v6556_v56  ;;  %v623_v24 = vcombine.high %v6556_v56, %v9134_v20  ;;  %v9168_v56 = vld [vmem:[#allocation43_spill] sm:$0xff] }
 0x196   : > { %2088 = vrot.lane.b32.xlu0 %v2055_v43, %s5411_s8  ;;  %2318 = vrot.lane.b32.xlu1 %v2285_v29, %s5411_s8  ;;  %v1341_v43 = vcombine.low %v6198_v15, %v6189_v57  ;;  %v1535_v57 = vcombine.high %v6461_v44, %v9134_v20 }
 0x198   : > { %v6466_v14 = vrot.slane %v1341_v43, %v5899_v21  ;;  %v2218_v43 = vcombine.high %v6135_v61, %v9134_v20  ;;  %v2287_v61 = vcombine.high %v6132_v7, %v9134_v20 }
 0x199   : > { %v6474_v15 = vpop.permute.xlu1 %1180 }
 0x19a   : > { %1636 = vrot.lane.b32.xlu0 %v1603_v1, %s5411_s8  ;;  %2096 = vrot.lane.b32.xlu1 %v2056_v48, %s5412_s7  ;;  %9140 = vst [vmem:[#allocation60_spill] sm:$0xff] %v6466_v14  ;;  %9141 = vst [vmem:[#allocation61_spill] sm:$0xff] %v6474_v15  ;;  %v1373_v29 = vcombine.high %v6466_v14, %v9134_v20  ;;  %v6484_v1 = vpop.permute.xlu0 %1144 }
 0x19b   : > { %9142 = vst [vmem:[#allocation62_spill] sm:$0xff] %v6484_v1  ;;  %v9170_v1 = vld [vmem:[#allocation22_spill] sm:$0xff] }
 0x19d   : > { %v6489_v48 = vpop.permute.xlu1 %1850 }
 0x19e   : > { %2290 = vrot.lane.b32.xlu0 %v2217_v40, %s5411_s8  ;;  %2326 = vrot.lane.b32.xlu1 %v2286_v41, %s5412_s7  ;;  %v6495_v40 = vrot.slane %v1273_v35, %v5899_v21  ;;  %v6501_v33 = vpop.permute.xlu0 %1834  ;;  %v6531_v35 = vrot.slane %v659_v0, %v5899_v21 }
 0x1a0   : > { %9143 = vst [vmem:[#allocation63_spill] sm:$0xff] %v6495_v40  ;;  %v1305_v2 = vcombine.high %v6495_v40, %v9134_v20  ;;  %9146 = vst [vmem:[#allocation66_spill] sm:$0xff] %v6531_v35 }
 0x1a1   : > { %v6509_v41 = vpop.permute.xlu1 %1858 }
 0x1a2   : > { %1608 = vrot.lane.b32.xlu0 %v1535_v57, %s5411_s8  ;;  %1406 = vrot.lane.b32.xlu1 %v1373_v29, %s5411_s8  ;;  %v6512_v57 = vrot.slane %v889_v59, %v5899_v21  ;;  %v6520_v3 = vpop.permute.xlu0 %1822 }
 0x1a4   : > { %9144 = vst [vmem:[#allocation64_spill] sm:$0xff] %v6512_v57  ;;  %v921_v7 = vcombine.high %v6512_v57, %v9134_v20 }
 0x1a5   : > { %v6525_v29 = vpop.permute.xlu1 %1176 }
 0x1a6   : > { %2068 = vrot.lane.b32.xlu0 %v1988_v53, %s5412_s7  ;;  %1644 = vrot.lane.b32.xlu1 %v1604_v62, %s5412_s7  ;;  %9145 = vst [vmem:[#allocation65_spill] sm:$0xff] %v6525_v29  ;;  %v1989_v53 = vcombine.high %v6205_v5, %v9134_v20  ;;  %v6535_v34 = vpop.permute.xlu0 %1168  ;;  %v691_v62 = vcombine.high %v6531_v35, %v9134_v20  ;;  %v9177_v29 = vld [vmem:[#allocation48_spill] sm:$0xff] }
 0x1a7   : > { %9147 = vst [vmem:[#allocation67_spill] sm:$0xff] %v6535_v34  ;;  %v1605_v5 = vcombine.high %v6251_v37, %v9134_v20  ;;  %v2058_v37 = vcombine.high %v6258_v31, %v9134_v20  ;;  %v9180_v34 = vld [vmem:[#allocation51_spill] sm:$0xff] }
 0x1aa   : > { %2298 = vrot.lane.b32.xlu0 %v2218_v43, %s5412_s7  ;;  %2104 = vrot.lane.b32.xlu1 %v2057_v9, %s5413_s9  ;;  %v6545_v43 = vpop.permute.xlu1 %1866  ;;  %v821_v9 = vcombine.low %v6386_v13, %v6389_v10  ;;  %v6553_v59 = vpop.permute.xlu0 %1140  ;;  %v692_v10 = vcombine.high %v6313_v23, %v9134_v20  ;;  %v1306_v23 = vcombine.high %v6267_v49, %v9134_v20 }
 0x1ab   : > { %9148 = vst [vmem:[#allocation68_spill] sm:$0xff] %v6553_v59  ;;  %v1537_v49 = vcombine.high %v6293_v46, %v9134_v20  ;;  %v1258_v46 = vcombine.high %v6200_v39, %v6220_v6  ;;  %v9155_v6 = vld [vmem:[#allocation49_spill] sm:$0xff] }
 0x1ac   : > { %v6567_v13 = vrot.slane %v821_v9, %v5899_v21  ;;  %v1990_v9 = vcombine.high %v6310_v42, %v9134_v20  ;;  %v2288_v42 = vcombine.high %v9155_v6, %v9134_v20 }
 0x1ad   : > { %v6628_v39 = vrot.slane %v1258_v46, %v5611_v8  ;;  %v9158_v46 = vld [vmem:[#allocation23_spill] sm:$0xff] }
 0x1ae   : > { %1378 = vrot.lane.b32.xlu0 %v1305_v2, %s5411_s8  ;;  %2334 = vrot.lane.b32.xlu1 %v2287_v61, %s5413_s9  ;;  %v6561_v17 = vpop.permute.xlu1 %1870  ;;  %9150 = vst [vmem:[#allocation70_spill] sm:$0xff] %v6567_v13  ;;  %v6571_v2 = vpop.permute.xlu0 %1830  ;;  %v853_v31 = vcombine.high %v6567_v13, %v9134_v20  ;;  %v922_v61 = vcombine.high %v6340_v60, %v9134_v20 }
 0x1af   : > { %v1137_v60 = vcombine.high %v5949_v12, %v9134_v20  ;;  %v854_v13 = vcombine.high %v6407_v36, %v9134_v20  ;;  %v9173_v36 = vld [vmem:[#allocation42_spill] sm:$0xff] }
 0x1b2   : > { %1616 = vrot.lane.b32.xlu0 %v1536_v32, %s5412_s7  ;;  %954 = vrot.lane.b32.xlu1 %v921_v7, %s5411_s8  ;;  %v6579_v32 = vpop.permute.xlu1 %479  ;;  %v6585_v0 = vpop.permute.xlu0 %1148  ;;  %v314_v7 = vcombine.low %v5869_v30, %v5876_v50 }
 0x1b3   : > { %9151 = vst [vmem:[#allocation71_spill] sm:$0xff] %v6579_v32  ;;  %9152 = vst [vmem:[#allocation72_spill] sm:$0xff] %v6585_v0 }
 0x1b4   : > { %v6600_v11 = vrot.slane %v314_v7, %v5611_v8 }
 0x1b6   : > { %2076 = vrot.lane.b32.xlu0 %v1989_v53, %s5413_s9  ;;  %1414 = vrot.lane.b32.xlu1 %v1374_v16, %s5412_s7  ;;  %v330_v53 = vcombine.low %v5874_v47, %v5886_v26  ;;  %v6609_v12 = vpop.permute.xlu0 %1838 }
 0x1ba   : > { %724 = vrot.lane.b32.xlu0 %v691_v62, %s5411_s8  ;;  %1652 = vrot.lane.b32.xlu1 %v1605_v5, %s5413_s9  ;;  %v6603_v62 = vrot.slane %v330_v53, %v5611_v8  ;;  %v1375_v5 = vcombine.high %v6361_v45, %v9134_v20 }
 0x1bc   : > { %v6593_v16 = vpop.permute.xlu1 %2322  ;;  %v346_v45 = vcombine.low %v6600_v11, %v6603_v62 }
 0x1be   : > { %2306 = vrot.lane.b32.xlu0 %v2219_v51, %s5413_s9  ;;  %2112 = vrot.lane.b32.xlu1 %v2058_v37, %s5415_s11  ;;  %v1606_v37 = vcombine.high %v6374_v18, %v9134_v20  ;;  %v9156_v18 = vld [vmem:[#allocation34_spill] sm:$0xff]  ;;  %v6637_v53 = vrot.slane %v346_v45, %v5899_v21 }
 0x1bf   : > { %v1820_v7 = vcombine.high %v9156_v18, %v9134_v20 }
 0x1c0   : > { %v378_v45 = vcombine.high %v6637_v53, %v9134_v20 }
 0x1c2   : > { %696 = vrot.lane.b32.xlu0 %v623_v24, %s5411_s8  ;;  %732 = vrot.lane.b32.xlu1 %v692_v10, %s5412_s7  ;;  %v9153_v24 = vld [vmem:[#allocation41_spill] sm:$0xff]  ;;  %v9154_v10 = vld [vmem:[#allocation38_spill] sm:$0xff] }
 0x1c3   : > { %9157 = vst [vmem:[#allocation41_spill] sm:$0xff] %v6637_v53  ;;  %v9164_v53 = vld [vmem:[#allocation37_spill] sm:$0xff] }
 0x1c4   : > { %v6607_v51 = vpop.permute.xlu1 %1640 }
 0x1c6   : > { %926 = vrot.lane.b32.xlu0 %v853_v31, %s5411_s8  ;;  %962 = vrot.lane.b32.xlu1 %v922_v61, %s5412_s7  ;;  %v1242_v31 = vcombine.high %v9154_v10, %v9153_v24 }
 0x1c8   : > { %v6624_v61 = vpop.permute.xlu1 %2100 }
 0x1ca   : > { %1386 = vrot.lane.b32.xlu0 %v1306_v23, %s5412_s7  ;;  %1184 = vrot.lane.b32.xlu1 %v1137_v60, %s5413_s9  ;;  %v6632_v23 = vpop.permute.xlu0 %2092  ;;  %v6640_v60 = vrot.slane %v1242_v31, %v5611_v8 }
 0x1cc   : > { %v6652_v10 = vpop.permute.xlu1 %2330  ;;  %v1290_v14 = vcombine.high %v6640_v60, %v6628_v39 }
 0x1ce   : > { %1624 = vrot.lane.b32.xlu0 %v1537_v49, %s5413_s9  ;;  %1422 = vrot.lane.b32.xlu1 %v1375_v5, %s5413_s9  ;;  %v1289_v49 = vcombine.low %v6640_v60, %v6628_v39  ;;  %v6646_v5 = vpop.permute.xlu0 %2064 }
 0x1d0   : > { %v1297_v6 = vrot.slane %v1289_v49, %v5899_v21 }
 0x1d2   : > { %2084 = vrot.lane.b32.xlu0 %v1990_v9, %s5415_s11  ;;  %1660 = vrot.lane.b32.xlu1 %v1606_v37, %s5415_s11  ;;  %v9159_v9 = vld [vmem:[#allocation24_spill] sm:$0xff]  ;;  %v6658_v31 = vpop.permute.xlu0 %2294 }
 0x1d3   : > { %v9160_v37 = vcombine.low %v9158_v46, %v9159_v9 }
 0x1d5   : > { %v1059_v24 = vrot.slane %v9160_v37, %v5899_v21  ;;  %v9163_v37 = vld [vmem:[#allocation36_spill] sm:$0xff] }
 0x1d6   : > { %2342 = vrot.lane.b32.xlu0 %v2288_v42, %s5415_s11  ;;  %1874 = vrot.lane.b32.xlu1 %v1820_v7, %s5415_s11  ;;  %v624_v42 = vcombine.high %v6377_v27, %v9134_v20  ;;  %v6667_v7 = vpop.permute.xlu0 %1612  ;;  %v9165_v32 = vcombine.high %v9163_v37, %v9164_v53  ;;  %v9167_v27 = vld [vmem:[#allocation45_spill] sm:$0xff]  ;;  %v9172_v53 = vld [vmem:[#allocation44_spill] sm:$0xff] }
 0x1d7   : > { %9162 = vst [vmem:[#allocation49_spill] sm:$0xff] %v6667_v7  ;;  %v644_v0 = vcombine.high %v9168_v56, %v9167_v27  ;;  %v628_v37 = vcombine.high %v9173_v36, %v9172_v53  ;;  %v9175_v27 = vld [vmem:[#allocation47_spill] sm:$0xff]  ;;  %v1307_v53 = vcombine.high %v1297_v6, %v9134_v20 }
 0x1d9   : > { %v6695_v56 = vrot.slane %v644_v0, %v5611_v8  ;;  %v6705_v36 = vrot.slane %v628_v37, %v5611_v8  ;;  %v9179_v0 = vld [vmem:[#allocation53_spill] sm:$0xff] }
 0x1da   : > { %1152 = vrot.lane.b32.xlu0 %v1059_v24, %s5410_s16  ;;  %451 = vrot.lane.b32.xlu1 %v378_v45, %s5411_s8  ;;  %v1534_v45 = vrot.slane %v9165_v32, %v5899_v21  ;;  %v1069_v32 = vcombine.high %v1059_v24, %v9134_v20  ;;  %v6690_v57 = vpop.permute.xlu0 %2072  ;;  %v9176_v24 = vld [vmem:[#allocation52_spill] sm:$0xff]  ;;  %v560_v40 = vcombine.high %v9180_v34, %v9179_v0  ;;  %v9181_v37 = vld [vmem:[#allocation25_spill] sm:$0xff]  ;;  %v9184_v34 = vld [vmem:[#allocation55_spill] sm:$0xff] }
 0x1db   : > { %v347_v0 = vcombine.high %v6600_v11, %v6603_v62 }
 0x1dc   : > { %v6663_v18 = vpop.permute.xlu1 %1410  ;;  %v6739_v7 = vrot.slane %v560_v40, %v5611_v8 }
 0x1dd   : > { %9161 = vst [vmem:[#allocation38_spill] sm:$0xff] %v6663_v18 }
 0x1de   : > { %1390 = vrot.lane.b32.xlu0 %v1297_v6, %s5410_s16  ;;  %704 = vrot.lane.b32.xlu1 %v624_v42, %s5412_s7  ;;  %v9169_v42 = vld [vmem:[#allocation21_spill] sm:$0xff]  ;;  %v6720_v6 = vpop.permute.xlu0 %2302 }
 0x1df   : > { %v9171_v35 = vcombine.high %v9169_v42, %v9170_v1  ;;  %v576_v42 = vcombine.high %v9176_v24, %v6335_v38  ;;  %v675_v38 = vcombine.low %v6705_v36, %v6695_v56  ;;  %v806_v24 = vcombine.high %v9184_v34, %v6371_v4 }
 0x1e0   : > { %v6675_v49 = vpop.permute.xlu1 %1648 }
 0x1e1   : > { %9166 = vst [vmem:[#allocation34_spill] sm:$0xff] %v6675_v49  ;;  %v1748_v59 = vrot.slane %v9171_v35, %v5899_v21  ;;  %v2220_v35 = vcombine.high %v6392_v58, %v9134_v20  ;;  %v683_v11 = vrot.slane %v675_v38, %v5899_v21 }
 0x1e2   : > { %1628 = vrot.lane.b32.xlu0 %v1534_v45, %s5414_s10  ;;  %934 = vrot.lane.b32.xlu1 %v854_v13, %s5412_s7  ;;  %v9174_v13 = vld [vmem:[#allocation50_spill] sm:$0xff] }
 0x1e3   : > { %v874_v1 = vcombine.high %v9175_v27, %v9174_v13 }
 0x1e4   : > { %v6685_v15 = vpop.permute.xlu1 %2108 }
 0x1e5   : > { %v6718_v58 = vrot.slane %v874_v1, %v5611_v8 }
 0x1e6   : > { %1842 = vrot.lane.b32.xlu0 %v1748_v59, %s5414_s10  ;;  %1156 = vrot.lane.b32.xlu1 %v1069_v32, %s5413_s9  ;;  %v858_v32 = vcombine.high %v9178_v63, %v9177_v29  ;;  %v9182_v63 = vld [vmem:[#allocation26_spill] sm:$0xff] }
 0x1e7   : > { %v9183_v29 = vcombine.high %v9181_v37, %v9182_v63  ;;  %v9185_v37 = vld [vmem:[#allocation56_spill] sm:$0xff]  ;;  %v9186_v63 = vld [vmem:[#allocation54_spill] sm:$0xff] }
 0x1e8   : > { %v6712_v13 = vpop.permute.xlu1 %2338  ;;  %v6735_v1 = vrot.slane %v858_v32, %v5611_v8  ;;  %v6752_v32 = vrot.slane %v806_v24, %v5611_v8 }
 0x1e9   : > { %v429_v27 = vrot.slane %v9183_v29, %v5899_v21  ;;  %v361_v29 = vrot.slane %v347_v0, %v5899_v21  ;;  %v9191_v0 = vld [vmem:[#allocation19_spill] sm:$0xff] }
 0x1ea   : > { %2314 = vrot.lane.b32.xlu0 %v2220_v35, %s5415_s11  ;;  %1394 = vrot.lane.b32.xlu1 %v1307_v53, %s5413_s9  ;;  %v6727_v35 = vrot.slane %v576_v42, %v5611_v8  ;;  %v1538_v53 = vcombine.high %v1534_v45, %v9134_v20  ;;  %v790_v42 = vcombine.high %v9186_v63, %v9185_v37  ;;  %v6746_v45 = vpop.permute.xlu0 %1382 }
 0x1eb   : > { %v905_v4 = vcombine.low %v6735_v1, %v6718_v58  ;;  %9187 = vst [vmem:[#allocation23_spill] sm:$0xff] %v6746_v45  ;;  %v447_v60 = vcombine.high %v429_v27, %v9134_v20 }
 0x1ec   : > { %v607_v62 = vcombine.low %v6739_v7, %v6727_v35  ;;  %v6754_v40 = vpop.permute.xlu1 %728  ;;  %v6759_v34 = vrot.slane %v790_v42, %v5611_v8  ;;  %v9192_v42 = vld [vmem:[#allocation20_spill] sm:$0xff] }
 0x1ed   : > { %9188 = vst [vmem:[#allocation24_spill] sm:$0xff] %v6754_v40  ;;  %v9193_v40 = vcombine.high %v9191_v0, %v9192_v42 }
 0x1ee   : > { %483 = vrot.lane.b32.xlu0 %v429_v27, %s5409_s15  ;;  %1632 = vrot.lane.b32.xlu1 %v1538_v53, %s5415_s11  ;;  %v913_v53 = vrot.slane %v905_v4, %v5899_v21  ;;  %v837_v38 = vcombine.low %v6759_v34, %v6752_v32  ;;  %v615_v24 = vrot.slane %v607_v62, %v5899_v21  ;;  %v6768_v63 = vpop.permute.xlu0 %1620 }
 0x1ef   : > { %9190 = vst [vmem:[#allocation37_spill] sm:$0xff] %v6768_v63  ;;  %v1134_v45 = vrot.slane %v9193_v40, %v5899_v21  ;;  %v9196_v63 = vld [vmem:[#allocation40_spill] sm:$0xff]  ;;  %v9198_v40 = vcombine.high %v9158_v46, %v9159_v9  ;;  %v379_v9 = vcombine.high %v361_v29, %v9134_v20 }
 0x1f0   : > { %v845_v4 = vrot.slane %v837_v38, %v5899_v21  ;;  %v625_v27 = vcombine.high %v615_v24, %v9134_v20 }
 0x1f1   : > { %v1066_v38 = vrot.slane %v9198_v40, %v5899_v21 }
 0x1f2   : > { %736 = vrot.lane.b32.xlu0 %v683_v11, %s5410_s16  ;;  %455 = vrot.lane.b32.xlu1 %v361_v29, %s5409_s15  ;;  %v6781_v62 = vpop.permute.xlu0 %2080 }
 0x1f4   : > { %v6765_v37 = vpop.permute.xlu1 %958 }
 0x1f5   : > { %9189 = vst [vmem:[#allocation36_spill] sm:$0xff] %v6765_v37  ;;  %v9195_v37 = vld [vmem:[#allocation39_spill] sm:$0xff] }
 0x1f6   : > { %966 = vrot.lane.b32.xlu0 %v913_v53, %s5410_s16  ;;  %708 = vrot.lane.b32.xlu1 %v615_v24, %s5410_s16  ;;  %v9197_v18 = vcombine.high %v9195_v37, %v9196_v63  ;;  %v331_v63 = vcombine.high %v5874_v47, %v5886_v26  ;;  %v855_v47 = vcombine.high %v845_v4, %v9134_v20 }
 0x1f7   : > { %v1138_v26 = vcombine.high %v1134_v45, %v9134_v20 }
 0x1f8   : > { %v6776_v44 = vpop.permute.xlu1 %1418  ;;  %v1372_v49 = vrot.slane %v9197_v18, %v5899_v21  ;;  %v1304_v18 = vrot.slane %v1290_v14, %v5899_v21  ;;  %v693_v14 = vcombine.high %v683_v11, %v9134_v20 }
 0x1f9   : > { %9194 = vst [vmem:[#allocation45_spill] sm:$0xff] %v6776_v44  ;;  %v1752_v44 = vcombine.high %v1748_v59, %v9134_v20 }
 0x1fa   : > { %1188 = vrot.lane.b32.xlu0 %v1134_v45, %s5414_s10  ;;  %938 = vrot.lane.b32.xlu1 %v845_v4, %s5410_s16  ;;  %v1376_v4 = vcombine.high %v1372_v49, %v9134_v20 }
 0x1fc   : > { %v6789_v0 = vpop.permute.xlu1 %1656  ;;  %v6797_v42 = vpop.permute.xlu0 %700 }
 0x1fd   : > { %9199 = vst [vmem:[#allocation43_spill] sm:$0xff] %v6797_v42 }
 0x1fe   : > { %1426 = vrot.lane.b32.xlu0 %v1372_v49, %s5414_s10  ;;  %1160 = vrot.lane.b32.xlu1 %v1066_v38, %s5414_s10 }
 0x200   : > { %v6800_v37 = vpop.permute.xlu1 %2310 }
 0x202   : > { %1846 = vrot.lane.b32.xlu0 %v1752_v44, %s5415_s11  ;;  %1398 = vrot.lane.b32.xlu1 %v1304_v18, %s5414_s10  ;;  %v315_v44 = vcombine.high %v5869_v30, %v5876_v50 }
 0x204   : > { %v6805_v39 = vpop.permute.xlu0 %930  ;;  %v6808_v46 = vpop.permute.xlu1 %2060  ;;  %v329_v11 = vrot.slane %v315_v44, %v5611_v8 }
 0x205   : > { %9200 = vst [vmem:[#allocation21_spill] sm:$0xff] %v6805_v39 }
 0x206   : > { %487 = vrot.lane.b32.xlu0 %v447_v60, %s5412_s7  ;;  %459 = vrot.lane.b32.xlu1 %v379_v9, %s5412_s7  ;;  %v923_v60 = vcombine.high %v913_v53, %v9134_v20  ;;  %v345_v9 = vrot.slane %v331_v63, %v5611_v8  ;;  %v1070_v53 = vcombine.high %v1066_v38, %v9134_v20 }
 0x207   : > { %v608_v63 = vcombine.high %v6739_v7, %v6727_v35  ;;  %v676_v38 = vcombine.high %v6705_v36, %v6695_v56  ;;  %v838_v7 = vcombine.high %v6759_v34, %v6752_v32  ;;  %v906_v56 = vcombine.high %v6735_v1, %v6718_v58 }
 0x208   : > { %v6813_v59 = vpop.permute.xlu0 %2088  ;;  %v6820_v40 = vpop.permute.xlu1 %2318  ;;  %v1308_v1 = vcombine.high %v1304_v18, %v9134_v20  ;;  %v363_v42 = vcombine.high %v329_v11, %v345_v9 }
 0x209   : > { %v920_v34 = vrot.slane %v906_v56, %v5899_v21 }
 0x20a   : > { %740 = vrot.lane.b32.xlu0 %v693_v14, %s5413_s9  ;;  %712 = vrot.lane.b32.xlu1 %v625_v27, %s5413_s9  ;;  %v362_v14 = vcombine.low %v329_v11, %v345_v9 }
 0x20c   : > { %v6825_v29 = vpop.permute.xlu0 %1636  ;;  %v6830_v30 = vpop.permute.xlu1 %2096  ;;  %v370_v45 = vrot.slane %v362_v14, %v5899_v21  ;;  %v622_v14 = vrot.slane %v608_v63, %v5899_v21 }
 0x20e   : > { %970 = vrot.lane.b32.xlu0 %v923_v60, %s5413_s9  ;;  %942 = vrot.lane.b32.xlu1 %v855_v47, %s5413_s9  ;;  %v9201_v47 = vld [vmem:[#allocation27_spill] sm:$0xff]  ;;  %v380_v39 = vcombine.high %v370_v45, %v9134_v20 }
 0x210   : > { %v6835_v50 = vpop.permute.xlu0 %2290  ;;  %v6838_v24 = vpop.permute.xlu1 %2326 }
 0x212   : > { %1192 = vrot.lane.b32.xlu0 %v1138_v26, %s5415_s11  ;;  %1164 = vrot.lane.b32.xlu1 %v1070_v53, %s5415_s11  ;;  %v9202_v26 = vld [vmem:[#allocation28_spill] sm:$0xff] }
 0x213   : > { %v9203_v49 = vcombine.low %v9201_v47, %v9202_v26 }
 0x214   : > { %v6843_v44 = vpop.permute.xlu0 %1608  ;;  %v6848_v27 = vpop.permute.xlu1 %1406 }
 0x215   : > { %v438_v53 = vrot.slane %v9203_v49, %v5899_v21  ;;  %v852_v49 = vrot.slane %v838_v7, %v5899_v21  ;;  %v626_v7 = vcombine.high %v622_v14, %v9134_v20 }
 0x216   : > { %1430 = vrot.lane.b32.xlu0 %v1376_v4, %s5415_s11  ;;  %463 = vrot.lane.b32.xlu1 %v370_v45, %s5410_s16  ;;  %v690_v4 = vrot.slane %v676_v38, %v5899_v21 }
 0x217   : > { %v448_v45 = vcombine.high %v438_v53, %v9134_v20 }
 0x218   : > { %v6855_v60 = vpop.permute.xlu0 %2068  ;;  %v6863_v35 = vpop.permute.xlu1 %1644  ;;  %v694_v11 = vcombine.high %v690_v4, %v9134_v20 }
 0x21a   : > { %491 = vrot.lane.b32.xlu0 %v438_v53, %s5410_s16  ;;  %716 = vrot.lane.b32.xlu1 %v622_v14, %s5414_s10 }
 0x21c   : > { %v6870_v36 = vpop.permute.xlu0 %2298  ;;  %v6873_v8 = vpop.permute.xlu1 %2104 }
 0x21e   : > { %744 = vrot.lane.b32.xlu0 %v690_v4, %s5414_s10  ;;  %946 = vrot.lane.b32.xlu1 %v852_v49, %s5414_s10  ;;  %v9206_v4 = vcombine.high %v9201_v47, %v9202_v26  ;;  %v2352_v26 = vsel %vm506_vm3, %v6421_v28, %v6820_v40 }
 0x220   : > { %v6878_v32 = vpop.permute.xlu0 %1378  ;;  %v2335_v63 = vpop.permute.xlu1 %2334 }
 0x221   : > { %9204 = vst [vmem:[#allocation22_spill] sm:$0xff] %v6878_v32 }
 0x222   : > { %974 = vrot.lane.b32.xlu0 %v920_v34, %s5414_s10  ;;  %467 = vrot.lane.b32.xlu1 %v380_v39, %s5413_s9  ;;  %v377_v39 = vrot.slane %v363_v42, %v5899_v21  ;;  %v924_v42 = vcombine.high %v920_v34, %v9134_v20  ;;  %v856_v34 = vcombine.high %v852_v49, %v9134_v20  ;;  %v2393_v49 = vld [vmem:[%s8976_s2] sm:$0xf] }
 0x224   : > { %v6884_v58 = vpop.permute.xlu0 %1616  ;;  %v6887_v38 = vpop.permute.xlu1 %954  ;;  %v381_v14 = vcombine.high %v377_v39, %v9134_v20 }
 0x226   : > { %1402 = vrot.lane.b32.xlu0 %v1308_v1, %s5415_s11  ;;  %720 = vrot.lane.b32.xlu1 %v626_v7, %s5415_s11 }
 0x228   : > { %v6892_v56 = vpop.permute.xlu0 %2076  ;;  %v6895_v32 = vpop.permute.xlu1 %1414 }
 0x22a   : > { %495 = vrot.lane.b32.xlu0 %v448_v45, %s5413_s9  ;;  %471 = vrot.lane.b32.xlu1 %v377_v39, %s5414_s10  ;;  %v445_v45 = vrot.slane %v9206_v4, %v5899_v21 }
 0x22c   : > { %v6900_v18 = vpop.permute.xlu0 %724  ;;  %v6903_v9 = vpop.permute.xlu1 %1652  ;;  %v449_v47 = vcombine.high %v445_v45, %v9134_v20 }
 0x22d   : > { %9205 = vst [vmem:[#allocation44_spill] sm:$0xff] %v6900_v18 }
 0x22e   : > { %748 = vrot.lane.b32.xlu0 %v694_v11, %s5415_s11  ;;  %475 = vrot.lane.b32.xlu1 %v381_v14, %s5415_s11  ;;  %v5416_v11 = vmov 0  }
 0x22f   : > { %5263 = vset.pattern.permute.xlu0 %v5416_v11  ;;  %v2353_v11 = vsel %vm508_vm4, %v2352_v26, %v6593_v16 }
 0x230   : > { %v6908_v53 = vpop.permute.xlu0 %2306  ;;  %v6911_v1 = vpop.permute.xlu1 %2112 }
 0x232   : > { %978 = vrot.lane.b32.xlu0 %v924_v42, %s5415_s11 }
 0x234   : > { %v6914_v7 = vpop.permute.xlu0 %696  ;;  %v6920_v39 = vpop.permute.xlu1 %732 }
 0x236   : > { %499 = vrot.lane.b32.xlu0 %v445_v45, %s5414_s10  ;;  %v2354_v45 = vsel %vm510_vm5, %v2353_v11, %v6838_v24 }
 0x237   : > { %v2355_v28 = vsel %vm512_vm6, %v2354_v45, %v6652_v10  ;;  %v2122_v10 = vsel %vm506_vm3, %v6413_v55, %v6813_v59  ;;  %v9209_v55 = vld [vmem:[#allocation57_spill] sm:$0xff] }
 0x238   : > { %v6923_v14 = vpop.permute.xlu0 %926  ;;  %v6926_v18 = vpop.permute.xlu1 %962  ;;  %v2123_v45 = vsel %vm508_vm4, %v2122_v10, %v6632_v23 }
 0x23a   : > { %950 = vrot.lane.b32.xlu0 %v856_v34, %s5415_s11 }
 0x23c   : > { %v6929_v42 = vpop.permute.xlu0 %1386  ;;  %v6935_v4 = vpop.permute.xlu1 %1184 }
 0x23e   : > { %503 = vrot.lane.b32.xlu0 %v449_v47, %s5415_s11  ;;  %v2356_v47 = vsel %vm514_vm7, %v2355_v28, %v2335_v63 }
 0x23f   : > { %v2357_v24 = vsel %vm516_vm8, %v2356_v47, %v6712_v13  ;;  %v9208_v13 = vld [vmem:[#allocation32_spill] sm:$0xff] }
 0x240   : > { %v6943_v34 = vpop.permute.xlu0 %1624  ;;  %v6947_v20 = vpop.permute.xlu1 %1422  ;;  %v1884_v47 = vsel %vm506_vm3, %v9208_v13, %v6489_v48 }
 0x241   : > { %v1885_v59 = vsel %vm508_vm4, %v1884_v47, %v9209_v55 }
 0x242   : > { %2396 = vperm.xlu0 %5263, %v2393_v49   ;;  %v1886_v48 = vsel %vm510_vm5, %v1885_v59, %v6509_v41 }
 0x244   : > { %v6951_v40 = vpop.permute.xlu0 %2084  ;;  %v6954_v21 = vpop.permute.xlu1 %1660 }
 0x248   : > { %v2343_v16 = vpop.permute.xlu0 %2342  ;;  %v1875_v26 = vpop.permute.xlu1 %1874 }
 0x249   : > { %v2358_v49 = vsel %vm518_vm10, %v2357_v24, %v2343_v16  ;;  %v2124_v16 = vsel %vm510_vm5, %v2123_v45, %v6830_v30  ;;  %v2345_v24 = vsel %vm506_vm3, %v6448_v25, %v6835_v50  ;;  %v1887_v45 = vsel %vm512_vm6, %v1886_v48, %v6455_v52 }
 0x24a   : > { %5188 = vmatprep.subr.msk.mxu0 %vm2383_vm9, %v2358_v49  ;;  %v2125_v23 = vsel %vm512_vm6, %v2124_v16, %v6624_v61  ;;  %v2346_v10 = vsel %vm508_vm4, %v2345_v24, %v6658_v31  ;;  %v1888_v41 = vsel %vm514_vm7, %v1887_v45, %v6545_v43 }
 0x24b   : > { %v2126_v30 = vsel %vm514_vm7, %v2125_v23, %v6873_v8  ;;  %v2347_v25 = vsel %vm510_vm5, %v2346_v10, %v6870_v36  ;;  %v1889_v52 = vsel %vm516_vm8, %v1888_v41, %v6561_v17 }
 0x24c   : > { %v6960_v11 = vpop.permute.xlu0 %1152  ;;  %v6965_v63 = vpop.permute.xlu1 %451  ;;  %v2127_v61 = vsel %vm516_vm8, %v2126_v30, %v6685_v15  ;;  %v2348_v31 = vsel %vm512_vm6, %v2347_v25, %v6720_v6  ;;  %v1890_v15 = vsel %vm518_vm10, %v1889_v52, %v1875_v26  ;;  %v2115_v26 = vsel %vm506_vm3, %v6398_v54, %v6808_v46  ;;  %v9210_v25 = vld [vmem:[#allocation30_spill] sm:$0xff] }
 0x24d   : > { %9207 = vst [vmem:[#allocation42_spill] sm:$0xff] %v6965_v63  ;;  %v2128_v8 = vsel %vm518_vm10, %v2127_v61, %v6911_v1  ;;  %v2349_v36 = vsel %vm514_vm7, %v2348_v31, %v6908_v53  ;;  %v2116_v23 = vsel %vm508_vm4, %v2115_v26, %v6646_v5  ;;  %v1877_v45 = vsel %vm506_vm3, %v9210_v25, %v6520_v3 }
 0x24e   : > { %v2380_v16 = vrot.slane %v2128_v8, 4  ;;  %v2350_v6 = vsel %vm516_vm8, %v2349_v36, %v6800_v37  ;;  %v2117_v48 = vsel %vm510_vm5, %v2116_v23, %v6855_v60  ;;  %v1878_v31 = vsel %vm508_vm4, %v1877_v45, %v6468_v19  ;;  %v9212_v23 = vld [vmem:[#allocation34_spill] sm:$0xff] }
 0x24f   : > { %v2118_v61 = vsel %vm512_vm6, %v2117_v48, %v6690_v57  ;;  %v1879_v60 = vsel %vm510_vm5, %v1878_v31, %v6571_v2 }
 0x250   : > { %v6969_v28 = vpop.permute.xlu0 %1390  ;;  %v6979_v49 = vpop.permute.xlu1 %704  ;;  %v2391_v53 = vsel %vm2383_vm9, %v1890_v15, %v2380_v16  ;;  %v2119_v46 = vsel %vm514_vm7, %v2118_v61, %v6892_v56  ;;  %v1880_v56 = vsel %vm512_vm6, %v1879_v60, %v6501_v33  ;;  %v9214_v60 = vld [vmem:[#allocation45_spill] sm:$0xff] }
 0x251   : > { %v2120_v41 = vsel %vm516_vm8, %v2119_v46, %v6781_v62  ;;  %v1881_v36 = vsel %vm514_vm7, %v1880_v56, %v6609_v12 }
 0x252   : > { %v2121_v57 = vsel %vm518_vm10, %v2120_v41, %v6951_v40  ;;  %v1670_v40 = vsel %vm506_vm3, %v6432_v22, %v6825_v29 }
 0x253   : > { %v2379_v52 = vrot.slane %v2121_v57, 4  ;;  %v1671_v12 = vsel %vm508_vm4, %v1670_v40, %v6607_v51  ;;  %v9213_v51 = vld [vmem:[#allocation38_spill] sm:$0xff] }
 0x254   : > { %v6987_v63 = vpop.permute.xlu0 %1628  ;;  %v6995_v50 = vpop.permute.xlu1 %934 }
 0x258   : > { %v1843_v13 = vpop.permute.xlu0 %1842  ;;  %v7009_v47 = vpop.permute.xlu1 %1156 }
 0x259   : > { %v1882_v19 = vsel %vm516_vm8, %v1881_v36, %v1843_v13  ;;  %v1672_v13 = vsel %vm510_vm5, %v1671_v12, %v6863_v35  ;;  %v9217_v12 = vld [vmem:[#allocation22_spill] sm:$0xff] }
 0x25a   : > { %v1673_v48 = vsel %vm512_vm6, %v1672_v13, %v9212_v23  ;;  %v9218_v13 = vld [vmem:[#allocation63_spill] sm:$0xff] }
 0x25b   : > { %v1674_v29 = vsel %vm514_vm7, %v1673_v48, %v6903_v9  ;;  %v9220_v48 = vld [vmem:[#allocation23_spill] sm:$0xff] }
 0x25c   : > { %v2315_v24 = vpop.permute.xlu0 %2314  ;;  %v7016_v55 = vpop.permute.xlu1 %1394  ;;  %v1675_v61 = vsel %vm516_vm8, %v1674_v29, %v6789_v0 }
 0x25d   : > { %v2351_v43 = vsel %vm518_vm10, %v2350_v6, %v2315_v24 }
 0x25e   : > { %5189 = vmatpush1.msk.msra.mxu0 %vm2383_vm9, %v2351_v43 }
 0x25f   : > { %2433 = vmatprep.subr.mxu0 %v2391_v53  ;;  %v9211_v53 = vld [vmem:[#allocation60_spill] sm:$0xff] }
 0x260   : > { %v7021_v1 = vpop.permute.xlu0 %483  ;;  %v7023_v59 = vpop.permute.xlu1 %1632  ;;  %v1440_v26 = vsel %vm506_vm3, %v9211_v53, %v6848_v27  ;;  %v1676_v27 = vsel %vm518_vm10, %v1675_v61, %v6954_v21  ;;  %v9215_v21 = vld [vmem:[#allocation59_spill] sm:$0xff]  ;;  %v1433_v53 = vsel %vm506_vm3, %v9218_v13, %v9217_v12  ;;  %v9227_v12 = vld [vmem:[#allocation36_spill] sm:$0xff] }
 0x261   : > { %v1441_v45 = vsel %vm508_vm4, %v1440_v26, %v9213_v51  ;;  %v2374_v57 = vrot.slane %v1676_v27, 4  ;;  %v9219_v26 = vld [vmem:[#allocation37_spill] sm:$0xff]  ;;  %v1434_v29 = vsel %vm508_vm4, %v1433_v53, %v9220_v48 }
 0x262   : > { %v1442_v35 = vsel %vm510_vm5, %v1441_v45, %v6895_v32  ;;  %v1435_v45 = vsel %vm510_vm5, %v1434_v29, %v6929_v42 }
 0x263   : > { %v1443_v9 = vsel %vm512_vm6, %v1442_v35, %v9214_v60  ;;  %v1436_v27 = vsel %vm512_vm6, %v1435_v45, %v6969_v28  ;;  %v9221_v60 = vld [vmem:[#allocation67_spill] sm:$0xff]  ;;  %v9230_v45 = vld [vmem:[#allocation44_spill] sm:$0xff] }
 0x264   : > { %v7025_v17 = vpop.permute.xlu0 %736  ;;  %v7030_v37 = vpop.permute.xlu1 %455  ;;  %v1444_v41 = vsel %vm514_vm7, %v1443_v9, %v6947_v20 }
 0x268   : > { %v7034_v10 = vpop.permute.xlu0 %966  ;;  %v7038_v30 = vpop.permute.xlu1 %708 }
 0x26c   : > { %v7045_v54 = vpop.permute.xlu0 %1188  ;;  %v7049_v5 = vpop.permute.xlu1 %938 }
 0x270   : > { %v1427_v3 = vpop.permute.xlu0 %1426  ;;  %v7059_v8 = vpop.permute.xlu1 %1160 }
 0x271   : > { %v1445_v56 = vsel %vm516_vm8, %v1444_v41, %v1427_v3  ;;  %v1437_v41 = vsel %vm514_vm7, %v1436_v27, %v7016_v55  ;;  %v9225_v55 = vld [vmem:[#allocation64_spill] sm:$0xff] }
 0x274   : > { %v1847_v15 = vpop.permute.xlu0 %1846  ;;  %v1399_v2 = vpop.permute.xlu1 %1398 }
 0x275   : > { %v1883_v16 = vsel %vm518_vm10, %v1882_v19, %v1847_v15  ;;  %v1663_v19 = vsel %vm506_vm3, %v9215_v21, %v6843_v44 }
 0x276   : > { %v2390_v62 = vsel %vm2383_vm9, %v1883_v16, %v2379_v52  ;;  %v9216_v16 = vld [vmem:[#allocation49_spill] sm:$0xff] }
 0x277   : > { %2434 = vmatpush1.msra.mxu0 %v2390_v62  ;;  %v1664_v20 = vsel %vm508_vm4, %v1663_v19, %v9216_v16  ;;  %v988_v16 = vsel %vm506_vm3, %v9225_v55, %v6887_v38 }
 0x278   : > { %v7068_v24 = vpop.permute.xlu0 %487  ;;  %v7073_v33 = vpop.permute.xlu1 %459  ;;  %v1665_v3 = vsel %vm510_vm5, %v1664_v20, %v6884_v58  ;;  %v989_v13 = vsel %vm508_vm4, %v988_v16, %v9227_v12  ;;  %v9241_v12 = vld [vmem:[#allocation43_spill] sm:$0xff] }
 0x279   : > { %v1666_v44 = vsel %vm512_vm6, %v1665_v3, %v9219_v26  ;;  %v990_v38 = vsel %vm510_vm5, %v989_v13, %v6926_v18  ;;  %v9233_v18 = vld [vmem:[#allocation72_spill] sm:$0xff]  ;;  %v9242_v13 = vld [vmem:[#allocation21_spill] sm:$0xff] }
 0x27a   : > { %v1667_v23 = vsel %vm514_vm7, %v1666_v44, %v6943_v34  ;;  %v9222_v34 = vld [vmem:[#allocation31_spill] sm:$0xff]  ;;  %v9228_v44 = vld [vmem:[#allocation68_spill] sm:$0xff] }
 0x27b   : > { %v1668_v58 = vsel %vm516_vm8, %v1667_v23, %v6987_v63  ;;  %v1202_v9 = vsel %vm506_vm3, %v9222_v34, %v9221_v60  ;;  %v9229_v23 = vld [vmem:[#allocation33_spill] sm:$0xff]  ;;  %v9232_v60 = vld [vmem:[#allocation62_spill] sm:$0xff] }
 0x27c   : > { %v7077_v6 = vpop.permute.xlu0 %740  ;;  %v7081_v43 = vpop.permute.xlu1 %712  ;;  %v1669_v35 = vsel %vm518_vm10, %v1668_v58, %v7023_v59  ;;  %v1195_v48 = vsel %vm506_vm3, %v9229_v23, %v9228_v44 }
 0x27d   : > { %v2373_v63 = vrot.slane %v1669_v35, 4  ;;  %v9231_v35 = vld [vmem:[#allocation66_spill] sm:$0xff]  ;;  %v1196_v34 = vsel %vm508_vm4, %v1195_v48, %v9232_v60 }
 0x27e   : > { %v758_v27 = vsel %vm506_vm3, %v9231_v35, %v9230_v45 }
 0x280   : > { %v971_v22 = vpop.permute.xlu0 %970  ;;  %v7090_v25 = vpop.permute.xlu1 %942 }
 0x284   : > { %v1193_v46 = vpop.permute.xlu0 %1192  ;;  %v7100_v31 = vpop.permute.xlu1 %1164 }
 0x288   : > { %v1431_v36 = vpop.permute.xlu0 %1430  ;;  %v7107_v32 = vpop.permute.xlu1 %463 }
 0x289   : > { %v1446_v0 = vsel %vm518_vm10, %v1445_v56, %v1431_v36  ;;  %v9223_v36 = vld [vmem:[#allocation58_spill] sm:$0xff] }
 0x28a   : > { %v2389_v52 = vsel %vm2383_vm9, %v1446_v0, %v2374_v57  ;;  %v1438_v57 = vsel %vm516_vm8, %v1437_v41, %v1399_v2  ;;  %v1203_v59 = vsel %vm508_vm4, %v1202_v9, %v9223_v36  ;;  %v9226_v2 = vld [vmem:[#allocation61_spill] sm:$0xff]  ;;  %v9236_v36 = vld [vmem:[#allocation24_spill] sm:$0xff] }
 0x28b   : > { %2435 = vmatprep.subr.mxu0 %v2389_v52  ;;  %v9224_v52 = vld [vmem:[#allocation65_spill] sm:$0xff] }
 0x28c   : > { %v7114_v15 = vpop.permute.xlu0 %491  ;;  %v7120_v62 = vpop.permute.xlu1 %716  ;;  %v1204_v28 = vsel %vm510_vm5, %v1203_v59, %v9224_v52  ;;  %v759_v59 = vsel %vm508_vm4, %v758_v27, %v9236_v36  ;;  %v9237_v52 = vld [vmem:[#allocation71_spill] sm:$0xff] }
 0x28d   : > { %v1205_v20 = vsel %vm512_vm6, %v1204_v28, %v9226_v2  ;;  %v9238_v28 = vld [vmem:[#allocation35_spill] sm:$0xff]  ;;  %v9239_v2 = vld [vmem:[#allocation42_spill] sm:$0xff] }
 0x28e   : > { %v1206_v3 = vsel %vm514_vm7, %v1205_v20, %v6935_v4  ;;  %v991_v4 = vsel %vm512_vm6, %v990_v38, %v7034_v10  ;;  %v520_v55 = vsel %vm506_vm3, %v9238_v28, %v9237_v52  ;;  %v9240_v20 = vld [vmem:[#allocation41_spill] sm:$0xff] }
 0x28f   : > { %v1207_v53 = vsel %vm516_vm8, %v1206_v3, %v7045_v54  ;;  %v992_v54 = vsel %vm514_vm7, %v991_v4, %v971_v22  ;;  %v507_v3 = vsel %vm506_vm3, %v9240_v20, %v9239_v2  ;;  %v521_v48 = vsel %vm508_vm4, %v520_v55, %v7021_v1 }
 0x290   : > { %v7122_v40 = vpop.permute.xlu0 %744  ;;  %v7139_v61 = vpop.permute.xlu1 %946  ;;  %v1208_v29 = vsel %vm518_vm10, %v1207_v53, %v1193_v46  ;;  %v1197_v46 = vsel %vm510_vm5, %v1196_v34, %v9233_v18  ;;  %v522_v1 = vsel %vm510_vm5, %v521_v48, %v7068_v24 }
 0x291   : > { %v2368_v9 = vrot.slane %v1208_v29, 4  ;;  %v509_v29 = vsel %vm508_vm4, %v507_v3, %v7030_v37 }
 0x294   : > { %v975_v51 = vpop.permute.xlu0 %974  ;;  %v468_v21 = vpop.permute.xlu1 %467 }
 0x295   : > { %v993_v41 = vsel %vm516_vm8, %v992_v54, %v975_v51  ;;  %v1198_v51 = vsel %vm512_vm6, %v1197_v46, %v6960_v11 }
 0x298   : > { %v1403_v56 = vpop.permute.xlu0 %1402  ;;  %v721_v58 = vpop.permute.xlu1 %720 }
 0x299   : > { %v1439_v42 = vsel %vm518_vm10, %v1438_v57, %v1403_v56  ;;  %v9234_v57 = vld [vmem:[#allocation69_spill] sm:$0xff]  ;;  %v9235_v56 = vld [vmem:[#allocation70_spill] sm:$0xff] }
 0x29a   : > { %v2388_v0 = vsel %vm2383_vm9, %v1439_v42, %v2373_v63  ;;  %v751_v10 = vsel %vm506_vm3, %v9234_v57, %v6914_v7  ;;  %v981_v42 = vsel %vm506_vm3, %v9235_v56, %v6923_v14  ;;  %v760_v7 = vsel %vm510_vm5, %v759_v59, %v6920_v39 }
 0x29b   : > { %2436 = vmatpush1.msra.mxu0 %v2388_v0  ;;  %v1199_v14 = vsel %vm514_vm7, %v1198_v51, %v7009_v47  ;;  %v752_v11 = vsel %vm508_vm4, %v751_v10, %v9241_v12  ;;  %v982_v53 = vsel %vm508_vm4, %v981_v42, %v9242_v13  ;;  %v761_v4 = vsel %vm512_vm6, %v760_v7, %v7025_v17  ;;  %v9243_v7 = vld [vmem:[#allocation10_spill] sm:$0xff] }
 0x29c   : > { %v7155_v19 = vpop.permute.xlu0 %495  ;;  %v472_v16 = vpop.permute.xlu1 %471  ;;  %v1200_v44 = vsel %vm516_vm8, %v1199_v14, %v7059_v8  ;;  %v753_v39 = vsel %vm510_vm5, %v752_v11, %v6979_v49  ;;  %v983_v47 = vsel %vm510_vm5, %v982_v53, %v6995_v50  ;;  %v511_v50 = vsel %vm510_vm5, %v509_v29, %v7073_v33 }
 0x29d   : > { %v1201_v38 = vsel %vm518_vm10, %v1200_v44, %v7100_v31  ;;  %v754_v8 = vsel %vm512_vm6, %v753_v39, %v7038_v30  ;;  %v984_v49 = vsel %vm512_vm6, %v983_v47, %v7049_v5  ;;  %v762_v31 = vsel %vm514_vm7, %v761_v4, %v7077_v6 }
 0x29e   : > { %v985_v37 = vsel %vm514_vm7, %v984_v49, %v7090_v25  ;;  %v755_v17 = vsel %vm514_vm7, %v754_v8, %v7081_v43  ;;  %v2367_v45 = vrot.slane %v1201_v38, 4  ;;  %v763_v5 = vsel %vm516_vm8, %v762_v31, %v7122_v40  ;;  %v9244_v38 = vld [vmem:[#allocation29_spill] sm:$0xff] }
 0x29f   : > { %v986_v30 = vsel %vm516_vm8, %v985_v37, %v7139_v61  ;;  %v513_v24 = vsel %vm512_vm6, %v511_v50, %v7107_v32  ;;  %v756_v6 = vsel %vm516_vm8, %v755_v17, %v7120_v62  ;;  %v523_v43 = vsel %vm512_vm6, %v522_v1, %v7114_v15 }
 0x2a0   : > { %v749_v26 = vpop.permute.xlu0 %748  ;;  %v476_v35 = vpop.permute.xlu1 %475  ;;  %v515_v61 = vsel %vm514_vm7, %v513_v24, %v468_v21  ;;  %v757_v54 = vsel %vm518_vm10, %v756_v6, %v721_v58  ;;  %v524_v32 = vsel %vm514_vm7, %v523_v43, %v7155_v19  ;;  %v2392_v58 = vld [vmem:[%s8975_s1] sm:$0xf] }
 0x2a1   : > { %v764_v25 = vsel %vm518_vm10, %v763_v5, %v749_v26  ;;  %v517_v60 = vsel %vm516_vm8, %v515_v61, %v472_v16 }
 0x2a2   : > { %v519_v62 = vsel %vm518_vm10, %v517_v60, %v476_v35  ;;  %v2362_v26 = vrot.slane %v764_v25, 4 }
 0x2a4   : > { %v979_v63 = vpop.permute.xlu0 %978 }
 0x2a5   : > { %v994_v22 = vsel %vm518_vm10, %v993_v41, %v979_v63  ;;  %v2361_v41 = vrot.slane %v757_v54, 4 }
 0x2a6   : > { %v2387_v0 = vsel %vm2383_vm9, %v994_v22, %v2368_v9 }
 0x2a7   : > { %2437 = vmatprep.subr.mxu0 %v2387_v0  ;;  %v2384_v19 = vsel %vm2383_vm9, %v519_v62, %v2361_v41 }
 0x2a8   : > { %v500_v23 = vpop.permute.xlu0 %499 }
 0x2a9   : > { %v525_v34 = vsel %vm516_vm8, %v524_v32, %v500_v23 }
 0x2ac   : > { %v951_v33 = vpop.permute.xlu0 %950 }
 0x2ad   : > { %v987_v27 = vsel %vm518_vm10, %v986_v30, %v951_v33 }
 0x2ae   : > { %v2386_v40 = vsel %vm2383_vm9, %v987_v27, %v2367_v45 }
 0x2af   : > { %2438 = vmatpush1.msra.mxu0 %v2386_v40 }
 0x2b0   : > { %v504_v9 = vpop.permute.xlu0 %503 }
 0x2b1   : > { %v526_v15 = vsel %vm518_vm10, %v525_v34, %v504_v9 }
 0x2b2   : > { %v2385_v21 = vsel %vm2383_vm9, %v526_v15, %v2362_v26 }
 0x2b3   : > { %2439 = vmatprep.subr.mxu0 %v2385_v21 }
 0x2b4   : > { %2440 = vmatpush1.msra.mxu0 %v2384_v19 }
 0x2b5   : > { %5190 = vmatmul.mubr.msk.f32.vlgmr.msra.gmra.mxu0 %vm2399_vm11, %v2392_v58 }
 0x2bd   : > { %v2397_v63 = vpop.permute.xlu0 %2396 }
 0x375   : > { %v2475_v18 = vpop.f32.mrf.mxu0 }
 0x376   : > { %v2476_v46 = vadd.f32 %v2475_v18, %v2397_v63 }
 0x377   : > { %v2477_v10 = vpop.f32.mrf.mxu0 }
 0x378   : > { %v2480_v57 = vmax.f32 %v2476_v46, 0.0  ;;  %v2478_v56 = vadd.f32 %v2477_v10, %v2397_v63 }
 0x37a   : > { %2498 = vrot.lane.b32.xlu0 %v2480_v57, %s5414_s10  ;;  %2495 = vrot.lane.b32.xlu1 %v2480_v57, %s5415_s11  ;;  %v2481_v42 = vmax.f32 %v2478_v56, 0.0 }
 0x37e   : > { %2504 = vrot.lane.b32.xlu0 %v2480_v57, %s5410_s16  ;;  %2501 = vrot.lane.b32.xlu1 %v2480_v57, %s5413_s9 }
 0x382   : > { %2510 = vrot.lane.b32.xlu0 %v2480_v57, %s5409_s15  ;;  %2507 = vrot.lane.b32.xlu1 %v2480_v57, %s5412_s7 }
 0x386   : > { %2523 = vrot.lane.b32.xlu0 %v2481_v42, %s5413_s9  ;;  %2513 = vrot.lane.b32.xlu1 %v2480_v57, %s5411_s8 }
 0x38a   : > { %2529 = vrot.lane.b32.xlu0 %v2481_v42, %s5412_s7  ;;  %2517 = vrot.lane.b32.xlu1 %v2481_v42, %s5415_s11 }
 0x38e   : > { %2535 = vrot.lane.b32.xlu0 %v2481_v42, %s5411_s8  ;;  %2520 = vrot.lane.b32.xlu1 %v2481_v42, %s5414_s10 }
 0x392   : > { %2526 = vrot.lane.b32.xlu1 %v2481_v42, %s5410_s16 }
 0x396   : > { %2532 = vrot.lane.b32.xlu1 %v2481_v42, %s5409_s15 }
 0x3ec   : > { %v2499_v22 = vpop.permute.xlu0 %2498  ;;  %v2496_v36 = vpop.permute.xlu1 %2495 }
 0x3ed   : > { %v2538_v55 = vcombine.low %v2480_v57, %v2499_v22 }
 0x3ef   : > { %v2545_v3 = vrot.slane %v2538_v55, %v9243_v7 }
 0x3f0   : > { %v2505_v59 = vpop.permute.xlu0 %2504  ;;  %v2502_v51 = vpop.permute.xlu1 %2501 }
 0x3f1   : > { %v2546_v0 = vcombine.low %v2496_v36, %v2502_v51 }
 0x3f3   : > { %v2553_v14 = vrot.slane %v2546_v0, %v9243_v7 }
 0x3f4   : > { %v2511_v52 = vpop.permute.xlu0 %2510  ;;  %v2508_v28 = vpop.permute.xlu1 %2507 }
 0x3f5   : > { %v2554_v16 = vcombine.low %v2505_v59, %v2511_v52  ;;  %v2570_v11 = vcombine.low %v2545_v3, %v2553_v14  ;;  %v2571_v48 = vcombine.high %v2545_v3, %v2553_v14 }
 0x3f7   : > { %v2561_v13 = vrot.slane %v2554_v16, %v9243_v7  ;;  %v2578_v29 = vrot.slane %v2570_v11, %v9244_v38  ;;  %v2585_v31 = vrot.slane %v2571_v48, %v9244_v38 }
 0x3f8   : > { %v2524_v2 = vpop.permute.xlu0 %2523  ;;  %v2514_v20 = vpop.permute.xlu1 %2513 }
 0x3f9   : > { %v2562_v12 = vcombine.low %v2508_v28, %v2514_v20 }
 0x3fb   : > { %v2569_v53 = vrot.slane %v2562_v12, %v9243_v7 }
 0x3fc   : > { %v2518_v44 = vpop.permute.xlu1 %2517  ;;  %v2530_v47 = vpop.permute.xlu0 %2529 }
 0x3fd   : > { %v2586_v23 = vcombine.low %v2561_v13, %v2569_v53  ;;  %v2587_v39 = vcombine.high %v2561_v13, %v2569_v53  ;;  %v2614_v30 = vcombine.low %v2518_v44, %v2524_v2 }
 0x3ff   : > { %v2594_v4 = vrot.slane %v2586_v23, %v9244_v38  ;;  %v2601_v49 = vrot.slane %v2587_v39, %v9244_v38  ;;  %v2621_v25 = vrot.slane %v2614_v30, %v9243_v7 }
 0x400   : > { %v2521_v8 = vpop.permute.xlu1 %2520  ;;  %v2536_v17 = vpop.permute.xlu0 %2535 }
 0x401   : > { %v2603_v50 = vcombine.high %v2578_v29, %v2594_v4  ;;  %v2602_v1 = vcombine.low %v2578_v29, %v2594_v4  ;;  %v2606_v37 = vcombine.low %v2481_v42, %v2521_v8  ;;  %v2605_v5 = vcombine.high %v2585_v31, %v2601_v49 }
 0x402   : > { %v2604_v33 = vcombine.low %v2585_v31, %v2601_v49  ;;  %v2630_v24 = vcombine.low %v2530_v47, %v2536_v17 }
 0x403   : > { %2686 = vrot.lane.b32.xlu1 %v2603_v50, %s5405_s29  ;;  %2682 = vrot.lane.b32.xlu0 %v2602_v1, %s5405_s29  ;;  %v2613_v6 = vrot.slane %v2606_v37, %v9243_v7 }
 0x404   : > { %v2527_v45 = vpop.permute.xlu1 %2526  ;;  %v2637_v43 = vrot.slane %v2630_v24, %v9243_v7 }
 0x405   : > { %v2638_v61 = vcombine.low %v2613_v6, %v2621_v25  ;;  %v2639_v32 = vcombine.high %v2613_v6, %v2621_v25 }
 0x407   : > { %2694 = vrot.lane.b32.xlu1 %v2605_v5, %s5405_s29  ;;  %2690 = vrot.lane.b32.xlu0 %v2604_v33, %s5405_s29  ;;  %v2646_v62 = vrot.slane %v2638_v61, %v9244_v38  ;;  %v2653_v15 = vrot.slane %v2639_v32, %v9244_v38 }
 0x408   : > { %v2533_v35 = vpop.permute.xlu1 %2532 }
 0x409   : > { %v2622_v27 = vcombine.low %v2527_v45, %v2533_v35 }
 0x40b   : > { %v2629_v54 = vrot.slane %v2622_v27, %v9243_v7 }
 0x40d   : > { %v2654_v40 = vcombine.low %v2629_v54, %v2637_v43  ;;  %v2655_v60 = vcombine.high %v2629_v54, %v2637_v43 }
 0x40f   : > { %v2662_v26 = vrot.slane %v2654_v40, %v9244_v38  ;;  %v2669_v34 = vrot.slane %v2655_v60, %v9244_v38 }
 0x411   : > { %v2671_v9 = vcombine.high %v2646_v62, %v2662_v26  ;;  %v2670_v41 = vcombine.low %v2646_v62, %v2662_v26  ;;  %v2673_v21 = vcombine.high %v2653_v15, %v2669_v34  ;;  %v2672_v58 = vcombine.low %v2653_v15, %v2669_v34 }
 0x413   : > { %2688 = vrot.lane.b32.xlu1 %v2671_v9, %s5405_s29  ;;  %2684 = vrot.lane.b32.xlu0 %v2670_v41, %s5405_s29 }
 0x417   : > { %2696 = vrot.lane.b32.xlu1 %v2673_v21, %s5405_s29  ;;  %2692 = vrot.lane.b32.xlu0 %v2672_v58, %s5405_s29 }
 0x475   : > { %v2683_v19 = vpop.permute.xlu0 %2682  ;;  %v2687_v63 = vpop.permute.xlu1 %2686 }
 0x476   : > { %2706 = vst.msk [vmem:[#allocation3 + $0x1] sm:$0xff] %vm297_vm2, %v2683_v19  ;;  %2708 = vst.msk [vmem:[#allocation3 + $0x19] sm:$0xff] %vm297_vm2, %v2687_v63 }
 0x479   : > { %v2691_v18 = vpop.permute.xlu0 %2690  ;;  %v2695_v46 = vpop.permute.xlu1 %2694 }
 0x47a   : > { %2710 = vst.msk [vmem:[#allocation3 + $0x31] sm:$0xff] %vm297_vm2, %v2691_v18  ;;  %2712 = vst.msk [vmem:[#allocation3 + $0x49] sm:$0xff] %vm297_vm2, %v2695_v46 }
 0x47d   : > { %v7308_v57 = vld [vmem:[#allocation3] sm:$0xff]  ;;  %v2716_v52 = vld [vmem:[#allocation3 + $0x18] sm:$0xff] }
 0x47e   : > { %v3398_v10 = vld [vmem:[#allocation3 + $0x19] sm:$0xff]  ;;  %2936 = vrot.lane.b32.xlu0 %v7308_v57, %s5406_s12  ;;  %v3396_v56 = vld [vmem:[#allocation3 + $0x1] sm:$0xff] }
 0x47f   : > { %3852 = vrot.lane.b32.xlu1 %v3398_v10, %s5407_s14 }
 0x481   : > { %v3402_v42 = vld [vmem:[#allocation3 + $0x49] sm:$0xff]  ;;  %v3400_v22 = vld [vmem:[#allocation3 + $0x31] sm:$0xff] }
 0x482   : > { %v7313_v36 = vld [vmem:[#allocation3 + $0x30] sm:$0xff]  ;;  %3848 = vrot.lane.b32.xlu0 %v3396_v56, %s5407_s14  ;;  %v3420_v59 = vcombine.low %v3398_v10, %v3402_v42  ;;  %v3421_v51 = vcombine.high %v3398_v10, %v3402_v42  ;;  %v3404_v0 = vcombine.low %v3396_v56, %v3400_v22  ;;  %v2720_v28 = vld [vmem:[#allocation3 + $0x48] sm:$0xff]  ;;  %v3405_v55 = vcombine.high %v3396_v56, %v3400_v22 }
 0x483   : > { %3860 = vrot.lane.b32.xlu1 %v3402_v42, %s5407_s14  ;;  %v2722_v14 = vcombine.low %v7308_v57, %v7313_v36  ;;  %v2723_v16 = vcombine.high %v7308_v57, %v7313_v36  ;;  %v2738_v2 = vcombine.low %v2716_v52, %v2720_v28  ;;  %v2739_v11 = vcombine.high %v2716_v52, %v2720_v28 }
 0x484   : > { %v7322_v20 = vrot.slane %v3420_v59, %v9243_v7  ;;  %v7325_v3 = vrot.slane %v3421_v51, %v9243_v7  ;;  %v7328_v12 = vrot.slane %v3404_v0, %v9243_v7  ;;  %v7331_v44 = vrot.slane %v3405_v55, %v9243_v7 }
 0x485   : > { %v2685_v13 = vpop.permute.xlu0 %2684  ;;  %v2689_v53 = vpop.permute.xlu1 %2688  ;;  %v7334_v23 = vrot.slane %v2722_v14, %v9243_v7  ;;  %v7337_v39 = vrot.slane %v2723_v16, %v9243_v7  ;;  %v7340_v47 = vrot.slane %v2738_v2, %v9243_v7  ;;  %v7347_v48 = vrot.slane %v2739_v11, %v9243_v7 }
 0x486   : > { %2707 = vst.msk [vmem:[#allocation3 + $0x9] sm:$0xff] %vm297_vm2, %v2685_v13  ;;  %2709 = vst.msk [vmem:[#allocation3 + $0x21] sm:$0xff] %vm297_vm2, %v2689_v53  ;;  %3856 = vrot.lane.b32.xlu0 %v3400_v22, %s5407_s14  ;;  %v3437_v29 = vcombine.high %v7328_v12, %v7322_v20  ;;  %v3436_v4 = vcombine.low %v7328_v12, %v7322_v20  ;;  %v3453_v49 = vcombine.high %v7331_v44, %v7325_v3 }
 0x487   : > { %3622 = vrot.lane.b32.xlu1 %v3398_v10, %s5406_s12  ;;  %v2755_v8 = vcombine.high %v7334_v23, %v7340_v47  ;;  %v2754_v50 = vcombine.low %v7334_v23, %v7340_v47  ;;  %v3452_v1 = vcombine.low %v7331_v44, %v7325_v3  ;;  %v2770_v31 = vcombine.low %v7337_v39, %v7347_v48 }
 0x488   : > { %v2771_v37 = vcombine.high %v7337_v39, %v7347_v48  ;;  %v7464_v11 = vrot.slane %v3437_v29, %v9244_v38  ;;  %v7477_v53 = vrot.slane %v3453_v49, %v9244_v38  ;;  %v9246_v49 = vmov 0.0  }
 0x489   : > { %v2693_v17 = vpop.permute.xlu0 %2692  ;;  %v2697_v45 = vpop.permute.xlu1 %2696  ;;  %v2769_v2 = vrot.slane %v2755_v8, %v9244_v38  ;;  %v2778_v13 = vrot.slane %v2770_v31, %v9244_v38  ;;  %v7483_v29 = vrot.slane %v2754_v50, %v9244_v38  ;;  %v7500_v23 = vrot.slane %v3452_v1, %v9244_v38 }
 0x48a   : > { %2711 = vst.msk [vmem:[#allocation3 + $0x39] sm:$0xff] %vm297_vm2, %v2693_v17  ;;  %2713 = vst.msk [vmem:[#allocation3 + $0x51] sm:$0xff] %vm297_vm2, %v2697_v45  ;;  %3618 = vrot.lane.b32.xlu0 %v3396_v56, %s5406_s12  ;;  %v2785_v31 = vrot.slane %v2771_v37, %v9244_v38 }
 0x48b   : > { %3630 = vrot.lane.b32.xlu1 %v3402_v42, %s5406_s12  ;;  %9245 = vst [vmem:[#allocation50_spill] sm:$0xff] %v7483_v29  ;;  %v2786_v45 = vcombine.high %v7483_v29, %v9246_v49  ;;  %v2787_v47 = vcombine.high %v2769_v2, %v9246_v49  ;;  %v2788_v3 = vcombine.high %v2778_v13, %v9246_v49 }
 0x48d   : > { %v4079_v30 = vld [vmem:[#allocation3 + $0xa] sm:$0xff]  ;;  %v4081_v5 = vld [vmem:[#allocation3 + $0x22] sm:$0xff]  ;;  %v4080_v61 = vld [vmem:[#allocation3 + $0x1a] sm:$0xff] }
 0x48e   : > { %3626 = vrot.lane.b32.xlu0 %v3400_v22, %s5406_s12  ;;  %v4078_v27 = vld [vmem:[#allocation3 + $0x2] sm:$0xff] }
 0x48f   : > { %2940 = vrot.lane.b32.xlu1 %v2716_v52, %s5406_s12  ;;  %v7410_v10 = vld [vmem:[#allocation3 + $0x8] sm:$0xff]  ;;  %v2717_v55 = vld [vmem:[#allocation3 + $0x20] sm:$0xff] }
 0x490   : > { %v3397_v51 = vld [vmem:[#allocation3 + $0x9] sm:$0xff] }
 0x491   : > { %v4083_v33 = vld [vmem:[#allocation3 + $0x3a] sm:$0xff]  ;;  %v4085_v24 = vld [vmem:[#allocation3 + $0x52] sm:$0xff]  ;;  %v4084_v54 = vld [vmem:[#allocation3 + $0x4a] sm:$0xff] }
 0x492   : > { %v4082_v6 = vld [vmem:[#allocation3 + $0x32] sm:$0xff]  ;;  %2944 = vrot.lane.b32.xlu0 %v7313_v36, %s5406_s12  ;;  %v4154_v35 = vcombine.low %v4079_v30, %v4083_v33  ;;  %v4155_v25 = vcombine.high %v4079_v30, %v4083_v33  ;;  %v4170_v43 = vcombine.low %v4081_v5, %v4085_v24  ;;  %v4171_v40 = vcombine.high %v4081_v5, %v4085_v24 }
 0x493   : > { %2948 = vrot.lane.b32.xlu1 %v2720_v28, %s5406_s12  ;;  %v4086_v60 = vcombine.low %v4078_v27, %v4082_v6  ;;  %v4087_v32 = vcombine.high %v4078_v27, %v4082_v6  ;;  %v4102_v62 = vcombine.low %v4080_v61, %v4084_v54  ;;  %v4103_v26 = vcombine.high %v4080_v61, %v4084_v54  ;;  %v3401_v0 = vld [vmem:[#allocation3 + $0x39] sm:$0xff]  ;;  %v2721_v16 = vld [vmem:[#allocation3 + $0x50] sm:$0xff] }
 0x494   : > { %v7378_v34 = vrot.slane %v4154_v35, %v9243_v7  ;;  %v7381_v9 = vrot.slane %v4170_v43, %v9243_v7  ;;  %v7384_v41 = vrot.slane %v4155_v25, %v9243_v7  ;;  %v7387_v15 = vrot.slane %v4171_v40, %v9243_v7  ;;  %v2719_v14 = vld [vmem:[#allocation3 + $0x38] sm:$0xff] }
 0x495   : > { %v7393_v21 = vrot.slane %v4086_v60, %v9243_v7  ;;  %v7396_v58 = vrot.slane %v4087_v32, %v9243_v7  ;;  %v7401_v63 = vrot.slane %v4102_v62, %v9243_v7  ;;  %v7404_v18 = vrot.slane %v4103_v26, %v9243_v7 }
 0x496   : > { %3166 = vrot.lane.b32.xlu0 %v7308_v57, %s5407_s14  ;;  %v4187_v19 = vcombine.high %v7378_v34, %v7381_v9  ;;  %v4202_v46 = vcombine.low %v7384_v41, %v7387_v15  ;;  %v4203_v57 = vcombine.high %v7384_v41, %v7387_v15  ;;  %v4186_v59 = vcombine.low %v7378_v34, %v7381_v9 }
 0x497   : > { %3170 = vrot.lane.b32.xlu1 %v2716_v52, %s5407_s14  ;;  %v4135_v56 = vcombine.high %v7396_v58, %v7404_v18  ;;  %v4119_v42 = vcombine.high %v7393_v21, %v7401_v63  ;;  %v4134_v22 = vcombine.low %v7396_v58, %v7404_v18  ;;  %v3399_v52 = vld [vmem:[#allocation3 + $0x21] sm:$0xff]  ;;  %v3472_v8 = vcombine.low %v3397_v51, %v3401_v0 }
 0x498   : > { %v2790_v48 = vcombine.low %v7410_v10, %v2719_v14  ;;  %v2806_v37 = vcombine.low %v2717_v55, %v2721_v16  ;;  %v3473_v44 = vcombine.high %v3397_v51, %v3401_v0  ;;  %v2789_v43 = vcombine.high %v2785_v31, %v9246_v49 }
 0x499   : > { %v7504_v50 = vrot.slane %v3472_v8, %v9243_v7  ;;  %v7576_v8 = vrot.slane %v4203_v57, %v9244_v38  ;;  %v7596_v41 = vrot.slane %v4119_v42, %v9244_v38 }
 0x49a   : > { %3174 = vrot.lane.b32.xlu0 %v7313_v36, %s5407_s14  ;;  %v4118_v36 = vcombine.low %v7393_v21, %v7401_v63  ;;  %v3487_v25 = vrot.slane %v3473_v44, %v9243_v7 }
 0x49b   : > { %3178 = vrot.lane.b32.xlu1 %v2720_v28, %s5407_s14  ;;  %v3403_v28 = vld [vmem:[#allocation3 + $0x51] sm:$0xff] }
 0x49c   : > { %v3488_v17 = vcombine.low %v3399_v52, %v3403_v28  ;;  %v3489_v1 = vcombine.high %v3399_v52, %v3403_v28 }
 0x49e   : > { %4302 = vrot.lane.b32.xlu0 %v4079_v30, %s5406_s12  ;;  %v7507_v39 = vrot.slane %v3488_v17, %v9243_v7 }
 0x49f   : > { %2938 = vrot.lane.b32.xlu1 %v7410_v10, %s5406_s12 }
 0x4a0   : > { %v3505_v35 = vcombine.high %v7504_v50, %v7507_v39 }
 0x4a2   : > { %4310 = vrot.lane.b32.xlu0 %v4083_v33, %s5406_s12  ;;  %v7538_v32 = vrot.slane %v3505_v35, %v9244_v38 }
 0x4a3   : > { %4306 = vrot.lane.b32.xlu1 %v4081_v5, %s5406_s12 }
 0x4a6   : > { %4300 = vrot.lane.b32.xlu0 %v4078_v27, %s5406_s12 }
 0x4a7   : > { %4314 = vrot.lane.b32.xlu1 %v4085_v24, %s5406_s12 }
 0x4aa   : > { %4308 = vrot.lane.b32.xlu0 %v4082_v6, %s5406_s12 }
 0x4ab   : > { %4304 = vrot.lane.b32.xlu1 %v4080_v61, %s5406_s12 }
 0x4ae   : > { %4532 = vrot.lane.b32.xlu0 %v4079_v30, %s5407_s14  ;;  %v2791_v30 = vcombine.high %v7410_v10, %v2719_v14 }
 0x4af   : > { %4312 = vrot.lane.b32.xlu1 %v4084_v54, %s5406_s12 }
 0x4b2   : > { %4540 = vrot.lane.b32.xlu0 %v4083_v33, %s5407_s14  ;;  %v2798_v33 = vrot.slane %v2790_v48, %v9243_v7  ;;  %v7602_v48 = vrot.slane %v3436_v4, %v9244_v38 }
 0x4b3   : > { %4536 = vrot.lane.b32.xlu1 %v4081_v5, %s5407_s14  ;;  %v2807_v5 = vcombine.high %v2717_v55, %v2721_v16 }
 0x4b4   : > { %9247 = vst [vmem:[#allocation47_spill] sm:$0xff] %v7602_v48  ;;  %v3468_v20 = vcombine.high %v7602_v48, %v9246_v49 }
 0x4b6   : > { %3850 = vrot.lane.b32.xlu0 %v3397_v51, %s5407_s14 }
 0x4b7   : > { %4544 = vrot.lane.b32.xlu1 %v4085_v24, %s5407_s14  ;;  %v2814_v24 = vrot.slane %v2806_v37, %v9243_v7 }
 0x4b9   : > { %v2823_v62 = vcombine.high %v2798_v33, %v2814_v24  ;;  %v2822_v57 = vcombine.low %v2798_v33, %v2814_v24  ;;  %v7639_v24 = vrot.slane %v4134_v22, %v9244_v38 }
 0x4ba   : > { %3858 = vrot.lane.b32.xlu0 %v3401_v0, %s5407_s14 }
 0x4bb   : > { %3854 = vrot.lane.b32.xlu1 %v3399_v52, %s5407_s14 }
 0x4be   : > { %4530 = vrot.lane.b32.xlu0 %v4078_v27, %s5407_s14  ;;  %v3503_v27 = vrot.slane %v3489_v1, %v9243_v7 }
 0x4bf   : > { %3862 = vrot.lane.b32.xlu1 %v3403_v28, %s5407_s14 }
 0x4c0   : > { %v3521_v15 = vcombine.high %v3487_v25, %v3503_v27 }
 0x4c2   : > { %4538 = vrot.lane.b32.xlu0 %v4082_v6, %s5407_s14  ;;  %v7521_v6 = vrot.slane %v4187_v19, %v9244_v38  ;;  %v7613_v42 = vrot.slane %v3521_v15, %v9244_v38 }
 0x4c3   : > { %4534 = vrot.lane.b32.xlu1 %v4080_v61, %s5407_s14  ;;  %v2805_v61 = vrot.slane %v2791_v30, %v9243_v7 }
 0x4c6   : > { %3620 = vrot.lane.b32.xlu0 %v3397_v51, %s5406_s12  ;;  %v2837_v51 = vrot.slane %v2823_v62, %v9244_v38 }
 0x4c7   : > { %4542 = vrot.lane.b32.xlu1 %v4084_v54, %s5407_s14  ;;  %v2821_v54 = vrot.slane %v2807_v5, %v9243_v7 }
 0x4ca   : > { %3628 = vrot.lane.b32.xlu0 %v3401_v0, %s5406_s12  ;;  %v3520_v0 = vcombine.low %v3487_v25, %v3503_v27 }
 0x4cb   : > { %3624 = vrot.lane.b32.xlu1 %v3399_v52, %s5406_s12  ;;  %v2838_v52 = vcombine.low %v2805_v61, %v2821_v54 }
 0x4ce   : > { %2942 = vrot.lane.b32.xlu0 %v2717_v55, %s5406_s12 }
 0x4cf   : > { %3632 = vrot.lane.b32.xlu1 %v3403_v28, %s5406_s12 }
 0x4d2   : > { %2950 = vrot.lane.b32.xlu0 %v2721_v16, %s5406_s12 }
 0x4d3   : > { %2946 = vrot.lane.b32.xlu1 %v2719_v14, %s5406_s12 }
 0x4d6   : > { %3172 = vrot.lane.b32.xlu0 %v2717_v55, %s5407_s14 }
 0x4d7   : > { %3168 = vrot.lane.b32.xlu1 %v7410_v10, %s5407_s14  ;;  %v7551_v10 = vrot.slane %v4202_v46, %v9244_v38  ;;  %v2839_v46 = vcombine.high %v2805_v61, %v2821_v54  ;;  %v2855_v61 = vcombine.high %v2837_v51, %v9246_v49 }
 0x4d9   : > { %v2853_v17 = vrot.slane %v2839_v46, %v9244_v38 }
 0x4da   : > { %3180 = vrot.lane.b32.xlu0 %v2721_v16, %s5407_s14  ;;  %v2846_v16 = vrot.slane %v2838_v52, %v9244_v38 }
 0x4db   : > { %3176 = vrot.lane.b32.xlu1 %v2719_v14, %s5407_s14  ;;  %v7562_v14 = vrot.slane %v3520_v0, %v9244_v38 }
 0x4dc   : > { %v2856_v15 = vcombine.high %v2846_v16, %v9246_v49 }
 0x4de   : > { %3545 = vrot.lane.b32.xlu0 %v7464_v11, %s5409_s15 }
 0x4df   : > { %2863 = vrot.lane.b32.xlu1 %v2769_v2, %s5409_s15 }
 0x4e2   : > { %3561 = vrot.lane.b32.xlu0 %v7477_v53, %s5414_s10 }
 0x4e3   : > { %2871 = vrot.lane.b32.xlu1 %v2778_v13, %s5410_s16 }
 0x4e6   : > { %2859 = vrot.lane.b32.xlu0 %v2786_v45, %s5411_s8 }
 0x4e7   : > { %2879 = vrot.lane.b32.xlu1 %v2785_v31, %s5414_s10 }
 0x4ea   : > { %2867 = vrot.lane.b32.xlu0 %v2787_v47, %s5412_s7  ;;  %v7590_v47 = vrot.slane %v4135_v56, %v9244_v38 }
 0x4eb   : > { %3553 = vrot.lane.b32.xlu1 %v7500_v23, %s5410_s16 }
 0x4ee   : > { %2875 = vrot.lane.b32.xlu0 %v2788_v3, %s5413_s9  ;;  %v7616_v3 = vrot.slane %v2822_v57, %v9244_v38 }
 0x4ef   : > { %4255 = vrot.lane.b32.xlu1 %v7521_v6, %s5409_s15 }
 0x4f0   : > { %v7533_v40 = vpop.permute.xlu0 %2936  ;;  %9248 = vst [vmem:[#allocation52_spill] sm:$0xff] %v7616_v3  ;;  %v2854_v33 = vcombine.high %v7616_v3, %v9246_v49 }
 0x4f1   : > { %v7535_v60 = vpop.permute.xlu1 %3852 }
 0x4f2   : > { %2883 = vrot.lane.b32.xlu0 %v2789_v43, %s5415_s11  ;;  %v3469_v43 = vcombine.high %v7464_v11, %v9246_v49 }
 0x4f3   : > { %3573 = vrot.lane.b32.xlu1 %v7538_v32, %s5409_s15 }
 0x4f4   : > { %v7543_v26 = vpop.permute.xlu0 %3848 }
 0x4f5   : > { %v7545_v19 = vpop.permute.xlu1 %3860 }
 0x4f6   : > { %2891 = vrot.lane.b32.xlu0 %v2837_v51, %s5409_s15 }
 0x4f7   : > { %4263 = vrot.lane.b32.xlu1 %v7551_v10, %s5410_s16 }
 0x4f8   : > { %v7557_v28 = vpop.permute.xlu0 %3856 }
 0x4f9   : > { %v7559_v55 = vpop.permute.xlu1 %3622 }
 0x4fa   : > { %2899 = vrot.lane.b32.xlu0 %v2846_v16, %s5410_s16  ;;  %v7685_v16 = vrot.slane %v4186_v59, %v9244_v38 }
 0x4fb   : > { %3581 = vrot.lane.b32.xlu1 %v7562_v14, %s5410_s16 }
 0x4fc   : > { %v7568_v2 = vpop.permute.xlu0 %3618  ;;  %9251 = vst [vmem:[#allocation53_spill] sm:$0xff] %v7685_v16  ;;  %v4218_v59 = vcombine.high %v7685_v16, %v9246_v49 }
 0x4fd   : > { %v7570_v13 = vpop.permute.xlu1 %3630 }
 0x4fe   : > { %2907 = vrot.lane.b32.xlu0 %v2853_v17, %s5414_s10 }
 0x4ff   : > { %4271 = vrot.lane.b32.xlu1 %v7576_v8, %s5414_s10 }
 0x500   : > { %v7582_v31 = vpop.permute.xlu0 %3626 }
 0x501   : > { %v7584_v45 = vpop.permute.xlu1 %2940 }
 0x502   : > { %4227 = vrot.lane.b32.xlu0 %v7596_v41, %s5409_s15 }
 0x503   : > { %4243 = vrot.lane.b32.xlu1 %v7590_v47, %s5414_s10 }
 0x504   : > { %v7608_v56 = vpop.permute.xlu0 %2944 }
 0x505   : > { %v7610_v37 = vpop.permute.xlu1 %2948  ;;  %v2960_v12 = vcombine.low %v7533_v40, %v7608_v56 }
 0x506   : > { %v2976_v4 = vcombine.low %v7584_v45, %v7610_v37  ;;  %3541 = vrot.lane.b32.xlu0 %v3468_v20, %s5411_s8 }
 0x507   : > { %3589 = vrot.lane.b32.xlu1 %v7613_v42, %s5414_s10  ;;  %v7628_v44 = vrot.slane %v2960_v12, %v9243_v7  ;;  %v3470_v12 = vcombine.high %v7500_v23, %v9246_v49  ;;  %v7693_v23 = vrot.slane %v4118_v36, %v9244_v38 }
 0x508   : > { %v7631_v1 = vrot.slane %v2976_v4, %v9243_v7  ;;  %v3167_v30 = vpop.permute.xlu0 %3166 }
 0x509   : > { %v3171_v5 = vpop.permute.xlu1 %3170  ;;  %9252 = vst [vmem:[#allocation51_spill] sm:$0xff] %v7693_v23  ;;  %v4150_v63 = vcombine.high %v7693_v23, %v9246_v49 }
 0x50a   : > { %4235 = vrot.lane.b32.xlu0 %v7639_v24, %s5410_s16 }
 0x50b   : > { %2887 = vrot.lane.b32.xlu1 %v2854_v33, %s5411_s8  ;;  %v3471_v33 = vcombine.high %v7477_v53, %v9246_v49 }
 0x50c   : > { %v3175_v25 = vpop.permute.xlu0 %3174 }
 0x50d   : > { %v3179_v27 = vpop.permute.xlu1 %3178  ;;  %v3190_v54 = vcombine.low %v3167_v30, %v3175_v25  ;;  %v3191_v62 = vcombine.high %v3167_v30, %v3175_v25  ;;  %v3504_v25 = vcombine.low %v7504_v50, %v7507_v39 }
 0x50e   : > { %v3206_v58 = vcombine.low %v3171_v5, %v3179_v27  ;;  %v3207_v18 = vcombine.high %v3171_v5, %v3179_v27  ;;  %3549 = vrot.lane.b32.xlu0 %v3469_v43, %s5412_s7  ;;  %v2857_v5 = vcombine.high %v2853_v17, %v9246_v49  ;;  %v4219_v43 = vcombine.high %v7521_v6, %v9246_v49 }
 0x50f   : > { %2895 = vrot.lane.b32.xlu1 %v2855_v61, %s5412_s7  ;;  %v7651_v22 = vrot.slane %v3190_v54, %v9243_v7  ;;  %v7654_v0 = vrot.slane %v3191_v62, %v9243_v7  ;;  %v7712_v36 = vrot.slane %v3504_v25, %v9244_v38  ;;  %v4151_v6 = vcombine.high %v7596_v41, %v9246_v49 }
 0x510   : > { %v7657_v52 = vrot.slane %v3206_v58, %v9243_v7  ;;  %v7660_v46 = vrot.slane %v3207_v18, %v9243_v7  ;;  %v7663_v11 = vpop.permute.xlu0 %4302  ;;  %v3537_v18 = vcombine.high %v7538_v32, %v9246_v49  ;;  %v4152_v32 = vcombine.high %v7639_v24, %v9246_v49 }
 0x511   : > { %9249 = vst [vmem:[#allocation48_spill] sm:$0xff] %v7654_v0  ;;  %v7665_v51 = vpop.permute.xlu1 %2938  ;;  %9253 = vst [vmem:[#allocation25_spill] sm:$0xff] %v7712_v36  ;;  %v3536_v54 = vcombine.high %v7712_v36, %v9246_v49  ;;  %v3888_v41 = vcombine.low %v7535_v60, %v7545_v19  ;;  %v3642_v24 = vcombine.low %v7568_v2, %v7582_v31 }
 0x512   : > { %9250 = vst [vmem:[#allocation46_spill] sm:$0xff] %v7660_v46  ;;  %3557 = vrot.lane.b32.xlu0 %v3470_v12, %s5413_s9 }
 0x513   : > { %2903 = vrot.lane.b32.xlu1 %v2856_v15, %s5413_s9  ;;  %v3872_v15 = vcombine.low %v7543_v26, %v7557_v28 }
 0x514   : > { %v7676_v4 = vpop.permute.xlu0 %4310 }
 0x515   : > { %v7678_v30 = vpop.permute.xlu1 %4306  ;;  %v4392_v17 = vcombine.low %v7663_v11, %v7676_v4 }
 0x516   : > { %3565 = vrot.lane.b32.xlu0 %v3471_v33, %s5415_s11  ;;  %v4220_v33 = vcombine.high %v7551_v10, %v9246_v49  ;;  %v4153_v10 = vcombine.high %v7590_v47, %v9246_v49  ;;  %v3658_v47 = vcombine.low %v7559_v55, %v7570_v13 }
 0x517   : > { %2911 = vrot.lane.b32.xlu1 %v2857_v5, %s5415_s11  ;;  %v7716_v53 = vrot.slane %v4392_v17, %v9243_v7  ;;  %v7761_v17 = vrot.slane %v3872_v15, %v9243_v7 }
 0x518   : > { %v7701_v34 = vpop.permute.xlu0 %4300 }
 0x519   : > { %v7703_v9 = vpop.permute.xlu1 %4314 }
 0x51a   : > { %v4408_v21 = vcombine.low %v7678_v30, %v7703_v9  ;;  %4223 = vrot.lane.b32.xlu0 %v4150_v63, %s5411_s8 }
 0x51b   : > { %4251 = vrot.lane.b32.xlu1 %v4218_v59, %s5411_s8 }
 0x51c   : > { %v7719_v50 = vrot.slane %v4408_v21, %v9243_v7  ;;  %v7722_v39 = vpop.permute.xlu0 %4308 }
 0x51d   : > { %v7724_v27 = vpop.permute.xlu1 %4304 }
 0x51e   : > { %9254 = vst [vmem:[#allocation26_spill] sm:$0xff] %v7719_v50  ;;  %3569 = vrot.lane.b32.xlu0 %v3536_v54, %s5411_s8  ;;  %v7776_v54 = vrot.slane %v3888_v41, %v9243_v7  ;;  %v3539_v41 = vcombine.high %v7613_v42, %v9246_v49  ;;  %v7816_v42 = vrot.slane %v3658_v47, %v9243_v7 }
 0x51f   : > { %4259 = vrot.lane.b32.xlu1 %v4219_v43, %s5412_s7  ;;  %v3538_v43 = vcombine.high %v7562_v14, %v9246_v49 }
 0x520   : > { %v7734_v62 = vpop.permute.xlu0 %4532  ;;  %v3905_v14 = vcombine.high %v7761_v17, %v7776_v54 }
 0x521   : > { %v7736_v58 = vpop.permute.xlu1 %4312 }
 0x522   : > { %4231 = vrot.lane.b32.xlu0 %v4151_v6, %s5412_s7 }
 0x523   : > { %3577 = vrot.lane.b32.xlu1 %v3537_v18, %s5412_s7  ;;  %v3873_v18 = vcombine.high %v7543_v26, %v7557_v28  ;;  %v2993_v26 = vcombine.high %v7628_v44, %v7631_v1 }
 0x524   : > { %v7746_v12 = vpop.permute.xlu0 %4540 }
 0x525   : > { %v7748_v5 = vpop.permute.xlu1 %4536  ;;  %v4622_v25 = vcombine.low %v7734_v62, %v7746_v12 }
 0x526   : > { %4239 = vrot.lane.b32.xlu0 %v4152_v32, %s5413_s9 }
 0x527   : > { %4267 = vrot.lane.b32.xlu1 %v4220_v33, %s5413_s9  ;;  %v7784_v6 = vrot.slane %v4622_v25, %v9243_v7  ;;  %v3643_v33 = vcombine.high %v7568_v2, %v7582_v31  ;;  %v7803_v25 = vrot.slane %v3642_v24, %v9243_v7  ;;  %v3889_v2 = vcombine.high %v7535_v60, %v7545_v19 }
 0x528   : > { %v7763_v59 = vpop.permute.xlu0 %3850  ;;  %v3659_v31 = vcombine.high %v7559_v55, %v7570_v13  ;;  %v3223_v60 = vcombine.high %v7651_v22, %v7657_v52  ;;  %v7831_v13 = vrot.slane %v3905_v14, %v9244_v38 }
 0x529   : > { %v7765_v21 = vpop.permute.xlu1 %4544  ;;  %v3675_v47 = vcombine.high %v7803_v25, %v7816_v42  ;;  %v3903_v20 = vrot.slane %v3889_v2, %v9243_v7 }
 0x52a   : > { %v4638_v63 = vcombine.low %v7748_v5, %v7765_v21  ;;  %3585 = vrot.lane.b32.xlu0 %v3538_v43, %s5413_s9  ;;  %v3887_v43 = vrot.slane %v3873_v18, %v9243_v7  ;;  %v7834_v18 = vrot.slane %v2993_v26, %v9244_v38  ;;  %v7846_v14 = vrot.slane %v3659_v31, %v9243_v7 }
 0x52b   : > { %4247 = vrot.lane.b32.xlu1 %v4153_v10, %s5415_s11  ;;  %v7865_v2 = vrot.slane %v3223_v60, %v9244_v38  ;;  %v7876_v10 = vrot.slane %v3675_v47, %v9244_v38 }
 0x52c   : > { %v7787_v15 = vrot.slane %v4638_v63, %v9243_v7  ;;  %v7796_v28 = vpop.permute.xlu0 %3858  ;;  %v4221_v63 = vcombine.high %v7576_v8, %v9246_v49  ;;  %v7822_v8 = vrot.slane %v3643_v33, %v9243_v7  ;;  %v2961_v33 = vcombine.high %v7533_v40, %v7608_v56 }
 0x52d   : > { %v7798_v32 = vpop.permute.xlu1 %3854  ;;  %v3940_v24 = vcombine.low %v7763_v59, %v7796_v28  ;;  %v3920_v40 = vcombine.low %v3887_v43, %v3903_v20  ;;  %v3921_v60 = vcombine.high %v3887_v43, %v3903_v20  ;;  %v4409_v20 = vcombine.high %v7678_v30, %v7703_v9 }
 0x52e   : > { %9255 = vst [vmem:[#allocation55_spill] sm:$0xff] %v7787_v15  ;;  %4275 = vrot.lane.b32.xlu0 %v4221_v63, %s5415_s11  ;;  %v7868_v31 = vrot.slane %v2961_v33, %v9243_v7  ;;  %v4655_v3 = vcombine.high %v7784_v6, %v7787_v15  ;;  %v4393_v30 = vcombine.high %v7663_v11, %v7676_v4 }
 0x52f   : > { %3593 = vrot.lane.b32.xlu1 %v3539_v41, %s5415_s11  ;;  %v2977_v41 = vcombine.high %v7584_v45, %v7610_v37  ;;  %v7851_v26 = vrot.slane %v3940_v24, %v9243_v7  ;;  %v3690_v45 = vcombine.low %v7822_v8, %v7846_v14  ;;  %v7896_v29 = vrot.slane %v3920_v40, %v9244_v38 }
 0x530   : > { %v7826_v19 = vpop.permute.xlu0 %4530  ;;  %v7917_v36 = vrot.slane %v3921_v60, %v9244_v38  ;;  %v7931_v23 = vrot.slane %v4409_v20, %v9243_v7  ;;  %v4639_v11 = vcombine.high %v7748_v5, %v7765_v21  ;;  %v7946_v16 = vrot.slane %v4655_v3, %v9244_v38 }
 0x531   : > { %v7828_v55 = vpop.permute.xlu1 %3862  ;;  %9256 = vst [vmem:[#allocation56_spill] sm:$0xff] %v7851_v26  ;;  %v7871_v24 = vrot.slane %v2977_v41, %v9243_v7  ;;  %v7889_v35 = vrot.slane %v3690_v45, %v9244_v38  ;;  %v3691_v20 = vcombine.high %v7822_v8, %v7846_v14  ;;  %v4623_v21 = vcombine.high %v7734_v62, %v7746_v12 }
 0x532   : > { %v3956_v63 = vcombine.low %v7798_v32, %v7828_v55  ;;  %4013 = vrot.lane.b32.xlu0 %v7831_v13, %s5409_s15  ;;  %9258 = vst [vmem:[#allocation19_spill] sm:$0xff] %v7917_v36  ;;  %9260 = vst [vmem:[#allocation39_spill] sm:$0xff] %v7946_v16 }
 0x533   : > { %3101 = vrot.lane.b32.xlu1 %v7834_v18, %s5409_s15  ;;  %v3008_v47 = vcombine.low %v7868_v31, %v7871_v24 }
 0x534   : > { %v7854_v61 = vrot.slane %v3956_v63, %v9243_v7  ;;  %v7860_v56 = vpop.permute.xlu0 %4538 }
 0x535   : > { %v7862_v37 = vpop.permute.xlu1 %4534  ;;  %v4554_v57 = vcombine.low %v7826_v19, %v7860_v56 }
 0x536   : > { %9257 = vst [vmem:[#allocation54_spill] sm:$0xff] %v7854_v61  ;;  %3783 = vrot.lane.b32.xlu0 %v7876_v10, %s5409_s15  ;;  %v3973_v4 = vcombine.high %v7851_v26, %v7854_v61  ;;  %v7989_v26 = vrot.slane %v3691_v20, %v9244_v38 }
 0x537   : > { %3331 = vrot.lane.b32.xlu1 %v7865_v2, %s5409_s15  ;;  %v7903_v43 = vrot.slane %v4554_v57, %v9243_v7  ;;  %v3238_v57 = vcombine.low %v7654_v0, %v7660_v46  ;;  %v7951_v46 = vrot.slane %v4393_v30, %v9243_v7 }
 0x538   : > { %v7884_v33 = vpop.permute.xlu0 %3620  ;;  %v7980_v12 = vrot.slane %v3973_v4, %v9244_v38 }
 0x539   : > { %v7886_v41 = vpop.permute.xlu1 %4542  ;;  %v7956_v5 = vrot.slane %v3238_v57, %v9244_v38  ;;  %v4440_v3 = vcombine.low %v7951_v46, %v7931_v23  ;;  %v7973_v57 = vrot.slane %v4639_v11, %v9243_v7  ;;  %v7992_v11 = vrot.slane %v4623_v21, %v9243_v7 }
 0x53a   : > { %v4570_v63 = vcombine.low %v7862_v37, %v7886_v41  ;;  %4021 = vrot.lane.b32.xlu0 %v7896_v29, %s5410_s16  ;;  %9264 = vst [vmem:[#allocation32_spill] sm:$0xff] %v7980_v12  ;;  %v3957_v21 = vcombine.high %v7798_v32, %v7828_v55 }
 0x53b   : > { %3791 = vrot.lane.b32.xlu1 %v7889_v35, %s5410_s16  ;;  %9261 = vst [vmem:[#allocation40_spill] sm:$0xff] %v7956_v5  ;;  %v4670_v20 = vcombine.low %v7992_v11, %v7973_v57 }
 0x53c   : > { %v7906_v45 = vrot.slane %v4570_v63, %v9243_v7  ;;  %v7912_v40 = vpop.permute.xlu0 %3628  ;;  %v7926_v63 = vrot.slane %v3008_v47, %v9244_v38 }
 0x53d   : > { %v7914_v48 = vpop.permute.xlu1 %3624  ;;  %v3710_v60 = vcombine.low %v7884_v33, %v7912_v40  ;;  %v8052_v32 = vrot.slane %v4670_v20, %v9244_v38 }
 0x53e   : > { %9259 = vst [vmem:[#allocation20_spill] sm:$0xff] %v7926_v63  ;;  %3109 = vrot.lane.b32.xlu0 %v7926_v63, %s5410_s16 }
 0x53f   : > { %4029 = vrot.lane.b32.xlu1 %v7917_v36, %s5414_s10  ;;  %v7965_v8 = vrot.slane %v3710_v60, %v9243_v7  ;;  %v3009_v60 = vcombine.high %v7868_v31, %v7871_v24  ;;  %v4324_v31 = vcombine.low %v7701_v34, %v7722_v39  ;;  %v8005_v24 = vrot.slane %v4440_v3, %v9244_v38 }
 0x540   : > { %v7941_v47 = vpop.permute.xlu0 %2942  ;;  %v4425_v3 = vcombine.high %v7716_v53, %v7719_v50  ;;  %9267 = vst [vmem:[#allocation60_spill] sm:$0xff] %v8052_v32 }
 0x541   : > { %v7943_v9 = vpop.permute.xlu1 %3632  ;;  %9262 = vst [vmem:[#allocation27_spill] sm:$0xff] %v7965_v8  ;;  %9265 = vst [vmem:[#allocation57_spill] sm:$0xff] %v8005_v24  ;;  %v8027_v15 = vrot.slane %v3009_v60, %v9244_v38  ;;  %v8036_v55 = vrot.slane %v4324_v31, %v9243_v7  ;;  %v8043_v60 = vrot.slane %v3957_v21, %v9243_v7 }
 0x542   : > { %v3726_v0 = vcombine.low %v7914_v48, %v7943_v9  ;;  %3339 = vrot.lane.b32.xlu0 %v7956_v5, %s5410_s16 }
 0x543   : > { %4723 = vrot.lane.b32.xlu1 %v7946_v16, %s5409_s15  ;;  %9266 = vst [vmem:[#allocation30_spill] sm:$0xff] %v8027_v15 }
 0x544   : > { %v7968_v14 = vrot.slane %v3726_v0, %v9243_v7  ;;  %v7975_v30 = vpop.permute.xlu0 %2950  ;;  %v4340_v0 = vcombine.low %v7724_v27, %v7736_v58 }
 0x545   : > { %v7977_v62 = vpop.permute.xlu1 %2946  ;;  %v3044_v16 = vcombine.low %v7941_v47, %v7975_v30 }
 0x546   : > { %9263 = vst [vmem:[#allocation28_spill] sm:$0xff] %v7968_v14  ;;  %v3028_v4 = vcombine.low %v7665_v51, %v7977_v62  ;;  %3799 = vrot.lane.b32.xlu0 %v7989_v26, %s5414_s10  ;;  %v8024_v36 = vrot.slane %v4340_v0, %v9243_v7  ;;  %v3904_v0 = vcombine.low %v7761_v17, %v7776_v54 }
 0x547   : > { %4041 = vrot.lane.b32.xlu1 %v7980_v12, %s5409_s15  ;;  %v8012_v61 = vrot.slane %v3044_v16, %v9243_v7  ;;  %v3941_v16 = vcombine.high %v7763_v59, %v7796_v28  ;;  %v3743_v59 = vcombine.high %v7965_v8, %v7968_v14  ;;  %v8061_v54 = vrot.slane %v4425_v3, %v9244_v38 }
 0x548   : > { %v8015_v12 = vrot.slane %v3028_v4, %v9243_v7  ;;  %v8017_v5 = vpop.permute.xlu0 %3172  ;;  %v4357_v31 = vcombine.high %v8036_v55, %v8024_v36  ;;  %v8093_v50 = vrot.slane %v3904_v0, %v9244_v38 }
 0x549   : > { %v8019_v63 = vpop.permute.xlu1 %3168  ;;  %v8064_v21 = vrot.slane %v3941_v16, %v9243_v7  ;;  %v8083_v16 = vrot.slane %v3743_v59, %v9244_v38 }
 0x54a   : > { %3117 = vrot.lane.b32.xlu0 %v8027_v15, %s5414_s10 }
 0x54b   : > { %4501 = vrot.lane.b32.xlu1 %v8005_v24, %s5410_s16  ;;  %v3988_v14 = vcombine.low %v8064_v21, %v8043_v60 }
 0x54c   : > { %v8047_v28 = vpop.permute.xlu0 %3180 }
 0x54d   : > { %v8049_v4 = vpop.permute.xlu1 %3176  ;;  %v3274_v15 = vcombine.low %v8017_v5, %v8047_v28 }
 0x54e   : > { %v3258_v17 = vcombine.low %v8019_v63, %v8049_v4  ;;  %4493 = vrot.lane.b32.xlu0 %v8061_v54, %s5409_s15 }
 0x54f   : > { %4731 = vrot.lane.b32.xlu1 %v8052_v32, %s5410_s16  ;;  %v8069_v20 = vrot.slane %v3274_v15, %v9243_v7  ;;  %v4341_v15 = vcombine.high %v7724_v27, %v7736_v58  ;;  %v8090_v32 = vrot.slane %v4357_v31, %v9244_v38  ;;  %v4441_v27 = vcombine.high %v7951_v46, %v7931_v23 }
 0x550   : > { %v8072_v24 = vrot.slane %v3258_v17, %v9243_v7  ;;  %v8078_v3 = vpop.permute.xlu0 %3545  ;;  %v8108_v31 = vrot.slane %v3988_v14, %v9244_v38  ;;  %v4587_v17 = vcombine.high %v7903_v43, %v7906_v45  ;;  %v4671_v23 = vcombine.high %v7992_v11, %v7973_v57 }
 0x551   : > { %9268 = vst [vmem:[#allocation34_spill] sm:$0xff] %v8078_v3  ;;  %v8080_v8 = vpop.permute.xlu1 %2863  ;;  %v8111_v0 = vrot.slane %v4341_v15, %v9243_v7  ;;  %v8128_v15 = vrot.slane %v4441_v27, %v9244_v38  ;;  %v3061_v57 = vcombine.high %v8015_v12, %v8012_v61 }
 0x552   : > { %9269 = vst [vmem:[#allocation38_spill] sm:$0xff] %v8080_v8  ;;  %v4325_v8 = vcombine.high %v7701_v34, %v7722_v39  ;;  %4465 = vrot.lane.b32.xlu0 %v8090_v32, %s5409_s15  ;;  %v3936_v34 = vcombine.high %v8093_v50, %v9246_v49  ;;  %v8134_v3 = vrot.slane %v4587_v17, %v9244_v38 }
 0x553   : > { %3811 = vrot.lane.b32.xlu1 %v8083_v16, %s5409_s15  ;;  %v4571_v17 = vcombine.high %v7862_v37, %v7886_v41  ;;  %v3291_v41 = vcombine.high %v8072_v24, %v8069_v20 }
 0x554   : > { %v8103_v58 = vpop.permute.xlu0 %3561  ;;  %v4339_v46 = vrot.slane %v4325_v8, %v9243_v7  ;;  %v3727_v8 = vcombine.high %v7914_v48, %v7943_v9  ;;  %v3711_v48 = vcombine.high %v7884_v33, %v7912_v40  ;;  %v4555_v9 = vcombine.high %v7826_v19, %v7860_v56 }
 0x555   : > { %9270 = vst [vmem:[#allocation45_spill] sm:$0xff] %v8103_v58  ;;  %v8105_v59 = vpop.permute.xlu1 %2871  ;;  %v8177_v33 = vrot.slane %v3061_v57, %v9244_v38  ;;  %v4585_v40 = vrot.slane %v4571_v17, %v9243_v7  ;;  %v8193_v17 = vrot.slane %v3291_v41, %v9244_v38 }
 0x556   : > { %9271 = vst [vmem:[#allocation59_spill] sm:$0xff] %v8105_v59  ;;  %4009 = vrot.lane.b32.xlu0 %v3936_v34, %s5411_s8  ;;  %v3674_v59 = vcombine.low %v7803_v25, %v7816_v42  ;;  %v4372_v58 = vcombine.low %v4339_v46, %v8111_v0  ;;  %v8149_v42 = vrot.slane %v4671_v23, %v9244_v38 }
 0x557   : > { %4049 = vrot.lane.b32.xlu1 %v8108_v31, %s5410_s16  ;;  %v8168_v37 = vrot.slane %v3727_v8, %v9243_v7  ;;  %v3725_v56 = vrot.slane %v3711_v48, %v9243_v7  ;;  %v4569_v23 = vrot.slane %v4555_v9, %v9243_v7  ;;  %v3937_v48 = vcombine.high %v7831_v13, %v9246_v49 }
 0x558   : > { %v8123_v39 = vpop.permute.xlu0 %2859  ;;  %v8154_v27 = vrot.slane %v4372_v58, %v9244_v38  ;;  %v8157_v34 = vrot.slane %v3674_v59, %v9244_v38  ;;  %v3989_v9 = vcombine.high %v8064_v21, %v8043_v60  ;;  %v3259_v21 = vcombine.high %v8019_v63, %v8049_v4 }
 0x559   : > { %9272 = vst [vmem:[#allocation49_spill] sm:$0xff] %v8123_v39  ;;  %v8125_v14 = vpop.permute.xlu1 %2879  ;;  %v3758_v8 = vcombine.low %v3725_v56, %v8168_v37  ;;  %v4603_v60 = vcombine.high %v4569_v23, %v4585_v40 }
 0x55a   : > { %9273 = vst [vmem:[#allocation22_spill] sm:$0xff] %v8125_v14  ;;  %4695 = vrot.lane.b32.xlu0 %v8134_v3, %s5409_s15  ;;  %v3706_v19 = vcombine.high %v8157_v34, %v9246_v49 }
 0x55b   : > { %4509 = vrot.lane.b32.xlu1 %v8128_v15, %s5414_s10  ;;  %v8211_v13 = vrot.slane %v3758_v8, %v9244_v38 }
 0x55c   : > { %v8144_v11 = vpop.permute.xlu0 %2867 }
 0x55d   : > { %9274 = vst [vmem:[#allocation63_spill] sm:$0xff] %v8144_v11  ;;  %v8146_v25 = vpop.permute.xlu1 %3553 }
 0x55e   : > { %9275 = vst [vmem:[#allocation37_spill] sm:$0xff] %v8146_v25  ;;  %4473 = vrot.lane.b32.xlu0 %v8154_v27, %s5410_s16  ;;  %v4373_v25 = vcombine.high %v4339_v46, %v8111_v0 }
 0x55f   : > { %4739 = vrot.lane.b32.xlu1 %v8149_v42, %s5414_s10 }
 0x560   : > { %v8172_v58 = vpop.permute.xlu0 %2875 }
 0x561   : > { %9276 = vst [vmem:[#allocation23_spill] sm:$0xff] %v8172_v58  ;;  %v8174_v59 = vpop.permute.xlu1 %4255  ;;  %v4602_v58 = vcombine.low %v4569_v23, %v4585_v40  ;;  %v9281_v40 = vcombine.low %v7628_v44, %v7631_v1  ;;  %v9283_v1 = vcombine.low %v7651_v22, %v7657_v52  ;;  %v3759_v22 = vcombine.high %v3725_v56, %v8168_v37 }
 0x562   : > { %3779 = vrot.lane.b32.xlu0 %v3706_v19, %s5411_s8  ;;  %v3045_v19 = vcombine.high %v7941_v47, %v7975_v30 }
 0x563   : > { %3129 = vrot.lane.b32.xlu1 %v8177_v33, %s5409_s15  ;;  %v8215_v39 = vrot.slane %v4602_v58, %v9244_v38  ;;  %v8235_v58 = vrot.slane %v4373_v25, %v9244_v38  ;;  %v8241_v23 = vrot.slane %v9281_v40, %v9244_v38  ;;  %v8254_v25 = vrot.slane %v4603_v60, %v9244_v38 }
 0x564   : > { %v8188_v14 = vpop.permute.xlu0 %2883  ;;  %v3059_v47 = vrot.slane %v3045_v19, %v9243_v7  ;;  %v8262_v8 = vrot.slane %v9283_v1, %v9244_v38  ;;  %v3707_v40 = vcombine.high %v7876_v10, %v9246_v49  ;;  %v8295_v37 = vrot.slane %v3759_v22, %v9244_v38 }
 0x565   : > { %9277 = vst [vmem:[#allocation67_spill] sm:$0xff] %v8188_v14  ;;  %v8190_v57 = vpop.permute.xlu1 %3573  ;;  %v3029_v14 = vcombine.high %v7665_v51, %v7977_v62  ;;  %v8222_v51 = vrot.slane %v3989_v9, %v9244_v38  ;;  %v3275_v62 = vcombine.high %v8017_v5, %v8047_v28  ;;  %v3273_v28 = vrot.slane %v3259_v21, %v9243_v7 }
 0x566   : > { %4017 = vrot.lane.b32.xlu0 %v3937_v48, %s5412_s7  ;;  %v3024_v44 = vcombine.high %v8241_v23, %v9246_v49  ;;  %v3254_v60 = vcombine.high %v8262_v8, %v9246_v49  ;;  %v3938_v1 = vcombine.high %v7896_v29, %v9246_v49  ;;  %v4356_v29 = vcombine.low %v8036_v55, %v8024_v36 }
 0x567   : > { %3359 = vrot.lane.b32.xlu1 %v8193_v17, %s5409_s15  ;;  %v3043_v30 = vrot.slane %v3029_v14, %v9243_v7  ;;  %v3289_v5 = vrot.slane %v3275_v62, %v9243_v7  ;;  %v3709_v36 = vcombine.high %v7989_v26, %v9246_v49  ;;  %v9292_v26 = vld [vmem:[#allocation55_spill] sm:$0xff] }
 0x568   : > { %v8206_v41 = vpop.permute.xlu0 %2891  ;;  %v8335_v55 = vrot.slane %v4356_v29, %v9244_v38 }
 0x569   : > { %9278 = vst [vmem:[#allocation31_spill] sm:$0xff] %v8206_v41  ;;  %v8208_v11 = vpop.permute.xlu1 %4263  ;;  %v3076_v63 = vcombine.low %v3043_v30, %v3059_v47  ;;  %v3306_v7 = vcombine.low %v3273_v28, %v3289_v5  ;;  %v3307_v10 = vcombine.high %v3273_v28, %v3289_v5 }
 0x56a   : > { %4703 = vrot.lane.b32.xlu0 %v8215_v39, %s5410_s16 }
 0x56b   : > { %3819 = vrot.lane.b32.xlu1 %v8211_v13, %s5410_s16  ;;  %v8272_v19 = vrot.slane %v3076_v63, %v9244_v38  ;;  %v8283_v62 = vrot.slane %v3306_v7, %v9244_v38  ;;  %v3077_v63 = vcombine.high %v3043_v30, %v3059_v47  ;;  %v8321_v5 = vrot.slane %v3307_v10, %v9244_v38 }
 0x56c   : > { %v8230_v0 = vpop.permute.xlu0 %2899  ;;  %v4388_v10 = vcombine.high %v8335_v55, %v9246_v49 }
 0x56d   : > { %9279 = vst [vmem:[#allocation58_spill] sm:$0xff] %v8230_v0  ;;  %v8232_v46 = vpop.permute.xlu1 %3581  ;;  %v8307_v47 = vrot.slane %v3077_v63, %v9244_v38 }
 0x56e   : > { %9280 = vst [vmem:[#allocation65_spill] sm:$0xff] %v8232_v46  ;;  %4481 = vrot.lane.b32.xlu0 %v8235_v58, %s5414_s10 }
 0x56f   : > { %4057 = vrot.lane.b32.xlu1 %v8222_v51, %s5414_s10 }
 0x570   : > { %v8249_v4 = vpop.permute.xlu0 %2907 }
 0x571   : > { %9282 = vst [vmem:[#allocation64_spill] sm:$0xff] %v8249_v4  ;;  %v8251_v14 = vpop.permute.xlu1 %4271 }
 0x572   : > { %3097 = vrot.lane.b32.xlu0 %v3024_v44, %s5411_s8 }
 0x573   : > { %4711 = vrot.lane.b32.xlu1 %v8254_v25, %s5414_s10 }
 0x574   : > { %v8267_v48 = vpop.permute.xlu0 %4227 }
 0x575   : > { %v8269_v9 = vpop.permute.xlu1 %4243 }
 0x576   : > { %3327 = vrot.lane.b32.xlu0 %v3254_v60, %s5411_s8  ;;  %v3025_v60 = vcombine.high %v7834_v18, %v9246_v49 }
 0x577   : > { %3137 = vrot.lane.b32.xlu1 %v8272_v19, %s5410_s16 }
 0x578   : > { %v8285_v21 = vpop.permute.xlu0 %3541 }
 0x579   : > { %v8280_v52 = vpop.permute.xlu1 %3589 }
 0x57a   : > { %9284 = vst [vmem:[#allocation61_spill] sm:$0xff] %v8280_v52  ;;  %3787 = vrot.lane.b32.xlu0 %v3707_v40, %s5412_s7  ;;  %v3255_v40 = vcombine.high %v7865_v2, %v9246_v49  ;;  %v9301_v52 = vld [vmem:[#allocation28_spill] sm:$0xff] }
 0x57b   : > { %3367 = vrot.lane.b32.xlu1 %v8283_v62, %s5410_s16 }
 0x57c   : > { %v8297_v56 = vpop.permute.xlu0 %4235 }
 0x57d   : > { %v8292_v44 = vpop.permute.xlu1 %2887 }
 0x57e   : > { %9285 = vst [vmem:[#allocation36_spill] sm:$0xff] %v8292_v44  ;;  %4025 = vrot.lane.b32.xlu0 %v3938_v1, %s5413_s9  ;;  %v3708_v1 = vcombine.high %v7889_v35, %v9246_v49 }
 0x57f   : > { %3827 = vrot.lane.b32.xlu1 %v8295_v37, %s5414_s10 }
 0x580   : > { %v8309_v30 = vpop.permute.xlu0 %3549 }
 0x581   : > { %v8304_v7 = vpop.permute.xlu1 %2895  ;;  %9287 = vst [vmem:[#allocation33_spill] sm:$0xff] %v8309_v30 }
 0x582   : > { %9286 = vst [vmem:[#allocation68_spill] sm:$0xff] %v8304_v7  ;;  %3105 = vrot.lane.b32.xlu0 %v3025_v60, %s5412_s7  ;;  %v9293_v60 = vcombine.low %v7784_v6, %v9292_v26  ;;  %v9295_v6 = vld [vmem:[#allocation20_spill] sm:$0xff] }
 0x583   : > { %3145 = vrot.lane.b32.xlu1 %v8307_v47, %s5414_s10  ;;  %v3026_v26 = vcombine.high %v9295_v6, %v9246_v49  ;;  %v9299_v6 = vld [vmem:[#allocation39_spill] sm:$0xff] }
 0x584   : > { %v8323_v28 = vpop.permute.xlu0 %3557  ;;  %v8351_v29 = vrot.slane %v9293_v60, %v9244_v38 }
 0x585   : > { %v8318_v22 = vpop.permute.xlu1 %2903  ;;  %9289 = vst [vmem:[#allocation66_spill] sm:$0xff] %v8323_v28 }
 0x586   : > { %9288 = vst [vmem:[#allocation44_spill] sm:$0xff] %v8318_v22  ;;  %3335 = vrot.lane.b32.xlu0 %v3255_v40, %s5412_s7 }
 0x587   : > { %3375 = vrot.lane.b32.xlu1 %v8321_v5, %s5414_s10 }
 0x588   : > { %v8337_v63 = vpop.permute.xlu0 %3565 }
 0x589   : > { %v8330_v18 = vpop.permute.xlu1 %2911  ;;  %9291 = vst [vmem:[#allocation72_spill] sm:$0xff] %v8337_v63  ;;  %v9297_v63 = vld [vmem:[#allocation26_spill] sm:$0xff] }
 0x58a   : > { %9290 = vst [vmem:[#allocation62_spill] sm:$0xff] %v8330_v18  ;;  %3795 = vrot.lane.b32.xlu0 %v3708_v1, %s5413_s9  ;;  %v9294_v18 = vld [vmem:[#allocation19_spill] sm:$0xff]  ;;  %v4686_v1 = vcombine.high %v8351_v29, %v9246_v49  ;;  %v9298_v0 = vcombine.low %v7716_v53, %v9297_v63  ;;  %v9304_v63 = vld [vmem:[#allocation54_spill] sm:$0xff] }
 0x58b   : > { %3803 = vrot.lane.b32.xlu1 %v3709_v36, %s5415_s11  ;;  %v3939_v35 = vcombine.high %v9294_v18, %v9246_v49  ;;  %v4457_v18 = vcombine.high %v8061_v54, %v9246_v49  ;;  %v4687_v54 = vcombine.high %v9299_v6, %v9246_v49 }
 0x58c   : > { %v8353_v40 = vpop.permute.xlu0 %4223  ;;  %v8381_v7 = vrot.slane %v9298_v0, %v9244_v38  ;;  %v9303_v0 = vld [vmem:[#allocation56_spill] sm:$0xff] }
 0x58d   : > { %v8343_v2 = vpop.permute.xlu1 %4251 }
 0x58e   : > { %4033 = vrot.lane.b32.xlu0 %v3939_v35, %s5415_s11  ;;  %v9296_v35 = vld [vmem:[#allocation40_spill] sm:$0xff]  ;;  %v4456_v53 = vcombine.high %v8381_v7, %v9246_v49 }
 0x58f   : > { %4461 = vrot.lane.b32.xlu1 %v4388_v10, %s5411_s8  ;;  %v3256_v22 = vcombine.high %v9296_v35, %v9246_v49 }
 0x590   : > { %v8363_v4 = vpop.permute.xlu0 %3569 }
 0x591   : > { %v8359_v36 = vpop.permute.xlu1 %4259 }
 0x592   : > { %3113 = vrot.lane.b32.xlu0 %v3026_v26, %s5413_s9  ;;  %v9300_v26 = vld [vmem:[#allocation27_spill] sm:$0xff] }
 0x593   : > { %4719 = vrot.lane.b32.xlu1 %v4686_v1, %s5411_s8  ;;  %v9302_v28 = vcombine.low %v9300_v26, %v9301_v52 }
 0x594   : > { %v8373_v10 = vpop.permute.xlu0 %4231 }
 0x595   : > { %v8369_v60 = vpop.permute.xlu1 %3577  ;;  %v8393_v35 = vrot.slane %v9302_v28, %v9244_v38 }
 0x596   : > { %3343 = vrot.lane.b32.xlu0 %v3256_v22, %s5413_s9  ;;  %v9305_v22 = vcombine.low %v9303_v0, %v9304_v63  ;;  %v9307_v0 = vcombine.low %v7903_v43, %v7906_v45  ;;  %v9310_v45 = vld [vmem:[#allocation57_spill] sm:$0xff] }
 0x597   : > { %4497 = vrot.lane.b32.xlu1 %v4457_v18, %s5412_s7  ;;  %v3774_v52 = vcombine.high %v8393_v35, %v9246_v49 }
 0x598   : > { %v8395_v41 = vpop.permute.xlu0 %4239  ;;  %v8403_v18 = vrot.slane %v9305_v22, %v9244_v38  ;;  %v8419_v63 = vrot.slane %v9307_v0, %v9244_v38  ;;  %v4389_v0 = vcombine.high %v8090_v32, %v9246_v49  ;;  %v4619_v32 = vcombine.high %v8134_v3, %v9246_v49 }
 0x599   : > { %v8385_v1 = vpop.permute.xlu1 %4267 }
 0x59a   : > { %4489 = vrot.lane.b32.xlu0 %v4456_v53, %s5411_s8  ;;  %v4004_v26 = vcombine.high %v8403_v18, %v9246_v49  ;;  %v9309_v53 = vld [vmem:[#allocation32_spill] sm:$0xff] }
 0x59b   : > { %4727 = vrot.lane.b32.xlu1 %v4687_v54, %s5412_s7  ;;  %v4005_v22 = vcombine.high %v9309_v53, %v9246_v49 }
 0x59c   : > { %v8411_v28 = vpop.permute.xlu0 %3585 }
 0x59d   : > { %v8407_v6 = vpop.permute.xlu1 %4247  ;;  %9306 = vst [vmem:[#allocation69_spill] sm:$0xff] %v8411_v28  ;;  %v4618_v28 = vcombine.high %v8419_v63, %v9246_v49 }
 0x59e   : > { %4037 = vrot.lane.b32.xlu0 %v4004_v26, %s5411_s8 }
 0x59f   : > { %3807 = vrot.lane.b32.xlu1 %v3774_v52, %s5411_s8  ;;  %v4458_v52 = vcombine.high %v9310_v45, %v9246_v49 }
 0x5a0   : > { %v8427_v46 = vpop.permute.xlu0 %4275 }
 0x5a1   : > { %v8423_v54 = vpop.permute.xlu1 %3593 }
 0x5a2   : > { %9308 = vst [vmem:[#allocation70_spill] sm:$0xff] %v8423_v54  ;;  %4691 = vrot.lane.b32.xlu0 %v4618_v28, %s5411_s8  ;;  %v9312_v28 = vcombine.low %v8072_v24, %v8069_v20  ;;  %v4390_v24 = vcombine.high %v8154_v27, %v9246_v49  ;;  %v9313_v20 = vcombine.low %v8015_v12, %v8012_v61 }
 0x5a3   : > { %4045 = vrot.lane.b32.xlu1 %v4005_v22, %s5412_s7  ;;  %v9311_v22 = vld [vmem:[#allocation60_spill] sm:$0xff]  ;;  %v4006_v12 = vcombine.high %v8108_v31, %v9246_v49 }
 0x5a4   : > { %v8437_v26 = vpop.permute.xlu0 %4013  ;;  %v4688_v54 = vcombine.high %v9311_v22, %v9246_v49  ;;  %v8451_v30 = vrot.slane %v9312_v28, %v9244_v38  ;;  %v8471_v28 = vrot.slane %v9313_v20, %v9244_v38  ;;  %v4459_v20 = vcombine.high %v8128_v15, %v9246_v49 }
 0x5a5   : > { %v8433_v43 = vpop.permute.xlu1 %3101 }
 0x5a6   : > { %4469 = vrot.lane.b32.xlu0 %v4389_v0, %s5412_s7  ;;  %v3322_v0 = vcombine.high %v8451_v30, %v9246_v49  ;;  %v3092_v27 = vcombine.high %v8471_v28, %v9246_v49 }
 0x5a7   : > { %4505 = vrot.lane.b32.xlu1 %v4458_v52, %s5413_s9 }
 0x5a8   : > { %v8453_v45 = vpop.permute.xlu0 %3783 }
 0x5a9   : > { %v8443_v53 = vpop.permute.xlu1 %3331 }
 0x5aa   : > { %4699 = vrot.lane.b32.xlu0 %v4619_v32, %s5412_s7 }
 0x5ab   : > { %4735 = vrot.lane.b32.xlu1 %v4688_v54, %s5413_s9  ;;  %v3775_v54 = vcombine.high %v8083_v16, %v9246_v49 }
 0x5ac   : > { %v8463_v22 = vpop.permute.xlu0 %4021 }
 0x5ad   : > { %v8459_v52 = vpop.permute.xlu1 %3791 }
 0x5ae   : > { %4477 = vrot.lane.b32.xlu0 %v4390_v24, %s5413_s9  ;;  %v4620_v24 = vcombine.high %v8215_v39, %v9246_v49  ;;  %v4621_v39 = vcombine.high %v8254_v25, %v9246_v49 }
 0x5af   : > { %3355 = vrot.lane.b32.xlu1 %v3322_v0, %s5411_s8 }
 0x5b0   : > { %v8479_v32 = vpop.permute.xlu0 %3109 }
 0x5b1   : > { %v8475_v3 = vpop.permute.xlu1 %4029 }
 0x5b2   : > { %3125 = vrot.lane.b32.xlu0 %v3092_v27, %s5411_s8  ;;  %v4391_v27 = vcombine.high %v8235_v58, %v9246_v49  ;;  %v3094_v58 = vcombine.high %v8272_v19, %v9246_v49 }
 0x5b3   : > { %3815 = vrot.lane.b32.xlu1 %v3775_v54, %s5412_s7 }
 0x5b4   : > { %v8489_v0 = vpop.permute.xlu0 %3339 }
 0x5b5   : > { %v8485_v61 = vpop.permute.xlu1 %4723  ;;  %9314 = vst [vmem:[#allocation24_spill] sm:$0xff] %v8489_v0  ;;  %v3325_v0 = vcombine.high %v8321_v5, %v9246_v49 }
 0x5b6   : > { %4707 = vrot.lane.b32.xlu0 %v4620_v24, %s5413_s9  ;;  %v4689_v24 = vcombine.high %v8149_v42, %v9246_v49  ;;  %v3324_v42 = vcombine.high %v8283_v62, %v9246_v49 }
 0x5b7   : > { %4053 = vrot.lane.b32.xlu1 %v4006_v12, %s5413_s9 }
 0x5b8   : > { %v8499_v54 = vpop.permute.xlu0 %3799 }
 0x5b9   : > { %v8495_v16 = vpop.permute.xlu1 %4041 }
 0x5ba   : > { %9315 = vst [vmem:[#allocation71_spill] sm:$0xff] %v8495_v16  ;;  %4485 = vrot.lane.b32.xlu0 %v4391_v27, %s5415_s11  ;;  %v3093_v27 = vcombine.high %v8177_v33, %v9246_v49  ;;  %v3777_v33 = vcombine.high %v8295_v37, %v9246_v49 }
 0x5bb   : > { %4513 = vrot.lane.b32.xlu1 %v4459_v20, %s5415_s11 }
 0x5bc   : > { %v8509_v12 = vpop.permute.xlu0 %3117 }
 0x5bd   : > { %v8505_v31 = vpop.permute.xlu1 %4501  ;;  %9316 = vst [vmem:[#allocation35_spill] sm:$0xff] %v8509_v12 }
 0x5be   : > { %4743 = vrot.lane.b32.xlu0 %v4689_v24, %s5415_s11  ;;  %v3323_v24 = vcombine.high %v8193_v17, %v9246_v49  ;;  %v3095_v17 = vcombine.high %v8307_v47, %v9246_v49 }
 0x5bf   : > { %4715 = vrot.lane.b32.xlu1 %v4621_v39, %s5415_s11 }
 0x5c0   : > { %v8519_v20 = vpop.permute.xlu0 %4493 }
 0x5c1   : > { %v8515_v15 = vpop.permute.xlu1 %4731 }
 0x5c2   : > { %3133 = vrot.lane.b32.xlu0 %v3093_v27, %s5412_s7  ;;  %v3776_v27 = vcombine.high %v8211_v13, %v9246_v49  ;;  %v9319_v13 = vld [vmem:[#allocation48_spill] sm:$0xff] }
 0x5c3   : > { %3141 = vrot.lane.b32.xlu1 %v3094_v58, %s5413_s9 }
 0x5c4   : > { %v8529_v39 = vpop.permute.xlu0 %4465 }
 0x5c5   : > { %v8525_v25 = vpop.permute.xlu1 %3811 }
 0x5c6   : > { %9317 = vst [vmem:[#allocation42_spill] sm:$0xff] %v8525_v25  ;;  %3363 = vrot.lane.b32.xlu0 %v3323_v24, %s5412_s7  ;;  %v4007_v24 = vcombine.high %v8222_v51, %v9246_v49 }
 0x5c7   : > { %3371 = vrot.lane.b32.xlu1 %v3324_v42, %s5413_s9 }
 0x5c8   : > { %v4010_v58 = vpop.permute.xlu0 %4009 }
 0x5c9   : > { %v8535_v19 = vpop.permute.xlu1 %4049 }
 0x5ca   : > { %9318 = vst [vmem:[#allocation41_spill] sm:$0xff] %v8535_v19  ;;  %3823 = vrot.lane.b32.xlu0 %v3776_v27, %s5413_s9  ;;  %v9323_v19 = vld [vmem:[#allocation30_spill] sm:$0xff] }
 0x5cb   : > { %3831 = vrot.lane.b32.xlu1 %v3777_v33, %s5415_s11  ;;  %v9320_v33 = vld [vmem:[#allocation46_spill] sm:$0xff]  ;;  %v3027_v44 = vcombine.high %v9323_v19, %v9246_v49  ;;  %v9328_v19 = vld [vmem:[#allocation11_spill] sm:$0xff] }
 0x5cc   : > { %v8547_v42 = vpop.permute.xlu0 %4695  ;;  %v9321_v27 = vcombine.high %v9319_v13, %v9320_v33  ;;  %v4064_v13 = vsel %vm506_vm3, %v8093_v50, %v4010_v58  ;;  %v9325_v33 = vld [vmem:[#allocation15_spill] sm:$0xff] }
 0x5cd   : > { %v8543_v62 = vpop.permute.xlu1 %4509 }
 0x5ce   : > { %4061 = vrot.lane.b32.xlu0 %v4007_v24, %s5415_s11  ;;  %v3253_v12 = vrot.slane %v9321_v27, %v9244_v38 }
 0x5cf   : > { %3149 = vrot.lane.b32.xlu1 %v3095_v17, %s5415_s11 }
 0x5d0   : > { %v8561_v47 = vpop.permute.xlu0 %4473  ;;  %v3257_v17 = vcombine.high %v3253_v12, %v9246_v49 }
 0x5d1   : > { %v8553_v37 = vpop.permute.xlu1 %4739 }
 0x5d2   : > { %3347 = vrot.lane.b32.xlu0 %v3253_v12, %s5414_s10 }
 0x5d3   : > { %3379 = vrot.lane.b32.xlu1 %v3325_v0, %s5415_s11  ;;  %v9324_v0 = vld [vmem:[#allocation17_spill] sm:$0xff] }
 0x5d4   : > { %v3780_v24 = vpop.permute.xlu0 %3779  ;;  %v9326_v27 = vcombine.low %v9324_v0, %v9325_v33 }
 0x5d5   : > { %v8565_v51 = vpop.permute.xlu1 %3129  ;;  %v3834_v5 = vsel %vm506_vm3, %v8157_v34, %v3780_v24 }
 0x5d6   : > { %9322 = vst [vmem:[#allocation43_spill] sm:$0xff] %v8565_v51  ;;  %v8579_v25 = vrot.slane %v9326_v27, %v9244_v38  ;;  %3121 = vrot.lane.b32.xlu0 %v3027_v44, %s5415_s11  ;;  %v3835_v12 = vsel %vm508_vm4, %v3834_v5, %v8453_v45  ;;  %v9329_v51 = vld [vmem:[#allocation13_spill] sm:$0xff]  ;;  %v4065_v44 = vsel %vm508_vm4, %v4064_v13, %v8437_v26 }
 0x5d7   : > { %3351 = vrot.lane.b32.xlu1 %v3257_v17, %s5415_s11  ;;  %v9330_v50 = vcombine.low %v9328_v19, %v9329_v51  ;;  %v4793_v17 = vld [vmem:[%s8978_s4] sm:$0xf]  ;;  %v9333_v5 = vcombine.high %v9324_v0, %v9325_v33  ;;  %v9335_v0 = vcombine.high %v9328_v19, %v9329_v51 }
 0x5d8   : > { %9327 = vst [vmem:[#allocation21_spill] sm:$0xff] %v8579_v25  ;;  %v4943_v24 = vcombine.high %v8579_v25, %v9246_v49  ;;  %v4018_v27 = vpop.permute.xlu0 %4017 }
 0x5d9   : > { %v8588_v58 = vrot.slane %v9330_v50, %v9244_v38  ;;  %v8590_v34 = vpop.permute.xlu1 %3359  ;;  %v4066_v45 = vsel %vm510_vm5, %v4065_v44, %v4018_v27  ;;  %v4926_v50 = vrot.slane %v9333_v5, %v9244_v38  ;;  %v4994_v33 = vrot.slane %v9335_v0, %v9244_v38  ;;  %v9338_v44 = vld [vmem:[#allocation16_spill] sm:$0xff] }
 0x5da   : > { %9332 = vst [vmem:[#allocation29_spill] sm:$0xff] %v8590_v34  ;;  %4796 = vperm.xlu0 %5263, %v4793_v17   ;;  %v4067_v34 = vsel %vm512_vm6, %v4066_v45, %v8463_v22  ;;  %v9340_v0 = vld [vmem:[#allocation12_spill] sm:$0xff] }
 0x5db   : > { %9331 = vst [vmem:[#allocation10_spill] sm:$0xff] %v8588_v58  ;;  %5016 = vrot.lane.b32.xlu1 %v4943_v24, %s5411_s8  ;;  %v5011_v25 = vcombine.high %v8588_v58, %v9246_v49  ;;  %v4944_v13 = vcombine.high %v4926_v50, %v9246_v49  ;;  %v9337_v24 = vld [vmem:[#allocation18_spill] sm:$0xff] }
 0x5dc   : > { %v8611_v26 = vpop.permute.xlu0 %4703  ;;  %v9339_v27 = vcombine.low %v9337_v24, %v9338_v44 }
 0x5dd   : > { %v8609_v16 = vpop.permute.xlu1 %3819 }
 0x5de   : > { %9334 = vst [vmem:[#allocation55_spill] sm:$0xff] %v8609_v16  ;;  %5044 = vrot.lane.b32.xlu0 %v5011_v25, %s5411_s8  ;;  %v4935_v45 = vrot.slane %v9339_v27, %v9244_v38  ;;  %v5012_v25 = vcombine.high %v4994_v33, %v9246_v49  ;;  %v9341_v27 = vld [vmem:[#allocation14_spill] sm:$0xff] }
 0x5df   : > { %5020 = vrot.lane.b32.xlu1 %v4926_v50, %s5409_s15  ;;  %v9342_v58 = vcombine.low %v9340_v0, %v9341_v27 }
 0x5e0   : > { %v8622_v22 = vpop.permute.xlu0 %4481  ;;  %v4945_v19 = vcombine.high %v4935_v45, %v9246_v49 }
 0x5e1   : > { %v8620_v17 = vpop.permute.xlu1 %4057 }
 0x5e2   : > { %9336 = vst [vmem:[#allocation19_spill] sm:$0xff] %v8620_v17  ;;  %5048 = vrot.lane.b32.xlu0 %v4994_v33, %s5409_s15  ;;  %v5003_v33 = vrot.slane %v9342_v58, %v9244_v38  ;;  %s5187_s15 = sshll.u32 %s5545_s23, 3 }
 0x5e3   : > { %5024 = vrot.lane.b32.xlu1 %v4944_v13, %s5412_s7  ;;  %s242_s8 = scalar_lea.vmem [#allocation7], %s5187_s15 }
 0x5e4   : > { %v3098_v50 = vpop.permute.xlu0 %3097  ;;  %v5013_v58 = vcombine.high %v5003_v33, %v9246_v49 }
 0x5e5   : > { %v8631_v5 = vpop.permute.xlu1 %4711  ;;  %v3152_v51 = vsel %vm506_vm3, %v8241_v23, %v3098_v50 }
 0x5e6   : > { %v3153_v13 = vsel %vm508_vm4, %v3152_v51, %v8433_v43  ;;  %5052 = vrot.lane.b32.xlu0 %v5012_v25, %s5412_s7  ;;  %s5109_s7 = sshll.u32 %s242_s8, 4  ;;  %s5110_s7 = int_to_ptr.vmem [resolvable:$true] %s5109_s7 }
 0x5e7   : > { %5028 = vrot.lane.b32.xlu1 %v4935_v45, %s5410_s16  ;;  %v9344_v45 = vcombine.high %v9337_v24, %v9338_v44  ;;  %s5334_s17 = scalar_lea.vmem %s5110_s7, 128  ;;  %p5341_p5 = scmp.lt.s32.totalorder %s5110_s7, %s5339_s26 }
 0x5e8   : > { %v3328_v16 = vpop.permute.xlu0 %3327  ;;  %p5335_p11 = scmp.ne.s32.totalorder %s5110_s7, %s5334_s17 }
 0x5e9   : > { %v8644_v17 = vpop.permute.xlu1 %3137  ;;  %v3382_v23 = vsel %vm506_vm3, %v8262_v8, %v3328_v16  ;;  %v4942_v43 = vrot.slane %v9344_v45, %v9244_v38 }
 0x5ea   : > { %9343 = vst [vmem:[#allocation20_spill] sm:$0xff] %v8644_v17  ;;  %v3383_v25 = vsel %vm508_vm4, %v3382_v23, %v8443_v53  ;;  %5056 = vrot.lane.b32.xlu0 %v5003_v33, %s5410_s16  ;;  %v9345_v53 = vcombine.high %v9340_v0, %v9341_v27  ;;  %s5200_s16 = sshll.u32 %s5469_s22, 7  ;;  %p5336_p13 = pnand %p5335_p11, %p9394_p12 }
 0x5eb   : > { %5032 = vrot.lane.b32.xlu1 %v4945_v19, %s5413_s9  ;;  %v4946_v8 = vcombine.high %v4942_v43, %v9246_v49  ;;  %s5340_s22 = scalar_lea.vmem %s5339_s26, 256 }
 0x5ec   : > { %v3788_v51 = vpop.permute.xlu0 %3787  ;;  %v5010_v24 = vrot.slane %v9345_v53, %v9244_v38  ;;  %p5337_p4 = pneg %p5336_p13  ;;  %p5342_p7 = scmp.lt.s32.totalorder %s5340_s22, %s5334_s17 }
 0x5ed   : > { %v8657_v50 = vpop.permute.xlu1 %3367  ;;  %v3836_v17 = vsel %vm510_vm5, %v3835_v12, %v3788_v51 }
 0x5ee   : > { %v3837_v16 = vsel %vm512_vm6, %v3836_v17, %v8459_v52  ;;  %5060 = vrot.lane.b32.xlu0 %v5013_v58, %s5413_s9  ;;  %v5014_v52 = vcombine.high %v5010_v24, %v9246_v49  ;;  %p5343_p8 = por %p5342_p7, %p5341_p5 }
 0x5ef   : > { %5036 = vrot.lane.b32.xlu1 %v4942_v43, %s5414_s10 }
 0x5f0   : > { %v4026_v19 = vpop.permute.xlu0 %4025  ;;  %p5344_p10 = pnand %p5343_p8, %p5337_p4 }
 0x5f1   : > { %v8669_v44 = vpop.permute.xlu1 %3827  ;;  %v4068_v33 = vsel %vm514_vm7, %v4067_v34, %v4026_v19 }
 0x5f2   : > { %v4069_v12 = vsel %vm516_vm8, %v4068_v33, %v8475_v3  ;;  %5064 = vrot.lane.b32.xlu0 %v5010_v24, %s5414_s10 }
 0x5f3   : > { %5040 = vrot.lane.b32.xlu1 %v4946_v8, %s5415_s11 }
 0x5f4   : > { %v3106_v23 = vpop.permute.xlu0 %3105 }
 0x5f5   : > { %v8677_v17 = vpop.permute.xlu1 %3145  ;;  %v3154_v0 = vsel %vm510_vm5, %v3153_v13, %v3106_v23 }
 0x5f6   : > { %5068 = vrot.lane.b32.xlu0 %v5014_v52, %s5415_s11  ;;  %s5107_s11 = scalar_lea.hbm %s8979_s5, %s5200_s16 }
 0x5f8   : > { %v3336_v27 = vpop.permute.xlu0 %3335 }
 0x5f9   : > { %v8681_v38 = vpop.permute.xlu1 %3375  ;;  %v8684_v34 = vsel %vm510_vm5, %v3383_v25, %v3336_v27  ;;  %v3155_v25 = vsel %vm512_vm6, %v3154_v0, %v8479_v32 }
 0x5fc   : > { %v3796_v43 = vpop.permute.xlu0 %3795 }
 0x5fd   : > { %v3804_v45 = vpop.permute.xlu1 %3803  ;;  %v3838_v3 = vsel %vm514_vm7, %v3837_v16, %v3796_v43 }
 0x5fe   : > { %v3839_v49 = vsel %vm516_vm8, %v3838_v3, %v8499_v54 }
 0x5ff   : > { %v3840_v58 = vsel %vm518_vm10, %v3839_v49, %v3804_v45 }
 0x600   : > { %v4034_v8 = vpop.permute.xlu0 %4033 }
 0x601   : > { %v4462_v51 = vpop.permute.xlu1 %4461  ;;  %v4070_v13 = vsel %vm518_vm10, %v4069_v12, %v4034_v8 }
 0x602   : > { %v4774_v53 = vrot.slane %v4070_v13, 4  ;;  %v4516_v0 = vsel %vm506_vm3, %v8335_v55, %v4462_v51 }
 0x603   : > { %v4517_v8 = vsel %vm508_vm4, %v4516_v0, %v8529_v39 }
 0x604   : > { %v3114_v19 = vpop.permute.xlu0 %3113  ;;  %v8694_v33 = vsel %vm2383_vm9, %v3840_v58, %v4774_v53 }
 0x605   : > { %v4720_v24 = vpop.permute.xlu1 %4719  ;;  %9346 = vst [vmem:[#allocation40_spill] sm:$0xff] %v8694_v33  ;;  %v8697_v16 = vsel %vm514_vm7, %v3155_v25, %v3114_v19 }
 0x606   : > { %9347 = vst [vmem:[#allocation26_spill] sm:$0xff] %v8697_v16  ;;  %v4753_v0 = vsel %vm506_vm3, %v8351_v29, %v4720_v24 }
 0x608   : > { %v8699_v54 = vpop.permute.xlu0 %3343 }
 0x609   : > { %v4498_v52 = vpop.permute.xlu1 %4497  ;;  %9348 = vst [vmem:[#allocation39_spill] sm:$0xff] %v8699_v54 }
 0x60c   : > { %v4490_v27 = vpop.permute.xlu0 %4489 }
 0x60d   : > { %v4728_v23 = vpop.permute.xlu1 %4727  ;;  %v4523_v19 = vsel %vm506_vm3, %v8381_v7, %v4490_v27 }
 0x60e   : > { %v4524_v54 = vsel %vm508_vm4, %v4523_v19, %v8519_v20 }
 0x60f   : > { %v4525_v7 = vsel %vm510_vm5, %v4524_v54, %v4498_v52  ;;  %v4754_v52 = vsel %vm508_vm4, %v4753_v0, %v8485_v61 }
 0x610   : > { %v8703_v12 = vpop.permute.xlu0 %4037 }
 0x611   : > { %v8701_v45 = vpop.permute.xlu1 %3807 }
 0x614   : > { %v4692_v3 = vpop.permute.xlu0 %4691 }
 0x615   : > { %v8705_v43 = vpop.permute.xlu1 %4045 }
 0x618   : > { %v4470_v32 = vpop.permute.xlu0 %4469 }
 0x619   : > { %v4506_v49 = vpop.permute.xlu1 %4505  ;;  %v4518_v53 = vsel %vm510_vm5, %v4517_v8, %v4470_v32  ;;  %v4746_v32 = vsel %vm506_vm3, %v8419_v63, %v4692_v3 }
 0x61a   : > { %v4519_v33 = vsel %vm512_vm6, %v4518_v53, %v8561_v47  ;;  %v9349_v47 = vld [vmem:[#allocation53_spill] sm:$0xff]  ;;  %v4747_v63 = vsel %vm508_vm4, %v4746_v32, %v8547_v42 }
 0x61b   : > { %v4285_v20 = vsel %vm506_vm3, %v9349_v47, %v8343_v2 }
 0x61c   : > { %v4700_v13 = vpop.permute.xlu0 %4699  ;;  %v4286_v54 = vsel %vm508_vm4, %v4285_v20, %v8174_v59 }
 0x61d   : > { %v4736_v58 = vpop.permute.xlu1 %4735  ;;  %v4748_v24 = vsel %vm510_vm5, %v4747_v63, %v4700_v13  ;;  %v9352_v63 = vld [vmem:[#allocation47_spill] sm:$0xff] }
 0x61e   : > { %v4749_v61 = vsel %vm512_vm6, %v4748_v24, %v8611_v26  ;;  %v9355_v24 = vld [vmem:[#allocation43_spill] sm:$0xff] }
 0x620   : > { %v4478_v16 = vpop.permute.xlu0 %4477 }
 0x621   : > { %v8714_v25 = vpop.permute.xlu1 %3355  ;;  %v4520_v55 = vsel %vm514_vm7, %v4519_v33, %v4478_v16  ;;  %v9350_v33 = vld [vmem:[#allocation51_spill] sm:$0xff] }
 0x622   : > { %v4521_v39 = vsel %vm516_vm8, %v4520_v55, %v8622_v22  ;;  %v4278_v16 = vsel %vm506_vm3, %v9350_v33, %v8353_v40  ;;  %v4526_v22 = vsel %vm512_vm6, %v4525_v7, %v8505_v31  ;;  %v4755_v40 = vsel %vm510_vm5, %v4754_v52, %v4728_v23 }
 0x623   : > { %v4527_v29 = vsel %vm514_vm7, %v4526_v22, %v4506_v49  ;;  %v4287_v31 = vsel %vm510_vm5, %v4286_v54, %v8359_v36  ;;  %v4279_v42 = vsel %vm508_vm4, %v4278_v16, %v8267_v48  ;;  %v4756_v59 = vsel %vm512_vm6, %v4755_v40, %v8515_v15  ;;  %v9356_v54 = vld [vmem:[#allocation29_spill] sm:$0xff]  ;;  %v9357_v40 = vld [vmem:[#allocation34_spill] sm:$0xff] }
 0x624   : > { %v3126_v27 = vpop.permute.xlu0 %3125  ;;  %v4280_v8 = vsel %vm510_vm5, %v4279_v42, %v8373_v10  ;;  %v4528_v49 = vsel %vm516_vm8, %v4527_v29, %v8543_v62  ;;  %v4288_v48 = vsel %vm512_vm6, %v4287_v31, %v8208_v11  ;;  %v4757_v10 = vsel %vm514_vm7, %v4756_v59, %v4736_v58  ;;  %v9361_v59 = vld [vmem:[#allocation65_spill] sm:$0xff] }
 0x625   : > { %v8723_v51 = vpop.permute.xlu1 %3815  ;;  %v4281_v26 = vsel %vm512_vm6, %v4280_v8, %v8297_v56  ;;  %v4289_v62 = vsel %vm514_vm7, %v4288_v48, %v8385_v1  ;;  %v4758_v58 = vsel %vm516_vm8, %v4757_v10, %v8553_v37  ;;  %v3159_v22 = vsel %vm506_vm3, %v8471_v28, %v3126_v27  ;;  %v9354_v28 = vld [vmem:[#allocation42_spill] sm:$0xff]  ;;  %v9358_v8 = vld [vmem:[#allocation36_spill] sm:$0xff]  ;;  %v9363_v48 = vld [vmem:[#allocation41_spill] sm:$0xff] }
 0x626   : > { %v4282_v15 = vsel %vm514_vm7, %v4281_v26, %v8395_v41  ;;  %v4290_v56 = vsel %vm516_vm8, %v4289_v62, %v8251_v14  ;;  %v9351_v14 = vld [vmem:[#allocation25_spill] sm:$0xff]  ;;  %v3596_v52 = vsel %vm506_vm3, %v9352_v63, %v8285_v21 }
 0x627   : > { %v4283_v41 = vsel %vm516_vm8, %v4282_v15, %v8269_v9  ;;  %v4291_v47 = vsel %vm518_vm10, %v4290_v56, %v8427_v46  ;;  %v3603_v33 = vsel %vm506_vm3, %v9351_v14, %v8363_v4  ;;  %v4071_v46 = vsel %vm506_vm3, %v8403_v18, %v8703_v12  ;;  %v9365_v15 = vld [vmem:[#allocation55_spill] sm:$0xff]  ;;  %v9368_v56 = vld [vmem:[#allocation37_spill] sm:$0xff] }
 0x628   : > { %v4708_v2 = vpop.permute.xlu0 %4707  ;;  %v3389_v4 = vsel %vm506_vm3, %v8451_v30, %v8714_v25  ;;  %v3604_v29 = vsel %vm508_vm4, %v3603_v33, %v8190_v57  ;;  %v3160_v30 = vsel %vm508_vm4, %v3159_v22, %v9355_v24  ;;  %v3597_v31 = vsel %vm508_vm4, %v3596_v52, %v9357_v40  ;;  %v9371_v14 = vld [vmem:[#allocation61_spill] sm:$0xff]  ;;  %v9374_v52 = vld [vmem:[#allocation38_spill] sm:$0xff]  ;;  %v9379_v40 = vld [vmem:[#allocation72_spill] sm:$0xff] }
 0x629   : > { %v8740_v3 = vpop.permute.xlu1 %4053  ;;  %v4750_v23 = vsel %vm514_vm7, %v4749_v61, %v4708_v2  ;;  %v3605_v12 = vsel %vm510_vm5, %v3604_v29, %v8369_v60  ;;  %v3390_v60 = vsel %vm508_vm4, %v3389_v4, %v9356_v54  ;;  %v9359_v61 = vld [vmem:[#allocation52_spill] sm:$0xff]  ;;  %v9373_v4 = vld [vmem:[#allocation19_spill] sm:$0xff]  ;;  %v9378_v54 = vld [vmem:[#allocation58_spill] sm:$0xff] }
 0x62a   : > { %v4751_v7 = vsel %vm516_vm8, %v4750_v23, %v8631_v5  ;;  %v4284_v5 = vsel %vm518_vm10, %v4283_v41, %v8407_v6  ;;  %v3841_v6 = vsel %vm506_vm3, %v8393_v35, %v8701_v45  ;;  %v9353_v35 = vld [vmem:[#allocation71_spill] sm:$0xff] }
 0x62b   : > { %v4072_v45 = vsel %vm508_vm4, %v4071_v46, %v9353_v35  ;;  %v3842_v27 = vsel %vm508_vm4, %v3841_v6, %v9354_v28  ;;  %v9369_v41 = vld [vmem:[#allocation31_spill] sm:$0xff] }
 0x62c   : > { %v4486_v53 = vpop.permute.xlu0 %4485  ;;  %v4073_v21 = vsel %vm510_vm5, %v4072_v45, %v8705_v43  ;;  %v3843_v57 = vsel %vm510_vm5, %v3842_v27, %v8723_v51  ;;  %v3606_v51 = vsel %vm512_vm6, %v3605_v12, %v9361_v59  ;;  %v9375_v12 = vld [vmem:[#allocation68_spill] sm:$0xff]  ;;  %v9376_v45 = vld [vmem:[#allocation63_spill] sm:$0xff]  ;;  %v9377_v27 = vld [vmem:[#allocation45_spill] sm:$0xff] }
 0x62d   : > { %v4514_v13 = vpop.permute.xlu1 %4513  ;;  %v4522_v19 = vsel %vm518_vm10, %v4521_v39, %v4486_v53  ;;  %v9362_v53 = vld [vmem:[#allocation69_spill] sm:$0xff]  ;;  %v4074_v10 = vsel %vm512_vm6, %v4073_v21, %v9363_v48  ;;  %v9382_v59 = vld [vmem:[#allocation59_spill] sm:$0xff]  ;;  %v9384_v48 = vld [vmem:[#allocation40_spill] sm:$0xff] }
 0x62e   : > { %v4529_v36 = vsel %vm518_vm10, %v4528_v49, %v4514_v13  ;;  %v4780_v0 = vrot.slane %v4522_v19, 4  ;;  %v2921_v49 = vsel %vm506_vm3, %v9359_v61, %v9358_v8  ;;  %v9360_v13 = vld [vmem:[#allocation33_spill] sm:$0xff]  ;;  %v9364_v19 = vld [vmem:[#allocation20_spill] sm:$0xff] }
 0x62f   : > { %v4781_v55 = vrot.slane %v4529_v36, 4  ;;  %v3598_v43 = vsel %vm510_vm5, %v3597_v31, %v9360_v13  ;;  %v3607_v36 = vsel %vm514_vm7, %v3606_v51, %v9362_v53  ;;  %v9380_v61 = vld [vmem:[#allocation44_spill] sm:$0xff] }
 0x630   : > { %v4744_v11 = vpop.permute.xlu0 %4743  ;;  %v4790_v9 = vsel %vm2383_vm9, %v4284_v5, %v4780_v0  ;;  %v9370_v5 = vld [vmem:[#allocation66_spill] sm:$0xff]  ;;  %v9381_v13 = vld [vmem:[#allocation24_spill] sm:$0xff] }
 0x631   : > { %v4716_v32 = vpop.permute.xlu1 %4715  ;;  %v4759_v1 = vsel %vm518_vm10, %v4758_v58, %v4744_v11  ;;  %v4791_v37 = vsel %vm2383_vm9, %v4291_v47, %v4781_v55  ;;  %v3844_v55 = vsel %vm512_vm6, %v3843_v57, %v9365_v15  ;;  %v9366_v11 = vld [vmem:[#allocation49_spill] sm:$0xff]  ;;  %v9367_v58 = vld [vmem:[#allocation50_spill] sm:$0xff]  ;;  %v2922_v47 = vsel %vm508_vm4, %v2921_v49, %v9369_v41  ;;  %v9386_v15 = vld [vmem:[#allocation64_spill] sm:$0xff] }
 0x632   : > { %v4752_v39 = vsel %vm518_vm10, %v4751_v7, %v4716_v32  ;;  %5191 = vmatprep.subr.msk.mxu1 %vm2383_vm9, %v4759_v1  ;;  %v4075_v32 = vsel %vm514_vm7, %v4074_v10, %v8740_v3  ;;  %v3599_v1 = vsel %vm512_vm6, %v3598_v43, %v9368_v56  ;;  %v3608_v3 = vsel %vm516_vm8, %v3607_v36, %v9371_v14  ;;  %v9385_v10 = vld [vmem:[#allocation23_spill] sm:$0xff] }
 0x633   : > { %5192 = vmatpush1.msk.msra.mxu1 %vm2383_vm9, %v4752_v39  ;;  %v2914_v39 = vsel %vm506_vm3, %v9367_v58, %v9366_v11  ;;  %v4076_v63 = vsel %vm516_vm8, %v4075_v32, %v9373_v4  ;;  %v2923_v35 = vsel %vm510_vm5, %v2922_v47, %v9375_v12  ;;  %v3385_v43 = vsel %vm512_vm6, %v8684_v34, %v9381_v13  ;;  %v9390_v47 = vld [vmem:[#allocation22_spill] sm:$0xff] }
 0x634   : > { %v3134_v16 = vpop.permute.xlu0 %3133  ;;  %4832 = vmatprep.subr.mxu1 %v4791_v37  ;;  %v3600_v37 = vsel %vm514_vm7, %v3599_v1, %v9370_v5  ;;  %v2915_v29 = vsel %vm508_vm4, %v2914_v39, %v9374_v52  ;;  %v9389_v39 = vld [vmem:[#allocation62_spill] sm:$0xff] }
 0x635   : > { %v3142_v20 = vpop.permute.xlu1 %3141  ;;  %4833 = vmatpush1.msra.mxu1 %v4790_v9  ;;  %v3161_v2 = vsel %vm510_vm5, %v3160_v30, %v3134_v16  ;;  %v9372_v16 = vld [vmem:[#allocation70_spill] sm:$0xff]  ;;  %v2916_v28 = vsel %vm510_vm5, %v2915_v29, %v9376_v45 }
 0x636   : > { %v3162_v26 = vsel %vm512_vm6, %v3161_v2, %v9364_v19  ;;  %v3609_v9 = vsel %vm518_vm10, %v3608_v3, %v9372_v16  ;;  %v2917_v51 = vsel %vm512_vm6, %v2916_v28, %v9382_v59  ;;  %v9391_v3 = vld [vmem:[#allocation67_spill] sm:$0xff]  ;;  %v9393_v45 = vld [vmem:[#allocation10_spill] sm:$0xff] }
 0x637   : > { %v4769_v30 = vrot.slane %v3609_v9, 4  ;;  %v2918_v19 = vsel %vm514_vm7, %v2917_v51, %v9385_v10 }
 0x638   : > { %v3364_v25 = vpop.permute.xlu0 %3363  ;;  %v2919_v5 = vsel %vm516_vm8, %v2918_v19, %v9390_v47 }
 0x639   : > { %v3372_v18 = vpop.permute.xlu1 %3371  ;;  %v3391_v42 = vsel %vm510_vm5, %v3390_v60, %v3364_v25  ;;  %v2924_v60 = vsel %vm512_vm6, %v2923_v35, %v9378_v54  ;;  %v9392_v35 = vld [vmem:[#allocation21_spill] sm:$0xff] }
 0x63a   : > { %v3392_v7 = vsel %vm512_vm6, %v3391_v42, %v8657_v50  ;;  %v3163_v50 = vsel %vm514_vm7, %v3162_v26, %v3142_v20  ;;  %v2925_v49 = vsel %vm514_vm7, %v2924_v60, %v9380_v61 }
 0x63b   : > { %v3393_v46 = vsel %vm514_vm7, %v3392_v7, %v3372_v18  ;;  %v3601_v18 = vsel %vm516_vm8, %v3600_v37, %v9377_v27  ;;  %v9387_v7 = vld [vmem:[#allocation35_spill] sm:$0xff] }
 0x63c   : > { %v3824_v62 = vpop.permute.xlu0 %3823  ;;  %v3394_v57 = vsel %vm516_vm8, %v3393_v46, %v8681_v38  ;;  %v3602_v31 = vsel %vm518_vm10, %v3601_v18, %v9379_v40 }
 0x63d   : > { %v3832_v23 = vpop.permute.xlu1 %3831  ;;  %v3845_v0 = vsel %vm514_vm7, %v3844_v55, %v3824_v62  ;;  %v4768_v26 = vrot.slane %v3602_v31, 4  ;;  %v2926_v55 = vsel %vm516_vm8, %v2925_v49, %v9386_v15 }
 0x63e   : > { %v3846_v6 = vsel %vm516_vm8, %v3845_v0, %v8669_v44  ;;  %v3164_v44 = vsel %vm516_vm8, %v3163_v50, %v8677_v17  ;;  %v9388_v0 = vld [vmem:[#allocation26_spill] sm:$0xff]  ;;  %v2927_v56 = vsel %vm518_vm10, %v2926_v55, %v9389_v39  ;;  %v2920_v50 = vsel %vm518_vm10, %v2919_v5, %v9391_v3 }
 0x63f   : > { %v3847_v25 = vsel %vm518_vm10, %v3846_v6, %v3832_v23  ;;  %v9383_v23 = vld [vmem:[#allocation39_spill] sm:$0xff]  ;;  %v3157_v11 = vsel %vm516_vm8, %v9388_v0, %v9387_v7 }
 0x640   : > { %v4062_v22 = vpop.permute.xlu0 %4061  ;;  %v3386_v53 = vsel %vm514_vm7, %v3385_v43, %v9383_v23 }
 0x641   : > { %v3150_v33 = vpop.permute.xlu1 %3149  ;;  %v4077_v20 = vsel %vm518_vm10, %v4076_v63, %v4062_v22 }
 0x642   : > { %v4775_v24 = vrot.slane %v4077_v20, 4  ;;  %v3165_v21 = vsel %vm518_vm10, %v3164_v44, %v3150_v33  ;;  %v4792_v33 = vld [vmem:[%s8977_s3] sm:$0xf] }
 0x643   : > { %v4763_v36 = vrot.slane %v3165_v21, 4 }
 0x644   : > { %v3348_v42 = vpop.permute.xlu0 %3347  ;;  %v4789_v17 = vsel %vm2383_vm9, %v3847_v25, %v4775_v24 }
 0x645   : > { %v3380_v2 = vpop.permute.xlu1 %3379  ;;  %4834 = vmatprep.subr.mxu1 %v4789_v17  ;;  %v3387_v62 = vsel %vm516_vm8, %v3386_v53, %v3348_v42  ;;  %v4785_v14 = vsel %vm2383_vm9, %v2927_v56, %v4763_v36 }
 0x646   : > { %v3395_v8 = vsel %vm518_vm10, %v3394_v57, %v3380_v2  ;;  %4835 = vmatpush1.msra.mxu1 %v9384_v48 }
 0x647   : > { %v4787_v38 = vsel %vm2383_vm9, %v3395_v8, %v4769_v30 }
 0x648   : > { %4836 = vmatprep.subr.mxu1 %v4787_v38  ;;  %v3122_v32 = vpop.permute.xlu0 %3121 }
 0x649   : > { %v3352_v34 = vpop.permute.xlu1 %3351  ;;  %v3158_v1 = vsel %vm518_vm10, %v3157_v11, %v3122_v32 }
 0x64a   : > { %v3388_v58 = vsel %vm518_vm10, %v3387_v62, %v3352_v34  ;;  %v4762_v37 = vrot.slane %v3158_v1, 4 }
 0x64b   : > { %v4786_v41 = vsel %vm2383_vm9, %v3388_v58, %v4768_v26 }
 0x64c   : > { %4837 = vmatpush1.msra.mxu1 %v4786_v41  ;;  %v4784_v16 = vsel %vm2383_vm9, %v2920_v50, %v4762_v37 }
 0x64d   : > { %4838 = vmatprep.subr.mxu1 %v4785_v14  ;;  %v5017_v46 = vpop.permute.xlu1 %5016 }
 0x64e   : > { %4839 = vmatpush1.msra.mxu1 %v4784_v16  ;;  %v5071_v20 = vsel %vm506_vm3, %v9392_v35, %v5017_v46 }
 0x64f   : > { %5193 = vmatmul.mubr.msk.f32.vlgmr.msra.gmra.mxu1 %vm2399_vm11, %v4792_v33 }
 0x651   : > { %v5021_v22 = vpop.permute.xlu1 %5020 }
 0x652   : > { %v5072_v27 = vsel %vm508_vm4, %v5071_v20, %v5021_v22 }
 0x655   : > { %v4797_v9 = vpop.permute.xlu0 %4796  ;;  %v5025_v63 = vpop.permute.xlu1 %5024 }
 0x656   : > { %v5073_v30 = vsel %vm510_vm5, %v5072_v27, %v5025_v63 }
 0x659   : > { %v5045_v6 = vpop.permute.xlu0 %5044  ;;  %v5029_v29 = vpop.permute.xlu1 %5028 }
 0x65a   : > { %v5078_v28 = vsel %vm506_vm3, %v9393_v45, %v5045_v6  ;;  %v5074_v21 = vsel %vm512_vm6, %v5073_v30, %v5029_v29 }
 0x65d   : > { %v5049_v4 = vpop.permute.xlu0 %5048  ;;  %v5033_v18 = vpop.permute.xlu1 %5032 }
 0x65e   : > { %v5079_v24 = vsel %vm508_vm4, %v5078_v28, %v5049_v4  ;;  %v5075_v60 = vsel %vm514_vm7, %v5074_v21, %v5033_v18 }
 0x661   : > { %v5053_v52 = vpop.permute.xlu0 %5052  ;;  %v5037_v57 = vpop.permute.xlu1 %5036 }
 0x662   : > { %v5080_v25 = vsel %vm510_vm5, %v5079_v24, %v5053_v52  ;;  %v5076_v31 = vsel %vm516_vm8, %v5075_v60, %v5037_v57 }
 0x665   : > { %v5057_v12 = vpop.permute.xlu0 %5056  ;;  %v5041_v42 = vpop.permute.xlu1 %5040 }
 0x666   : > { %v5081_v2 = vsel %vm512_vm6, %v5080_v25, %v5057_v12  ;;  %v5077_v13 = vsel %vm518_vm10, %v5076_v31, %v5041_v42 }
 0x669   : > { %v5061_v44 = vpop.permute.xlu0 %5060 }
 0x66a   : > { %v5082_v40 = vsel %vm514_vm7, %v5081_v2, %v5061_v44 }
 0x66d   : > { %v5065_v54 = vpop.permute.xlu0 %5064 }
 0x66e   : > { %v5083_v17 = vsel %vm516_vm8, %v5082_v40, %v5065_v54 }
 0x671   : > { %v5069_v61 = vpop.permute.xlu0 %5068 }
 0x672   : > { %v5084_v51 = vsel %vm518_vm10, %v5083_v17, %v5069_v61 }
 0x70f   : > { %v4874_v8 = vpop.f32.mrf.mxu1 }
 0x710   : > { %v4875_v49 = vadd.f32 %v4874_v8, %v4797_v9 }
 0x711   : > { %v4876_v43 = vpop.f32.mrf.mxu1 }
 0x712   : > { %v5085_v38 = vadd.f32 %v5077_v13, %v4875_v49  ;;  %v4877_v59 = vadd.f32 %v4876_v43, %v4797_v9 }
 0x714   : > { %v5086_v23 = vadd.f32 %v5084_v51, %v4877_v59  ;;  %v5087_v53 = vmax.f32 %v5085_v38, 0.0 }
 0x716   : > { %v5088_v36 = vmax.f32 %v5086_v23, 0.0 }
 0x718   : > { %v5091_v48 = vcombine.low %v5087_v53, %v5088_v36 }
 0x71a   : > { %5093 = vst [vmem:[%s242_s8] sm:$0xff] %v5091_v48 }
 0x71b   : > { %5347 = shalt.err (!%p5344_p10)
}
 0x71c   : > { %s5348_s28 = scalar_lea.hbm %s5107_s11, 128  ;;  %s5352_s12 = scalar_lea.hbm %s8979_s5, 256 }
 0x71d   : > { %p5349_p0 = scmp.ne.s32.totalorder %s5107_s11, %s5348_s28  ;;  %p5353_p1 = scmp.lt.s32.totalorder %s5107_s11, %s8979_s5 }
 0x71e   : > { %p5354_p3 = scmp.lt.s32.totalorder %s5352_s12, %s5348_s28 }
 0x71f   : > { %p5350_p2 = pnand %p5349_p0, %p9394_p12 }
 0x720   : > { %p5355_p6 = por %p5354_p3, %p5353_p1 }
 0x721   : > { %p5351_p9 = pneg %p5350_p2 }
 0x723   : > { %p5356_p11 = pnand %p5355_p6, %p5351_p9 }
 0x725   : > { %5359 = shalt.err (!%p5356_p11)
}
 0x726   : > { %5203 = dma.vmem_to_hbm [thread:$0]  (%p9394_p12), %s5110_s7, 128, %s5107_s11, %s5095_s13  }
 0x727 PF: > { %s5121_s16 = sand.u32 1, %s5386_s18   ;;  %p9395_p13 = scmp.ne.s32.totalorder %s9081_s6, 0 }
 0x728   : > { %p9396_p4 = scmp.ge.s32.totalorder %s5398_s21, 2  ;;  %s5122_s8 = scalar_lea.sflag [#allocation6], %s5121_s16 }
 0x72a   : > { %p5210_p5 = pnand %p9396_p4, %p9395_p13 }
 0x72c   : > { %p5211_p7 = pneg %p5210_p5 }
 0x72e   : > { %5381 = dma.done.wait (%p5211_p7), %s5122_s8, 128  }
 0x72f   : > { %5383 = vsyncadd (%p5211_p7), %s5122_s8, 4294967168  ;;  %p18_p8 = scmp.ge.s32.totalorder %s5473_s24, 4   ;;  %s9397_s18 = smov %s5390_s19 }
 0x730   : > { %s9398_s19 = smov %s5394_s20  ;;  %s9399_s20 = smov %s5485_s27 }
 0x731   : > { %s9400_s21 = smov %s5473_s24  ;;  %20 = sbr.rel (!%p18_p8) target bundleno = 5 (0x5), region = 85 }
 0x736   :  { %5127 = vsyncpa [#allocation5], 1 }
 0x737   :  { %5129 = vsyncpa [#allocation5 + $0x1], 1 }
 0x738   :  { %5130 = vsyncpa [#allocation6], 1 }
 0x739   :  { %5132 = vsyncpa [#allocation6 + $0x1], 1 }

</bundles_post_ra>
